<compile_context>
chip_gen: v7x
topology: tpu7x:2x2x1
jax: 0.10.0
libtpu: 0.0.40
codegen_flags: <defaults>
</compile_context>

<pallas_src>
import functools

import jax
import jax.numpy as jnp
import numpy as np
from jax.experimental import pallas as pl
from jax.experimental.pallas import tpu as pltpu

EPS = 1e-5
EXPANSION = 4
TM_TARGET = 512          # row-tile target for (M, C) slabs (multiple of 8)
ACC_ROWS_TARGET = 256    # target rows (TH*Wo) of the conv3x3 f32 accumulator

# Generation-aware scoped-VMEM budget: ~3/4 of physical VMEM, capped at 96 MiB
# (-> ~96 MiB on v5e/v6e's 128 MiB, ~48 MiB on v7x's 64 MiB).
try:
    _VMEM_CAP = int(pltpu.get_tpu_info().vmem_capacity_bytes)
except Exception:
    _VMEM_CAP = 64 * 1024 * 1024
VMEM_LIMIT = int(min(_VMEM_CAP * 3 // 4, 96 * 1024 * 1024))


def _cparams(ndims):
    return pltpu.CompilerParams(dimension_semantics=("parallel",) * ndims,
                                vmem_limit_bytes=VMEM_LIMIT)


def _pad128(c):
    return max(128, ((c + 127) // 128) * 128)


def _padvec(v, c):
    return jnp.pad(v.astype(jnp.float32), (0, c - v.shape[0]))


def _row_tiles(m, target=TM_TARGET):
    """Return (row-tile size TM (mult of 8), padded row count Mp)."""
    if m <= target:
        tm = ((m + 7) // 8) * 8
        return tm, tm
    for cand in range(target, 7, -8):       # prefer an exact divisor
        if m % cand == 0:
            return cand, m
    return target, ((m + target - 1) // target) * target   # pad + mask


def _pad_rows(a, mp):
    m = a.shape[0]
    return a if mp == m else jnp.pad(a, ((0, mp - m), (0, 0)))


def _choose_th(ho, wo, target_rows=ACC_ROWS_TARGET):
    """Largest divisor of ho with th*wo <= target accumulator rows."""
    best = 1
    for th in range(1, ho + 1):
        if ho % th == 0 and th * wo <= target_rows:
            best = th
    return best


# --------------------------------------------------------------------------
# Pallas kernels
# --------------------------------------------------------------------------
def _mm_stats_kernel(x_ref, w_ref, y_ref, ps_ref, pss_ref):
    """pass 1: y = x @ w (bf16 MXU, f32 acc); bf16 y + per-tile channel stats."""
    y = jnp.dot(x_ref[...], w_ref[...], preferred_element_type=jnp.float32)
    yb = y.astype(jnp.bfloat16)
    y_ref[...] = yb
    yf = yb.astype(jnp.float32)
    ps_ref[...] = jnp.sum(yf, axis=0)[None, None, :]
    pss_ref[...] = jnp.sum(yf * yf, axis=0)[None, None, :]


def _conv3x3_stats_kernel(x_ref, w_ref, y_ref, ps_ref, pss_ref, *, stride, th):
    """Row-tiled 3x3 conv: 3 packed-tap matmuls (K = 3*C) + channel stats.

    x_ref: (1, nph, Hph, Wph, C) whole-sample stride-phase (or plain padded)
           activation; resident across the row-tile grid axis.
    w_ref: (3, 3*C, Cout) -- for each kh the 3 kw taps stacked along K.
    y_ref: (1, TH, Wo, Cout) output row tile.
    """
    C = x_ref.shape[-1]
    _, TH, Wo, Co = y_ref.shape
    row0 = pl.program_id(1) * th
    if th % 8 == 0:
        row0 = pl.multiple_of(row0, 8)
    acc = jnp.zeros((TH * Wo, Co), jnp.float32)
    for kh in range(3):
        hs = kh // stride
        taps = []
        for kw in range(3):
            ph = (kh % stride) * stride + (kw % stride)
            ws = kw // stride
            taps.append(x_ref[0, ph, pl.ds(row0 + hs, TH), ws:ws + Wo, :])
        lhs = jnp.concatenate(taps, axis=-1).reshape(TH * Wo, 3 * C)
        acc = acc + jnp.dot(lhs, w_ref[kh], preferred_element_type=jnp.float32)
    yb = acc.astype(jnp.bfloat16)
    y_ref[...] = yb.reshape(1, TH, Wo, Co)
    yf = yb.astype(jnp.float32)
    ps_ref[...] = jnp.sum(yf, axis=0)[None, None, :]
    pss_ref[...] = jnp.sum(yf * yf, axis=0)[None, None, :]


def _bn_mm_stats_kernel(y_ref, s_ref, b_ref, w_ref, o_ref, ps_ref, pss_ref,
                        *, tm, m_true):
    """fused: h = relu(y*scale+bias); o = h @ w (bf16 MXU); o + channel stats."""
    h = jnp.maximum(y_ref[...].astype(jnp.float32) * s_ref[...] + b_ref[...], 0.0)
    if m_true is not None:   # zero padded rows so downstream BN stats stay exact
        row = pl.program_id(0) * tm + jax.lax.broadcasted_iota(jnp.int32, h.shape, 0)
        h = jnp.where(row < m_true, h, 0.0)
    z = jnp.dot(h.astype(jnp.bfloat16), w_ref[...],
                preferred_element_type=jnp.float32)
    zb = z.astype(jnp.bfloat16)
    o_ref[...] = zb
    zf = zb.astype(jnp.float32)
    ps_ref[...] = jnp.sum(zf, axis=0)[None, None, :]
    pss_ref[...] = jnp.sum(zf * zf, axis=0)[None, None, :]


def _bn_mm_ds_stats_kernel(y_ref, s_ref, b_ref, w_ref, xs_ref, wd_ref,
                           o_ref, dr_ref, ps_ref, pss_ref, psd_ref, pssd_ref,
                           *, tm, m_true):
    """as above + the fused downsample 1x1 conv (raw) and its channel stats."""
    h = jnp.maximum(y_ref[...].astype(jnp.float32) * s_ref[...] + b_ref[...], 0.0)
    if m_true is not None:
        row = pl.program_id(0) * tm + jax.lax.broadcasted_iota(jnp.int32, h.shape, 0)
        h = jnp.where(row < m_true, h, 0.0)
    z = jnp.dot(h.astype(jnp.bfloat16), w_ref[...],
                preferred_element_type=jnp.float32)
    zb = z.astype(jnp.bfloat16)
    o_ref[...] = zb
    zf = zb.astype(jnp.float32)
    ps_ref[...] = jnp.sum(zf, axis=0)[None, None, :]
    pss_ref[...] = jnp.sum(zf * zf, axis=0)[None, None, :]
    d = jnp.dot(xs_ref[...], wd_ref[...], preferred_element_type=jnp.float32)
    db = d.astype(jnp.bfloat16)
    dr_ref[...] = db
    df = db.astype(jnp.float32)
    psd_ref[...] = jnp.sum(df, axis=0)[None, None, :]
    pssd_ref[...] = jnp.sum(df * df, axis=0)[None, None, :]


def _final_ds_kernel(y3_ref, s3_ref, b3_ref, dr_ref, sd_ref, bd_ref, o_ref):
    a = y3_ref[...].astype(jnp.float32) * s3_ref[...] + b3_ref[...]
    r = dr_ref[...].astype(jnp.float32) * sd_ref[...] + bd_ref[...]
    o_ref[...] = jnp.maximum(a + r, 0.0).astype(o_ref.dtype)


def _final_id_kernel(y3_ref, s3_ref, b3_ref, res_ref, o_ref):
    a = y3_ref[...].astype(jnp.float32) * s3_ref[...] + b3_ref[...]
    o_ref[...] = jnp.maximum(a + res_ref[...].astype(jnp.float32), 0.0
                             ).astype(o_ref.dtype)


# --------------------------------------------------------------------------
# pallas_call wrappers
# --------------------------------------------------------------------------
# TODO(synk): weight BlockSpecs (constant index_map) could use
# pipeline_mode=pl.Buffered(1) to drop their second VMEM buffer on v7x.
def _mm_stats(x2d, w, tm):
    Mp, K = x2d.shape
    C = w.shape[1]
    nT = Mp // tm
    return pl.pallas_call(
        _mm_stats_kernel,
        grid=(nT,),
        in_specs=[pl.BlockSpec((tm, K), lambda i: (i, 0)),
                  pl.BlockSpec((K, C), lambda i: (0, 0))],
        out_specs=[pl.BlockSpec((tm, C), lambda i: (i, 0)),
                   pl.BlockSpec((1, 1, C), lambda i: (i, 0, 0)),
                   pl.BlockSpec((1, 1, C), lambda i: (i, 0, 0))],
        out_shape=[jax.ShapeDtypeStruct((Mp, C), jnp.bfloat16),
                   jax.ShapeDtypeStruct((nT, 1, C), jnp.float32),
                   jax.ShapeDtypeStruct((nT, 1, C), jnp.float32)],
        compiler_params=_cparams(1),
    )(x2d, w)


def _conv3x3_stats(phases, w2, Ho, Wo, stride, th):
    N, nph, Hph, Wph, C = phases.shape
    Co = w2.shape[-1]
    nrt = Ho // th
    kern = functools.partial(_conv3x3_stats_kernel, stride=stride, th=th)
    return pl.pallas_call(
        kern,
        grid=(N, nrt),
        in_specs=[pl.BlockSpec((1, nph, Hph, Wph, C),
                               lambda n, r: (n, 0, 0, 0, 0)),
                  pl.BlockSpec((3, 3 * C, Co), lambda n, r: (0, 0, 0))],
        out_specs=[pl.BlockSpec((1, th, Wo, Co), lambda n, r: (n, r, 0, 0)),
                   pl.BlockSpec((1, 1, Co), lambda n, r: (n * nrt + r, 0, 0)),
                   pl.BlockSpec((1, 1, Co), lambda n, r: (n * nrt + r, 0, 0))],
        out_shape=[jax.ShapeDtypeStruct((N, Ho, Wo, Co), jnp.bfloat16),
                   jax.ShapeDtypeStruct((N * nrt, 1, Co), jnp.float32),
                   jax.ShapeDtypeStruct((N * nrt, 1, Co), jnp.float32)],
        compiler_params=_cparams(2),
    )(phases, w2)


def _stage3_id(y2, scale2, bias2, w3, tm, m_true):
    Mp, Cm = y2.shape
    Co = w3.shape[1]
    nT = Mp // tm
    kern = functools.partial(_bn_mm_stats_kernel, tm=tm, m_true=m_true)
    return pl.pallas_call(
        kern,
        grid=(nT,),
        in_specs=[pl.BlockSpec((tm, Cm), lambda i: (i, 0)),
                  pl.BlockSpec((1, Cm), lambda i: (0, 0)),
                  pl.BlockSpec((1, Cm), lambda i: (0, 0)),
                  pl.BlockSpec((Cm, Co), lambda i: (0, 0))],
        out_specs=[pl.BlockSpec((tm, Co), lambda i: (i, 0)),
                   pl.BlockSpec((1, 1, Co), lambda i: (i, 0, 0)),
                   pl.BlockSpec((1, 1, Co), lambda i: (i, 0, 0))],
        out_shape=[jax.ShapeDtypeStruct((Mp, Co), jnp.bfloat16),
                   jax.ShapeDtypeStruct((nT, 1, Co), jnp.float32),
                   jax.ShapeDtypeStruct((nT, 1, Co), jnp.float32)],
        compiler_params=_cparams(1),
    )(y2, scale2, bias2, w3)


def _stage3_ds(y2, scale2, bias2, w3, xs, wd, tm, m_true):
    Mp, Cm = y2.shape
    Co = w3.shape[1]
    Ci = xs.shape[1]
    nT = Mp // tm
    kern = functools.partial(_bn_mm_ds_stats_kernel, tm=tm, m_true=m_true)
    return pl.pallas_call(
        kern,
        grid=(nT,),
        in_specs=[pl.BlockSpec((tm, Cm), lambda i: (i, 0)),
                  pl.BlockSpec((1, Cm), lambda i: (0, 0)),
                  pl.BlockSpec((1, Cm), lambda i: (0, 0)),
                  pl.BlockSpec((Cm, Co), lambda i: (0, 0)),
                  pl.BlockSpec((tm, Ci), lambda i: (i, 0)),
                  pl.BlockSpec((Ci, Co), lambda i: (0, 0))],
        out_specs=[pl.BlockSpec((tm, Co), lambda i: (i, 0)),
                   pl.BlockSpec((tm, Co), lambda i: (i, 0)),
                   pl.BlockSpec((1, 1, Co), lambda i: (i, 0, 0)),
                   pl.BlockSpec((1, 1, Co), lambda i: (i, 0, 0)),
                   pl.BlockSpec((1, 1, Co), lambda i: (i, 0, 0)),
                   pl.BlockSpec((1, 1, Co), lambda i: (i, 0, 0))],
        out_shape=[jax.ShapeDtypeStruct((Mp, Co), jnp.bfloat16),
                   jax.ShapeDtypeStruct((Mp, Co), jnp.bfloat16),
                   jax.ShapeDtypeStruct((nT, 1, Co), jnp.float32),
                   jax.ShapeDtypeStruct((nT, 1, Co), jnp.float32),
                   jax.ShapeDtypeStruct((nT, 1, Co), jnp.float32),
                   jax.ShapeDtypeStruct((nT, 1, Co), jnp.float32)],
        compiler_params=_cparams(1),
    )(y2, scale2, bias2, w3, xs, wd)


def _final_ds(y3, scale3, bias3, dr, scaled, biasd, tm, out_dtype):
    Mp, Co = y3.shape
    return pl.pallas_call(
        _final_ds_kernel,
        grid=(Mp // tm,),
        in_specs=[pl.BlockSpec((tm, Co), lambda i: (i, 0)),
                  pl.BlockSpec((1, Co), lambda i: (0, 0)),
                  pl.BlockSpec((1, Co), lambda i: (0, 0)),
                  pl.BlockSpec((tm, Co), lambda i: (i, 0)),
                  pl.BlockSpec((1, Co), lambda i: (0, 0)),
                  pl.BlockSpec((1, Co), lambda i: (0, 0))],
        out_specs=pl.BlockSpec((tm, Co), lambda i: (i, 0)),
        out_shape=jax.ShapeDtypeStruct((Mp, Co), out_dtype),
        compiler_params=_cparams(1),
    )(y3, scale3, bias3, dr, scaled, biasd)


def _final_id(y3, scale3, bias3, res, tm, out_dtype):
    Mp, Co = y3.shape
    return pl.pallas_call(
        _final_id_kernel,
        grid=(Mp // tm,),
        in_specs=[pl.BlockSpec((tm, Co), lambda i: (i, 0)),
                  pl.BlockSpec((1, Co), lambda i: (0, 0)),
                  pl.BlockSpec((1, Co), lambda i: (0, 0)),
                  pl.BlockSpec((tm, Co), lambda i: (i, 0))],
        out_specs=pl.BlockSpec((tm, Co), lambda i: (i, 0)),
        out_shape=jax.ShapeDtypeStruct((Mp, Co), out_dtype),
        compiler_params=_cparams(1),
    )(y3, scale3, bias3, res)


# --------------------------------------------------------------------------
# JAX glue: BN folding, stride-phase relayout, parameter plumbing
# --------------------------------------------------------------------------
def _bn_affine(psum, psumsq, count, gamma, beta):
    """Reduce per-tile stats and fold training-mode BN into y*scale + bias."""
    s = jnp.sum(psum, axis=0).reshape(-1)
    ss = jnp.sum(psumsq, axis=0).reshape(-1)
    mean = s / count
    var = jnp.maximum(ss / count - mean * mean, 0.0)
    scale = gamma * jax.lax.rsqrt(var + EPS)
    bias = beta - mean * scale
    return scale.reshape(1, -1), bias.reshape(1, -1)


def _make_phases(img, stride, Ho, Wo):
    """Stride-2 space-to-phase relayout of the 1-padded activation so every
    3x3 tap is a contiguous slice inside the kernel (no HBM im2col)."""
    N, H, W, C = img.shape
    Hph, Wph = Ho + 1, Wo + 1            # halo of one extra phase row/col
    xp = jnp.pad(img, ((0, 0),
                       (1, stride * Hph - (H + 1)),
                       (1, stride * Wph - (W + 1)),
                       (0, 0)))
    xr = xp.reshape(N, Hph, stride, Wph, stride, C)
    xr = jnp.transpose(xr, (0, 2, 4, 1, 3, 5))
    return xr.reshape(N, stride * stride, Hph, Wph, C)


def init_params(key, in_planes, planes):
    out_planes = EXPANSION * planes
    ks = jax.random.split(key, 12)
    norm = lambda k, s: 0.1 * jax.random.normal(k, s, jnp.float32)
    gam = lambda k, c: 1.0 + 0.1 * jax.random.normal(k, (c,), jnp.float32)
    bet = lambda k, c: 0.1 * jax.random.normal(k, (c,), jnp.float32)
    return {
        'w1': norm(ks[0], (planes, in_planes, 1, 1)),
        'g1': gam(ks[1], planes), 'b1': bet(ks[2], planes),
        'w2': norm(ks[3], (planes, planes, 3, 3)),
        'g2': gam(ks[4], planes), 'b2': bet(ks[5], planes),
        'w3': norm(ks[6], (out_planes, planes, 1, 1)),
        'g3': gam(ks[7], out_planes), 'b3': bet(ks[8], out_planes),
        'wd': norm(ks[9], (out_planes, in_planes, 1, 1)),
        'gd': gam(ks[10], out_planes), 'bd': bet(ks[11], out_planes),
    }


def bottleneck_pallas_nhwc(x_nhwc, p, *, stride, out_dtype=jnp.bfloat16):
    """NHWC-in / NHWC-out Bottleneck forward (training-mode BatchNorm)."""
    # TODO(synk): strides > 2 (unused by the FPN Bottleneck) would need a
    # larger stride-phase decomposition in _make_phases.
    assert stride in (1, 2)
    N, H, W, in_planes = x_nhwc.shape
    planes = p['w1'].shape[0]
    out_planes = EXPANSION * planes
    Ci, Cm, Co = _pad128(in_planes), _pad128(planes), _pad128(out_planes)

    x_pad = jnp.pad(x_nhwc, ((0, 0), (0, 0), (0, 0), (0, Ci - in_planes)))

    # packed, channel-padded bf16 weights and f32 BN params
    w1 = jnp.pad(p['w1'].reshape(planes, in_planes).T,
                 ((0, Ci - in_planes), (0, Cm - planes))).astype(jnp.bfloat16)
    # conv2: (O,I,kh,kw) -> (kh,kw,I,O), pad channels, then pack the 3 kw taps
    # of each kh along the contraction so every MXU call has K = 3*Cm >= 384.
    w2 = jnp.transpose(p['w2'], (2, 3, 1, 0))
    w2 = jnp.pad(w2, ((0, 0), (0, 0), (0, Cm - planes), (0, Cm - planes)))
    w2 = w2.reshape(3, 3 * Cm, Cm).astype(jnp.bfloat16)
    w3 = jnp.pad(p['w3'].reshape(out_planes, planes).T,
                 ((0, Cm - planes), (0, Co - out_planes))).astype(jnp.bfloat16)
    g1, b1 = _padvec(p['g1'], Cm), _padvec(p['b1'], Cm)
    g2, b2 = _padvec(p['g2'], Cm), _padvec(p['b2'], Cm)
    g3, b3 = _padvec(p['g3'], Co), _padvec(p['b3'], Co)

    # ---- stage 1: 1x1 conv (matmul + BN1 per-tile stats, single pass) ----
    M1 = N * H * W
    tm1, m1p = _row_tiles(M1)
    x2d = _pad_rows(x_pad.reshape(M1, Ci), m1p).astype(jnp.bfloat16)
    y1raw, s1, ss1 = _mm_stats(x2d, w1, tm1)
    scale1, bias1 = _bn_affine(s1, ss1, M1, g1, b1)

    # ---- BN1 affine + ReLU folded into the conv2-input zero-pad / relayout
    #      (pure XLA elementwise, fuses with the copy -> no extra HBM pass) ----
    y1 = y1raw[:M1].reshape(N, H, W, Cm).astype(jnp.float32)
    y1 = jnp.maximum(y1 * scale1.reshape(1, 1, 1, Cm)
                     + bias1.reshape(1, 1, 1, Cm), 0.0).astype(jnp.bfloat16)

    Ho = (H - 1) // stride + 1
    Wo = (W - 1) // stride + 1
    if stride == 1:
        # plain 1-pad already exposes contiguous tap slices -> no relayout copy
        phases = jnp.pad(y1, ((0, 0), (1, 1), (1, 1), (0, 0)))[:, None]
    else:
        phases = _make_phases(y1, stride, Ho, Wo)

    # ---- stage 2: row-tiled 3x3 conv (packed taps) + BN2 stats ----
    th = _choose_th(Ho, Wo)
    y2, s2, ss2 = _conv3x3_stats(phases, w2, Ho, Wo, stride, th)
    M2 = N * Ho * Wo
    scale2, bias2 = _bn_affine(s2, ss2, M2, g2, b2)

    tm2, m2p = _row_tiles(M2)
    y2flat = _pad_rows(y2.reshape(M2, Cm), m2p)
    m_true = None if m2p == M2 else M2       # mask padded rows in fused kernels

    has_ds = (stride != 1) or (in_planes != out_planes)
    if has_ds:
        wd = jnp.pad(p['wd'].reshape(out_planes, in_planes).T,
                     ((0, Ci - in_planes), (0, Co - out_planes))).astype(jnp.bfloat16)
        gd, bd = _padvec(p['gd'], Co), _padvec(p['bd'], Co)
        xs = _pad_rows(x_pad[:, ::stride, ::stride, :].reshape(M2, Ci),
                       m2p).astype(jnp.bfloat16)
        # fused: BN2 affine+ReLU -> conv3 matmul, plus the downsample 1x1 conv
        y3raw, drraw, s3, ss3, sd, ssd = _stage3_ds(
            y2flat, scale2, bias2, w3, xs, wd, tm2, m_true)
        scale3, bias3 = _bn_affine(s3, ss3, M2, g3, b3)
        scaled, biasd = _bn_affine(sd, ssd, M2, gd, bd)
        out2d = _final_ds(y3raw, scale3, bias3, drraw, scaled, biasd,
                          tm2, out_dtype)
    else:
        y3raw, s3, ss3 = _stage3_id(y2flat, scale2, bias2, w3, tm2, m_true)
        scale3, bias3 = _bn_affine(s3, ss3, M2, g3, b3)
        # identity residual: Ci == Co and M1 == M2, reuse the conv1 input slab
        out2d = _final_id(y3raw, scale3, bias3, x2d, tm2, out_dtype)

    return out2d[:M2, :out_planes].reshape(N, Ho, Wo, out_planes)


def bottleneck_pallas(x_nchw, p, *, stride):
    """NCHW (PyTorch-spec) wrapper.  Chained blocks should call the NHWC core
    directly to avoid the two full-tensor layout transposes per block."""
    x_nhwc = jnp.transpose(x_nchw, (0, 2, 3, 1))
    out = bottleneck_pallas_nhwc(x_nhwc, p, stride=stride)
    return jnp.transpose(out, (0, 3, 1, 2))


# --------------------------------------------------------------------------
# Pure-JAX reference (training-mode BatchNorm, matching the PyTorch forward)
# --------------------------------------------------------------------------
def _bn_train_nchw(y, gamma, beta):
    mean = jnp.mean(y, axis=(0, 2, 3), keepdims=True)
    var = jnp.mean(jnp.square(y - mean), axis=(0, 2, 3), keepdims=True)
    yn = (y - mean) * jax.lax.rsqrt(var + EPS)
    return yn * gamma.reshape(1, -1, 1, 1) + beta.reshape(1, -1, 1, 1)


def bottleneck_ref(x, p, stride):
    dn = ('NCHW', 'OIHW', 'NCHW')
    conv = lambda a, w, s, pad: jax.lax.conv_general_dilated(
        a, w, (s, s), pad, dimension_numbers=dn,
        precision=jax.lax.Precision.HIGHEST)
    out = jax.nn.relu(_bn_train_nchw(conv(x, p['w1'], 1, 'VALID'), p['g1'], p['b1']))
    out = jax.nn.relu(_bn_train_nchw(conv(out, p['w2'], stride, ((1, 1), (1, 1))),
                                     p['g2'], p['b2']))
    out = _bn_train_nchw(conv(out, p['w3'], 1, 'VALID'), p['g3'], p['b3'])
    in_planes, out_planes = x.shape[1], p['w3'].shape[0]
    if stride != 1 or in_planes != out_planes:
        res = _bn_train_nchw(conv(x, p['wd'], stride, 'VALID'), p['gd'], p['bd'])
    else:
        res = x
    return jax.nn.relu(out + res)


if __name__ == "__main__":
    key = jax.random.PRNGKey(0)
    configs = [
        # (N, in_planes, planes, H, W, stride)
        (2, 16, 8, 16, 16, 2),   # downsample path (stride-2 1x1 conv + BN)
        (2, 32, 8, 8, 8, 1),     # identity-residual path
        (1, 32, 8, 32, 32, 1),   # identity path, multiple conv row tiles
        (1, 16, 8, 20, 20, 2),   # downsample path, ragged M2 (padded + masked)
    ]
    for (N, in_planes, planes, H, W, stride) in configs:
        kx, kp, key = jax.random.split(key, 3)
        x = jax.random.normal(kx, (N, in_planes, H, W), jnp.float32)
        params = init_params(kp, in_planes, planes)

        fwd = jax.jit(functools.partial(bottleneck_pallas, stride=stride))
        out = jax.block_until_ready(fwd(x, params))
        ref = bottleneck_ref(x, params, stride)

        out_np = np.asarray(out).astype(np.float32)
        ref_np = np.asarray(ref)
        # bf16 MXU inputs + bf16 intermediates/output vs an f32 HIGHEST reference.
        np.testing.assert_allclose(out_np, ref_np, atol=1e-1, rtol=1e-1)
        assert float(np.mean(np.abs(out_np - ref_np))) < 2e-2
    print("KERNEL_OK")
</pallas_src>

<mosaic_0001>
module attributes {stable_mosaic.version = 11 : i64} {
  func.func @_mm_stats_kernel(%arg0: i32, %arg1: memref<512x128xbf16, #tpu.memory_space<vmem>>, %arg2: memref<128x128xbf16, #tpu.memory_space<vmem>>, %arg3: memref<512x128xbf16, #tpu.memory_space<vmem>>, %arg4: memref<1x1x128xf32, #tpu.memory_space<vmem>>, %arg5: memref<1x1x128xf32, #tpu.memory_space<vmem>>) attributes {dimension_semantics = [#tpu.dimension_semantics<parallel>], iteration_bounds = array<i64: 1>, scalar_prefetch = 0 : i64, scratch_operands = 0 : i64, tpu.core_type = #tpu.core_type<tc>, window_params = [{transform_indices = @transform_0, window_bounds = array<i64: 512, 128>}, {pipeline_mode = #tpu.pipeline_mode<synchronous>, transform_indices = @transform_1, window_bounds = array<i64: 128, 128>}, {transform_indices = @transform_2, window_bounds = array<i64: 512, 128>}, {transform_indices = @transform_3, window_bounds = array<i64: 1, 1, 128>}, {transform_indices = @transform_4, window_bounds = array<i64: 1, 1, 128>}]} {
    %c0 = arith.constant 0 : index
    %c0_0 = arith.constant 0 : index
    %0 = vector.load %arg1[%c0, %c0_0] : memref<512x128xbf16, #tpu.memory_space<vmem>>, vector<512x128xbf16>
    %c0_1 = arith.constant 0 : index
    %c0_2 = arith.constant 0 : index
    %1 = vector.load %arg2[%c0_1, %c0_2] : memref<128x128xbf16, #tpu.memory_space<vmem>>, vector<128x128xbf16>
    %cst = arith.constant dense<0.000000e+00> : vector<512x128xf32>
    %2 = tpu.matmul %0, %1, %cst {dimension_numbers = #tpu.dot_dimension_numbers<[1], [0], [0], [1], [0, 0, 1, 1], [], []>} : vector<512x128xbf16>, vector<128x128xbf16>, vector<512x128xf32> -> vector<512x128xf32>
    %3 = arith.truncf %2 : vector<512x128xf32> to vector<512x128xbf16>
    %c0_3 = arith.constant 0 : index
    %c0_4 = arith.constant 0 : index
    %4 = vector.load %arg3[%c0_3, %c0_4] : memref<512x128xbf16, #tpu.memory_space<vmem>>, vector<512x128xbf16>
    tpu.vector_store %arg3[%c0_3, %c0_4], %3 {strides = array<i32>} : memref<512x128xbf16, #tpu.memory_space<vmem>>, vector<512x128xbf16>,
    %5 = arith.extf %3 : vector<512x128xbf16> to vector<512x128xf32>
    %cst_5 = arith.constant dense<0.000000e+00> : vector<128xf32>
    %6 = vector.multi_reduction <add>, %5, %cst_5 [0] : vector<512x128xf32> to vector<128xf32>
    %7 = vector.shape_cast %6 : vector<128xf32> to vector<1x1x128xf32>
    %c0_6 = arith.constant 0 : index
    %c0_7 = arith.constant 0 : index
    %c0_8 = arith.constant 0 : index
    %8 = vector.load %arg4[%c0_6, %c0_7, %c0_8] : memref<1x1x128xf32, #tpu.memory_space<vmem>>, vector<1x1x128xf32>
    tpu.vector_store %arg4[%c0_6, %c0_7, %c0_8], %7 {strides = array<i32>} : memref<1x1x128xf32, #tpu.memory_space<vmem>>, vector<1x1x128xf32>,
    %9 = arith.mulf %5, %5 : vector<512x128xf32>
    %cst_9 = arith.constant dense<0.000000e+00> : vector<128xf32>
    %10 = vector.multi_reduction <add>, %9, %cst_9 [0] : vector<512x128xf32> to vector<128xf32>
    %11 = vector.shape_cast %10 : vector<128xf32> to vector<1x1x128xf32>
    %c0_10 = arith.constant 0 : index
    %c0_11 = arith.constant 0 : index
    %c0_12 = arith.constant 0 : index
    %12 = vector.load %arg5[%c0_10, %c0_11, %c0_12] : memref<1x1x128xf32, #tpu.memory_space<vmem>>, vector<1x1x128xf32>
    tpu.vector_store %arg5[%c0_10, %c0_11, %c0_12], %11 {strides = array<i32>} : memref<1x1x128xf32, #tpu.memory_space<vmem>>, vector<1x1x128xf32>,
    return
  }
  func.func @transform_0(%arg0: i32) -> (i32, i32) {
    %c0_i32 = arith.constant 0 : i32
    %c0_i32_0 = arith.constant 0 : i32
    return %arg0, %c0_i32 : i32, i32
  }
  func.func @transform_1(%arg0: i32) -> (i32, i32) {
    %c0_i32 = arith.constant 0 : i32
    %c0_i32_0 = arith.constant 0 : i32
    %c0_i32_1 = arith.constant 0 : i32
    return %c0_i32, %c0_i32_0 : i32, i32
  }
  func.func @transform_2(%arg0: i32) -> (i32, i32) {
    %c0_i32 = arith.constant 0 : i32
    %c0_i32_0 = arith.constant 0 : i32
    return %arg0, %c0_i32 : i32, i32
  }
  func.func @transform_3(%arg0: i32) -> (i32, i32, i32) {
    %c0_i32 = arith.constant 0 : i32
    %c0_i32_0 = arith.constant 0 : i32
    %c0_i32_1 = arith.constant 0 : i32
    return %arg0, %c0_i32, %c0_i32_0 : i32, i32, i32
  }
  func.func @transform_4(%arg0: i32) -> (i32, i32, i32) {
    %c0_i32 = arith.constant 0 : i32
    %c0_i32_0 = arith.constant 0 : i32
    %c0_i32_1 = arith.constant 0 : i32
    return %arg0, %c0_i32, %c0_i32_0 : i32, i32, i32
  }
}

module attributes {stable_mosaic.version = 11 : i64} {
  func.func @_conv3x3_stats_kernel(%arg0: i32, %arg1: i32, %arg2: memref<1x4x9x9x128xbf16, #tpu.memory_space<vmem>>, %arg3: memref<3x384x128xbf16, #tpu.memory_space<vmem>>, %arg4: memref<1x8x8x128xbf16, #tpu.memory_space<vmem>>, %arg5: memref<1x1x128xf32, #tpu.memory_space<vmem>>, %arg6: memref<1x1x128xf32, #tpu.memory_space<vmem>>) attributes {dimension_semantics = [#tpu.dimension_semantics<parallel>, #tpu.dimension_semantics<parallel>], iteration_bounds = array<i64: 2, 1>, scalar_prefetch = 0 : i64, scratch_operands = 0 : i64, tpu.core_type = #tpu.core_type<tc>, window_params = [{transform_indices = @transform_0, window_bounds = array<i64: 1, 4, 9, 9, 128>}, {pipeline_mode = #tpu.pipeline_mode<synchronous>, transform_indices = @transform_1, window_bounds = array<i64: 3, 384, 128>}, {transform_indices = @transform_2, window_bounds = array<i64: 1, 8, 8, 128>}, {transform_indices = @transform_3, window_bounds = array<i64: 1, 1, 128>}, {transform_indices = @transform_4, window_bounds = array<i64: 1, 1, 128>}]} {
    %c8_i32 = arith.constant 8 : i32
    %0 = arith.muli %arg1, %c8_i32 : i32
    %1 = tpu.assume_multiple %0, 8 : i32
    %cst = arith.constant 0.000000e+00 : f32
    %2 = vector.broadcast %cst : f32 to vector<64x128xf32>
    %c0_i32 = arith.constant 0 : i32
    %3 = arith.addi %1, %c0_i32 : i32
    %c0 = arith.constant 0 : index
    %c0_0 = arith.constant 0 : index
    %4 = arith.index_cast %3 : i32 to index
    %c0_1 = arith.constant 0 : index
    %c0_2 = arith.constant 0 : index
    %5 = vector.load %arg2[%c0, %c0_0, %4, %c0_1, %c0_2] : memref<1x4x9x9x128xbf16, #tpu.memory_space<vmem>>, vector<1x1x8x8x128xbf16>
    %6 = vector.shape_cast %5 : vector<1x1x8x8x128xbf16> to vector<8x8x128xbf16>
    %c0_i32_3 = arith.constant 0 : i32
    %7 = arith.addi %1, %c0_i32_3 : i32
    %c0_4 = arith.constant 0 : index
    %c1 = arith.constant 1 : index
    %8 = arith.index_cast %7 : i32 to index
    %c0_5 = arith.constant 0 : index
    %c0_6 = arith.constant 0 : index
    %9 = vector.load %arg2[%c0_4, %c1, %8, %c0_5, %c0_6] : memref<1x4x9x9x128xbf16, #tpu.memory_space<vmem>>, vector<1x1x8x8x128xbf16>
    %10 = vector.shape_cast %9 : vector<1x1x8x8x128xbf16> to vector<8x8x128xbf16>
    %c0_i32_7 = arith.constant 0 : i32
    %11 = arith.addi %1, %c0_i32_7 : i32
    %c0_8 = arith.constant 0 : index
    %c0_9 = arith.constant 0 : index
    %12 = arith.index_cast %11 : i32 to index
    %c1_10 = arith.constant 1 : index
    %c0_11 = arith.constant 0 : index
    %13 = vector.load %arg2[%c0_8, %c0_9, %12, %c1_10, %c0_11] : memref<1x4x9x9x128xbf16, #tpu.memory_space<vmem>>, vector<1x1x8x8x128xbf16>
    %14 = vector.shape_cast %13 : vector<1x1x8x8x128xbf16> to vector<8x8x128xbf16>
    %15 = tpu.concatenate %6, %10, %14 in 2 : vector<8x8x128xbf16>, vector<8x8x128xbf16>, vector<8x8x128xbf16> -> vector<8x8x384xbf16>
    %16 = vector.shape_cast %15 : vector<8x8x384xbf16> to vector<64x384xbf16>
    %c0_12 = arith.constant 0 : index
    %c0_13 = arith.constant 0 : index
    %c0_14 = arith.constant 0 : index
    %17 = vector.load %arg3[%c0_12, %c0_13, %c0_14] : memref<3x384x128xbf16, #tpu.memory_space<vmem>>, vector<1x384x128xbf16>
    %18 = vector.shape_cast %17 : vector<1x384x128xbf16> to vector<384x128xbf16>
    %cst_15 = arith.constant dense<0.000000e+00> : vector<64x128xf32>
    %19 = tpu.matmul %16, %18, %cst_15 {dimension_numbers = #tpu.dot_dimension_numbers<[1], [0], [0], [1], [0, 0, 1, 1], [], []>} : vector<64x384xbf16>, vector<384x128xbf16>, vector<64x128xf32> -> vector<64x128xf32>
    %20 = arith.addf %2, %19 : vector<64x128xf32>
    %c0_i32_16 = arith.constant 0 : i32
    %21 = arith.addi %1, %c0_i32_16 : i32
    %c0_17 = arith.constant 0 : index
    %c2 = arith.constant 2 : index
    %22 = arith.index_cast %21 : i32 to index
    %c0_18 = arith.constant 0 : index
    %c0_19 = arith.constant 0 : index
    %23 = vector.load %arg2[%c0_17, %c2, %22, %c0_18, %c0_19] : memref<1x4x9x9x128xbf16, #tpu.memory_space<vmem>>, vector<1x1x8x8x128xbf16>
    %24 = vector.shape_cast %23 : vector<1x1x8x8x128xbf16> to vector<8x8x128xbf16>
    %c0_i32_20 = arith.constant 0 : i32
    %25 = arith.addi %1, %c0_i32_20 : i32
    %c0_21 = arith.constant 0 : index
    %c3 = arith.constant 3 : index
    %26 = arith.index_cast %25 : i32 to index
    %c0_22 = arith.constant 0 : index
    %c0_23 = arith.constant 0 : index
    %27 = vector.load %arg2[%c0_21, %c3, %26, %c0_22, %c0_23] : memref<1x4x9x9x128xbf16, #tpu.memory_space<vmem>>, vector<1x1x8x8x128xbf16>
    %28 = vector.shape_cast %27 : vector<1x1x8x8x128xbf16> to vector<8x8x128xbf16>
    %c0_i32_24 = arith.constant 0 : i32
    %29 = arith.addi %1, %c0_i32_24 : i32
    %c0_25 = arith.constant 0 : index
    %c2_26 = arith.constant 2 : index
    %30 = arith.index_cast %29 : i32 to index
    %c1_27 = arith.constant 1 : index
    %c0_28 = arith.constant 0 : index
    %31 = vector.load %arg2[%c0_25, %c2_26, %30, %c1_27, %c0_28] : memref<1x4x9x9x128xbf16, #tpu.memory_space<vmem>>, vector<1x1x8x8x128xbf16>
    %32 = vector.shape_cast %31 : vector<1x1x8x8x128xbf16> to vector<8x8x128xbf16>
    %33 = tpu.concatenate %24, %28, %32 in 2 : vector<8x8x128xbf16>, vector<8x8x128xbf16>, vector<8x8x128xbf16> -> vector<8x8x384xbf16>
    %34 = vector.shape_cast %33 : vector<8x8x384xbf16> to vector<64x384xbf16>
    %c1_29 = arith.constant 1 : index
    %c0_30 = arith.constant 0 : index
    %c0_31 = arith.constant 0 : index
    %35 = vector.load %arg3[%c1_29, %c0_30, %c0_31] : memref<3x384x128xbf16, #tpu.memory_space<vmem>>, vector<1x384x128xbf16>
    %36 = vector.shape_cast %35 : vector<1x384x128xbf16> to vector<384x128xbf16>
    %cst_32 = arith.constant dense<0.000000e+00> : vector<64x128xf32>
    %37 = tpu.matmul %34, %36, %cst_32 {dimension_numbers = #tpu.dot_dimension_numbers<[1], [0], [0], [1], [0, 0, 1, 1], [], []>} : vector<64x384xbf16>, vector<384x128xbf16>, vector<64x128xf32> -> vector<64x128xf32>
    %38 = arith.addf %20, %37 : vector<64x128xf32>
    %c1_i32 = arith.constant 1 : i32
    %39 = arith.addi %1, %c1_i32 : i32
    %c0_33 = arith.constant 0 : index
    %c0_34 = arith.constant 0 : index
    %40 = arith.index_cast %39 : i32 to index
    %c0_35 = arith.constant 0 : index
    %c0_36 = arith.constant 0 : index
    %41 = vector.load %arg2[%c0_33, %c0_34, %40, %c0_35, %c0_36] : memref<1x4x9x9x128xbf16, #tpu.memory_space<vmem>>, vector<1x1x8x8x128xbf16>
    %42 = vector.shape_cast %41 : vector<1x1x8x8x128xbf16> to vector<8x8x128xbf16>
    %c1_i32_37 = arith.constant 1 : i32
    %43 = arith.addi %1, %c1_i32_37 : i32
    %c0_38 = arith.constant 0 : index
    %c1_39 = arith.constant 1 : index
    %44 = arith.index_cast %43 : i32 to index
    %c0_40 = arith.constant 0 : index
    %c0_41 = arith.constant 0 : index
    %45 = vector.load %arg2[%c0_38, %c1_39, %44, %c0_40, %c0_41] : memref<1x4x9x9x128xbf16, #tpu.memory_space<vmem>>, vector<1x1x8x8x128xbf16>
    %46 = vector.shape_cast %45 : vector<1x1x8x8x128xbf16> to vector<8x8x128xbf16>
    %c1_i32_42 = arith.constant 1 : i32
    %47 = arith.addi %1, %c1_i32_42 : i32
    %c0_43 = arith.constant 0 : index
    %c0_44 = arith.constant 0 : index
    %48 = arith.index_cast %47 : i32 to index
    %c1_45 = arith.constant 1 : index
    %c0_46 = arith.constant 0 : index
    %49 = vector.load %arg2[%c0_43, %c0_44, %48, %c1_45, %c0_46] : memref<1x4x9x9x128xbf16, #tpu.memory_space<vmem>>, vector<1x1x8x8x128xbf16>
    %50 = vector.shape_cast %49 : vector<1x1x8x8x128xbf16> to vector<8x8x128xbf16>
    %51 = tpu.concatenate %42, %46, %50 in 2 : vector<8x8x128xbf16>, vector<8x8x128xbf16>, vector<8x8x128xbf16> -> vector<8x8x384xbf16>
    %52 = vector.shape_cast %51 : vector<8x8x384xbf16> to vector<64x384xbf16>
    %c2_47 = arith.constant 2 : index
    %c0_48 = arith.constant 0 : index
    %c0_49 = arith.constant 0 : index
    %53 = vector.load %arg3[%c2_47, %c0_48, %c0_49] : memref<3x384x128xbf16, #tpu.memory_space<vmem>>, vector<1x384x128xbf16>
    %54 = vector.shape_cast %53 : vector<1x384x128xbf16> to vector<384x128xbf16>
    %cst_50 = arith.constant dense<0.000000e+00> : vector<64x128xf32>
    %55 = tpu.matmul %52, %54, %cst_50 {dimension_numbers = #tpu.dot_dimension_numbers<[1], [0], [0], [1], [0, 0, 1, 1], [], []>} : vector<64x384xbf16>, vector<384x128xbf16>, vector<64x128xf32> -> vector<64x128xf32>
    %56 = arith.addf %38, %55 : vector<64x128xf32>
    %57 = arith.truncf %56 : vector<64x128xf32> to vector<64x128xbf16>
    %58 = vector.shape_cast %57 : vector<64x128xbf16> to vector<1x8x8x128xbf16>
    %c0_51 = arith.constant 0 : index
    %c0_52 = arith.constant 0 : index
    %c0_53 = arith.constant 0 : index
    %c0_54 = arith.constant 0 : index
    %59 = vector.load %arg4[%c0_51, %c0_52, %c0_53, %c0_54] : memref<1x8x8x128xbf16, #tpu.memory_space<vmem>>, vector<1x8x8x128xbf16>
    tpu.vector_store %arg4[%c0_51, %c0_52, %c0_53, %c0_54], %58 {strides = array<i32>} : memref<1x8x8x128xbf16, #tpu.memory_space<vmem>>, vector<1x8x8x128xbf16>,
    %60 = arith.extf %57 : vector<64x128xbf16> to vector<64x128xf32>
    %cst_55 = arith.constant dense<0.000000e+00> : vector<128xf32>
    %61 = vector.multi_reduction <add>, %60, %cst_55 [0] : vector<64x128xf32> to vector<128xf32>
    %62 = vector.shape_cast %61 : vector<128xf32> to vector<1x1x128xf32>
    %c0_56 = arith.constant 0 : index
    %c0_57 = arith.constant 0 : index
    %c0_58 = arith.constant 0 : index
    %63 = vector.load %arg5[%c0_56, %c0_57, %c0_58] : memref<1x1x128xf32, #tpu.memory_space<vmem>>, vector<1x1x128xf32>
    tpu.vector_store %arg5[%c0_56, %c0_57, %c0_58], %62 {strides = array<i32>} : memref<1x1x128xf32, #tpu.memory_space<vmem>>, vector<1x1x128xf32>,
    %64 = arith.mulf %60, %60 : vector<64x128xf32>
    %cst_59 = arith.constant dense<0.000000e+00> : vector<128xf32>
    %65 = vector.multi_reduction <add>, %64, %cst_59 [0] : vector<64x128xf32> to vector<128xf32>
    %66 = vector.shape_cast %65 : vector<128xf32> to vector<1x1x128xf32>
    %c0_60 = arith.constant 0 : index
    %c0_61 = arith.constant 0 : index
    %c0_62 = arith.constant 0 : index
    %67 = vector.load %arg6[%c0_60, %c0_61, %c0_62] : memref<1x1x128xf32, #tpu.memory_space<vmem>>, vector<1x1x128xf32>
    tpu.vector_store %arg6[%c0_60, %c0_61, %c0_62], %66 {strides = array<i32>} : memref<1x1x128xf32, #tpu.memory_space<vmem>>, vector<1x1x128xf32>,
    return
  }
  func.func @transform_0(%arg0: i32, %arg1: i32) -> (i32, i32, i32, i32, i32) {
    %c0_i32 = arith.constant 0 : i32
    %c0_i32_0 = arith.constant 0 : i32
    %c0_i32_1 = arith.constant 0 : i32
    %c0_i32_2 = arith.constant 0 : i32
    %c0_i32_3 = arith.constant 0 : i32
    return %arg0, %c0_i32, %c0_i32_0, %c0_i32_1, %c0_i32_2 : i32, i32, i32, i32, i32
  }
  func.func @transform_1(%arg0: i32, %arg1: i32) -> (i32, i32, i32) {
    %c0_i32 = arith.constant 0 : i32
    %c0_i32_0 = arith.constant 0 : i32
    %c0_i32_1 = arith.constant 0 : i32
    %c0_i32_2 = arith.constant 0 : i32
    return %c0_i32, %c0_i32_0, %c0_i32_1 : i32, i32, i32
  }
  func.func @transform_2(%arg0: i32, %arg1: i32) -> (i32, i32, i32, i32) {
    %c0_i32 = arith.constant 0 : i32
    %c0_i32_0 = arith.constant 0 : i32
    %c0_i32_1 = arith.constant 0 : i32
    return %arg0, %arg1, %c0_i32, %c0_i32_0 : i32, i32, i32, i32
  }
  func.func @transform_3(%arg0: i32, %arg1: i32) -> (i32, i32, i32) {
    %c1_i32 = arith.constant 1 : i32
    %0 = arith.muli %arg0, %c1_i32 : i32
    %1 = arith.addi %0, %arg1 : i32
    %c0_i32 = arith.constant 0 : i32
    %c0_i32_0 = arith.constant 0 : i32
    %c0_i32_1 = arith.constant 0 : i32
    return %1, %c0_i32, %c0_i32_0 : i32, i32, i32
  }
  func.func @transform_4(%arg0: i32, %arg1: i32) -> (i32, i32, i32) {
    %c1_i32 = arith.constant 1 : i32
    %0 = arith.muli %arg0, %c1_i32 : i32
    %1 = arith.addi %0, %arg1 : i32
    %c0_i32 = arith.constant 0 : i32
    %c0_i32_0 = arith.constant 0 : i32
    %c0_i32_1 = arith.constant 0 : i32
    return %1, %c0_i32, %c0_i32_0 : i32, i32, i32
  }
}

module attributes {stable_mosaic.version = 11 : i64} {
  func.func @_bn_mm_ds_stats_kernel(%arg0: i32, %arg1: memref<128x128xbf16, #tpu.memory_space<vmem>>, %arg2: memref<1x128xf32, #tpu.memory_space<vmem>>, %arg3: memref<1x128xf32, #tpu.memory_space<vmem>>, %arg4: memref<128x128xbf16, #tpu.memory_space<vmem>>, %arg5: memref<128x128xbf16, #tpu.memory_space<vmem>>, %arg6: memref<128x128xbf16, #tpu.memory_space<vmem>>, %arg7: memref<128x128xbf16, #tpu.memory_space<vmem>>, %arg8: memref<128x128xbf16, #tpu.memory_space<vmem>>, %arg9: memref<1x1x128xf32, #tpu.memory_space<vmem>>, %arg10: memref<1x1x128xf32, #tpu.memory_space<vmem>>, %arg11: memref<1x1x128xf32, #tpu.memory_space<vmem>>, %arg12: memref<1x1x128xf32, #tpu.memory_space<vmem>>) attributes {dimension_semantics = [#tpu.dimension_semantics<parallel>], iteration_bounds = array<i64: 1>, scalar_prefetch = 0 : i64, scratch_operands = 0 : i64, tpu.core_type = #tpu.core_type<tc>, window_params = [{transform_indices = @transform_0, window_bounds = array<i64: 128, 128>}, {pipeline_mode = #tpu.pipeline_mode<synchronous>, transform_indices = @transform_1, window_bounds = array<i64: 1, 128>}, {pipeline_mode = #tpu.pipeline_mode<synchronous>, transform_indices = @transform_2, window_bounds = array<i64: 1, 128>}, {pipeline_mode = #tpu.pipeline_mode<synchronous>, transform_indices = @transform_3, window_bounds = array<i64: 128, 128>}, {transform_indices = @transform_4, window_bounds = array<i64: 128, 128>}, {pipeline_mode = #tpu.pipeline_mode<synchronous>, transform_indices = @transform_5, window_bounds = array<i64: 128, 128>}, {transform_indices = @transform_6, window_bounds = array<i64: 128, 128>}, {transform_indices = @transform_7, window_bounds = array<i64: 128, 128>}, {transform_indices = @transform_8, window_bounds = array<i64: 1, 1, 128>}, {transform_indices = @transform_9, window_bounds = array<i64: 1, 1, 128>}, {transform_indices = @transform_10, window_bounds = array<i64: 1, 1, 128>}, {transform_indices = @transform_11, window_bounds = array<i64: 1, 1, 128>}]} {
    %c0 = arith.constant 0 : index
    %c0_0 = arith.constant 0 : index
    %0 = vector.load %arg1[%c0, %c0_0] : memref<128x128xbf16, #tpu.memory_space<vmem>>, vector<128x128xbf16>
    %1 = arith.extf %0 : vector<128x128xbf16> to vector<128x128xf32>
    %c0_1 = arith.constant 0 : index
    %c0_2 = arith.constant 0 : index
    %2 = vector.load %arg2[%c0_1, %c0_2] : memref<1x128xf32, #tpu.memory_space<vmem>>, vector<1x128xf32>
    %3 = vector.broadcast %2 : vector<1x128xf32> to vector<128x128xf32>
    %4 = arith.mulf %1, %3 : vector<128x128xf32>
    %c0_3 = arith.constant 0 : index
    %c0_4 = arith.constant 0 : index
    %5 = vector.load %arg3[%c0_3, %c0_4] : memref<1x128xf32, #tpu.memory_space<vmem>>, vector<1x128xf32>
    %6 = vector.broadcast %5 : vector<1x128xf32> to vector<128x128xf32>
    %7 = arith.addf %4, %6 : vector<128x128xf32>
    %cst = arith.constant 0.000000e+00 : f32
    %8 = vector.broadcast %cst : f32 to vector<128x128xf32>
    %9 = arith.maximumf %7, %8 : vector<128x128xf32>
    %10 = arith.truncf %9 : vector<128x128xf32> to vector<128x128xbf16>
    %c0_5 = arith.constant 0 : index
    %c0_6 = arith.constant 0 : index
    %11 = vector.load %arg4[%c0_5, %c0_6] : memref<128x128xbf16, #tpu.memory_space<vmem>>, vector<128x128xbf16>
    %cst_7 = arith.constant dense<0.000000e+00> : vector<128x128xf32>
    %12 = tpu.matmul %10, %11, %cst_7 {dimension_numbers = #tpu.dot_dimension_numbers<[1], [0], [0], [1], [0, 0, 1, 1], [], []>} : vector<128x128xbf16>, vector<128x128xbf16>, vector<128x128xf32> -> vector<128x128xf32>
    %13 = arith.truncf %12 : vector<128x128xf32> to vector<128x128xbf16>
    %c0_8 = arith.constant 0 : index
    %c0_9 = arith.constant 0 : index
    %14 = vector.load %arg7[%c0_8, %c0_9] : memref<128x128xbf16, #tpu.memory_space<vmem>>, vector<128x128xbf16>
    tpu.vector_store %arg7[%c0_8, %c0_9], %13 {strides = array<i32>} : memref<128x128xbf16, #tpu.memory_space<vmem>>, vector<128x128xbf16>,
    %15 = arith.extf %13 : vector<128x128xbf16> to vector<128x128xf32>
    %cst_10 = arith.constant dense<0.000000e+00> : vector<128xf32>
    %16 = vector.multi_reduction <add>, %15, %cst_10 [0] : vector<128x128xf32> to vector<128xf32>
    %17 = vector.shape_cast %16 : vector<128xf32> to vector<1x1x128xf32>
    %c0_11 = arith.constant 0 : index
    %c0_12 = arith.constant 0 : index
    %c0_13 = arith.constant 0 : index
    %18 = vector.load %arg9[%c0_11, %c0_12, %c0_13] : memref<1x1x128xf32, #tpu.memory_space<vmem>>, vector<1x1x128xf32>
    tpu.vector_store %arg9[%c0_11, %c0_12, %c0_13], %17 {strides = array<i32>} : memref<1x1x128xf32, #tpu.memory_space<vmem>>, vector<1x1x128xf32>,
    %19 = arith.mulf %15, %15 : vector<128x128xf32>
    %cst_14 = arith.constant dense<0.000000e+00> : vector<128xf32>
    %20 = vector.multi_reduction <add>, %19, %cst_14 [0] : vector<128x128xf32> to vector<128xf32>
    %21 = vector.shape_cast %20 : vector<128xf32> to vector<1x1x128xf32>
    %c0_15 = arith.constant 0 : index
    %c0_16 = arith.constant 0 : index
    %c0_17 = arith.constant 0 : index
    %22 = vector.load %arg10[%c0_15, %c0_16, %c0_17] : memref<1x1x128xf32, #tpu.memory_space<vmem>>, vector<1x1x128xf32>
    tpu.vector_store %arg10[%c0_15, %c0_16, %c0_17], %21 {strides = array<i32>} : memref<1x1x128xf32, #tpu.memory_space<vmem>>, vector<1x1x128xf32>,
    %c0_18 = arith.constant 0 : index
    %c0_19 = arith.constant 0 : index
    %23 = vector.load %arg5[%c0_18, %c0_19] : memref<128x128xbf16, #tpu.memory_space<vmem>>, vector<128x128xbf16>
    %c0_20 = arith.constant 0 : index
    %c0_21 = arith.constant 0 : index
    %24 = vector.load %arg6[%c0_20, %c0_21] : memref<128x128xbf16, #tpu.memory_space<vmem>>, vector<128x128xbf16>
    %cst_22 = arith.constant dense<0.000000e+00> : vector<128x128xf32>
    %25 = tpu.matmul %23, %24, %cst_22 {dimension_numbers = #tpu.dot_dimension_numbers<[1], [0], [0], [1], [0, 0, 1, 1], [], []>} : vector<128x128xbf16>, vector<128x128xbf16>, vector<128x128xf32> -> vector<128x128xf32>
    %26 = arith.truncf %25 : vector<128x128xf32> to vector<128x128xbf16>
    %c0_23 = arith.constant 0 : index
    %c0_24 = arith.constant 0 : index
    %27 = vector.load %arg8[%c0_23, %c0_24] : memref<128x128xbf16, #tpu.memory_space<vmem>>, vector<128x128xbf16>
    tpu.vector_store %arg8[%c0_23, %c0_24], %26 {strides = array<i32>} : memref<128x128xbf16, #tpu.memory_space<vmem>>, vector<128x128xbf16>,
    %28 = arith.extf %26 : vector<128x128xbf16> to vector<128x128xf32>
    %cst_25 = arith.constant dense<0.000000e+00> : vector<128xf32>
    %29 = vector.multi_reduction <add>, %28, %cst_25 [0] : vector<128x128xf32> to vector<128xf32>
    %30 = vector.shape_cast %29 : vector<128xf32> to vector<1x1x128xf32>
    %c0_26 = arith.constant 0 : index
    %c0_27 = arith.constant 0 : index
    %c0_28 = arith.constant 0 : index
    %31 = vector.load %arg11[%c0_26, %c0_27, %c0_28] : memref<1x1x128xf32, #tpu.memory_space<vmem>>, vector<1x1x128xf32>
    tpu.vector_store %arg11[%c0_26, %c0_27, %c0_28], %30 {strides = array<i32>} : memref<1x1x128xf32, #tpu.memory_space<vmem>>, vector<1x1x128xf32>,
    %32 = arith.mulf %28, %28 : vector<128x128xf32>
    %cst_29 = arith.constant dense<0.000000e+00> : vector<128xf32>
    %33 = vector.multi_reduction <add>, %32, %cst_29 [0] : vector<128x128xf32> to vector<128xf32>
    %34 = vector.shape_cast %33 : vector<128xf32> to vector<1x1x128xf32>
    %c0_30 = arith.constant 0 : index
    %c0_31 = arith.constant 0 : index
    %c0_32 = arith.constant 0 : index
    %35 = vector.load %arg12[%c0_30, %c0_31, %c0_32] : memref<1x1x128xf32, #tpu.memory_space<vmem>>, vector<1x1x128xf32>
    tpu.vector_store %arg12[%c0_30, %c0_31, %c0_32], %34 {strides = array<i32>} : memref<1x1x128xf32, #tpu.memory_space<vmem>>, vector<1x1x128xf32>,
    return
  }
  func.func @transform_0(%arg0: i32) -> (i32, i32) {
    %c0_i32 = arith.constant 0 : i32
    %c0_i32_0 = arith.constant 0 : i32
    return %arg0, %c0_i32 : i32, i32
  }
  func.func @transform_1(%arg0: i32) -> (i32, i32) {
    %c0_i32 = arith.constant 0 : i32
    %c0_i32_0 = arith.constant 0 : i32
    %c0_i32_1 = arith.constant 0 : i32
    return %c0_i32, %c0_i32_0 : i32, i32
  }
  func.func @transform_2(%arg0: i32) -> (i32, i32) {
    %c0_i32 = arith.constant 0 : i32
    %c0_i32_0 = arith.constant 0 : i32
    %c0_i32_1 = arith.constant 0 : i32
    return %c0_i32, %c0_i32_0 : i32, i32
  }
  func.func @transform_3(%arg0: i32) -> (i32, i32) {
    %c0_i32 = arith.constant 0 : i32
    %c0_i32_0 = arith.constant 0 : i32
    %c0_i32_1 = arith.constant 0 : i32
    return %c0_i32, %c0_i32_0 : i32, i32
  }
  func.func @transform_4(%arg0: i32) -> (i32, i32) {
    %c0_i32 = arith.constant 0 : i32
    %c0_i32_0 = arith.constant 0 : i32
    return %arg0, %c0_i32 : i32, i32
  }
  func.func @transform_5(%arg0: i32) -> (i32, i32) {
    %c0_i32 = arith.constant 0 : i32
    %c0_i32_0 = arith.constant 0 : i32
    %c0_i32_1 = arith.constant 0 : i32
    return %c0_i32, %c0_i32_0 : i32, i32
  }
  func.func @transform_6(%arg0: i32) -> (i32, i32) {
    %c0_i32 = arith.constant 0 : i32
    %c0_i32_0 = arith.constant 0 : i32
    return %arg0, %c0_i32 : i32, i32
  }
  func.func @transform_7(%arg0: i32) -> (i32, i32) {
    %c0_i32 = arith.constant 0 : i32
    %c0_i32_0 = arith.constant 0 : i32
    return %arg0, %c0_i32 : i32, i32
  }
  func.func @transform_8(%arg0: i32) -> (i32, i32, i32) {
    %c0_i32 = arith.constant 0 : i32
    %c0_i32_0 = arith.constant 0 : i32
    %c0_i32_1 = arith.constant 0 : i32
    return %arg0, %c0_i32, %c0_i32_0 : i32, i32, i32
  }
  func.func @transform_9(%arg0: i32) -> (i32, i32, i32) {
    %c0_i32 = arith.constant 0 : i32
    %c0_i32_0 = arith.constant 0 : i32
    %c0_i32_1 = arith.constant 0 : i32
    return %arg0, %c0_i32, %c0_i32_0 : i32, i32, i32
  }
  func.func @transform_10(%arg0: i32) -> (i32, i32, i32) {
    %c0_i32 = arith.constant 0 : i32
    %c0_i32_0 = arith.constant 0 : i32
    %c0_i32_1 = arith.constant 0 : i32
    return %arg0, %c0_i32, %c0_i32_0 : i32, i32, i32
  }
  func.func @transform_11(%arg0: i32) -> (i32, i32, i32) {
    %c0_i32 = arith.constant 0 : i32
    %c0_i32_0 = arith.constant 0 : i32
    %c0_i32_1 = arith.constant 0 : i32
    return %arg0, %c0_i32, %c0_i32_0 : i32, i32, i32
  }
}

module attributes {stable_mosaic.version = 11 : i64} {
  func.func @_final_ds_kernel(%arg0: i32, %arg1: memref<128x128xbf16, #tpu.memory_space<vmem>>, %arg2: memref<1x128xf32, #tpu.memory_space<vmem>>, %arg3: memref<1x128xf32, #tpu.memory_space<vmem>>, %arg4: memref<128x128xbf16, #tpu.memory_space<vmem>>, %arg5: memref<1x128xf32, #tpu.memory_space<vmem>>, %arg6: memref<1x128xf32, #tpu.memory_space<vmem>>, %arg7: memref<128x128xbf16, #tpu.memory_space<vmem>>) attributes {dimension_semantics = [#tpu.dimension_semantics<parallel>], iteration_bounds = array<i64: 1>, scalar_prefetch = 0 : i64, scratch_operands = 0 : i64, tpu.core_type = #tpu.core_type<tc>, window_params = [{transform_indices = @transform_0, window_bounds = array<i64: 128, 128>}, {pipeline_mode = #tpu.pipeline_mode<synchronous>, transform_indices = @transform_1, window_bounds = array<i64: 1, 128>}, {pipeline_mode = #tpu.pipeline_mode<synchronous>, transform_indices = @transform_2, window_bounds = array<i64: 1, 128>}, {transform_indices = @transform_3, window_bounds = array<i64: 128, 128>}, {pipeline_mode = #tpu.pipeline_mode<synchronous>, transform_indices = @transform_4, window_bounds = array<i64: 1, 128>}, {pipeline_mode = #tpu.pipeline_mode<synchronous>, transform_indices = @transform_5, window_bounds = array<i64: 1, 128>}, {transform_indices = @transform_6, window_bounds = array<i64: 128, 128>}]} {
    %c0 = arith.constant 0 : index
    %c0_0 = arith.constant 0 : index
    %0 = vector.load %arg1[%c0, %c0_0] : memref<128x128xbf16, #tpu.memory_space<vmem>>, vector<128x128xbf16>
    %1 = arith.extf %0 : vector<128x128xbf16> to vector<128x128xf32>
    %c0_1 = arith.constant 0 : index
    %c0_2 = arith.constant 0 : index
    %2 = vector.load %arg2[%c0_1, %c0_2] : memref<1x128xf32, #tpu.memory_space<vmem>>, vector<1x128xf32>
    %3 = vector.broadcast %2 : vector<1x128xf32> to vector<128x128xf32>
    %4 = arith.mulf %1, %3 : vector<128x128xf32>
    %c0_3 = arith.constant 0 : index
    %c0_4 = arith.constant 0 : index
    %5 = vector.load %arg3[%c0_3, %c0_4] : memref<1x128xf32, #tpu.memory_space<vmem>>, vector<1x128xf32>
    %6 = vector.broadcast %5 : vector<1x128xf32> to vector<128x128xf32>
    %7 = arith.addf %4, %6 : vector<128x128xf32>
    %c0_5 = arith.constant 0 : index
    %c0_6 = arith.constant 0 : index
    %8 = vector.load %arg4[%c0_5, %c0_6] : memref<128x128xbf16, #tpu.memory_space<vmem>>, vector<128x128xbf16>
    %9 = arith.extf %8 : vector<128x128xbf16> to vector<128x128xf32>
    %c0_7 = arith.constant 0 : index
    %c0_8 = arith.constant 0 : index
    %10 = vector.load %arg5[%c0_7, %c0_8] : memref<1x128xf32, #tpu.memory_space<vmem>>, vector<1x128xf32>
    %11 = vector.broadcast %10 : vector<1x128xf32> to vector<128x128xf32>
    %12 = arith.mulf %9, %11 : vector<128x128xf32>
    %c0_9 = arith.constant 0 : index
    %c0_10 = arith.constant 0 : index
    %13 = vector.load %arg6[%c0_9, %c0_10] : memref<1x128xf32, #tpu.memory_space<vmem>>, vector<1x128xf32>
    %14 = vector.broadcast %13 : vector<1x128xf32> to vector<128x128xf32>
    %15 = arith.addf %12, %14 : vector<128x128xf32>
    %16 = arith.addf %7, %15 : vector<128x128xf32>
    %cst = arith.constant 0.000000e+00 : f32
    %17 = vector.broadcast %cst : f32 to vector<128x128xf32>
    %18 = arith.maximumf %16, %17 : vector<128x128xf32>
    %19 = arith.truncf %18 : vector<128x128xf32> to vector<128x128xbf16>
    %c0_11 = arith.constant 0 : index
    %c0_12 = arith.constant 0 : index
    %20 = vector.load %arg7[%c0_11, %c0_12] : memref<128x128xbf16, #tpu.memory_space<vmem>>, vector<128x128xbf16>
    tpu.vector_store %arg7[%c0_11, %c0_12], %19 {strides = array<i32>} : memref<128x128xbf16, #tpu.memory_space<vmem>>, vector<128x128xbf16>,
    return
  }
  func.func @transform_0(%arg0: i32) -> (i32, i32) {
    %c0_i32 = arith.constant 0 : i32
    %c0_i32_0 = arith.constant 0 : i32
    return %arg0, %c0_i32 : i32, i32
  }
  func.func @transform_1(%arg0: i32) -> (i32, i32) {
    %c0_i32 = arith.constant 0 : i32
    %c0_i32_0 = arith.constant 0 : i32
    %c0_i32_1 = arith.constant 0 : i32
    return %c0_i32, %c0_i32_0 : i32, i32
  }
  func.func @transform_2(%arg0: i32) -> (i32, i32) {
    %c0_i32 = arith.constant 0 : i32
    %c0_i32_0 = arith.constant 0 : i32
    %c0_i32_1 = arith.constant 0 : i32
    return %c0_i32, %c0_i32_0 : i32, i32
  }
  func.func @transform_3(%arg0: i32) -> (i32, i32) {
    %c0_i32 = arith.constant 0 : i32
    %c0_i32_0 = arith.constant 0 : i32
    return %arg0, %c0_i32 : i32, i32
  }
  func.func @transform_4(%arg0: i32) -> (i32, i32) {
    %c0_i32 = arith.constant 0 : i32
    %c0_i32_0 = arith.constant 0 : i32
    %c0_i32_1 = arith.constant 0 : i32
    return %c0_i32, %c0_i32_0 : i32, i32
  }
  func.func @transform_5(%arg0: i32) -> (i32, i32) {
    %c0_i32 = arith.constant 0 : i32
    %c0_i32_0 = arith.constant 0 : i32
    %c0_i32_1 = arith.constant 0 : i32
    return %c0_i32, %c0_i32_0 : i32, i32
  }
  func.func @transform_6(%arg0: i32) -> (i32, i32) {
    %c0_i32 = arith.constant 0 : i32
    %c0_i32_0 = arith.constant 0 : i32
    return %arg0, %c0_i32 : i32, i32
  }
}

</mosaic_0001>

<bundles_post_ra>
// kernel: bottleneck_pallas.4
= control target key start
LH: loop header
LB: loop body
LE: loop exit
PB: predicated region body
PF: predicated region fallthrough
CT: control target
= control target key end

     0   :  { %s2086_s1 = inlined_call_operand.vmem [shape: bf16[128,128], index: 1, kind: input, shape index: {}]   ;;  %s2087_s0 = inlined_call_operand.vmem [shape: bf16[512,128], index: 0, kind: input, shape index: {}]   ;;  %s2088_s2 = inlined_call_operand.vmem [shape: bf16[512,128], index: 2, kind: output, shape index: {0}]   ;;  %s2089_s3 = inlined_call_operand.vmem [shape: f32[1,1,128], index: 3, kind: output, shape index: {1}]   ;;  %s2090_s4 = inlined_call_operand.vmem [shape: f32[1,1,128], index: 4, kind: output, shape index: {2}]  }
   0x1   :  { %v1719_v0 = vld [vmem:[%s2086_s1] sm:$0xff]   ;;  %v1720_v1 = vld [vmem:[%s2086_s1 + $0x8] sm:$0xff]   ;;  %v1721_v2 = vld [vmem:[%s2086_s1 + $0x10] sm:$0xff]  }
   0x2   :  { %1623 = vmatprep.subr.bf16.mxu0 %v1719_v0  ;;  %1703 = vmatprep.subr.bf16.mxu1 %v1719_v0  ;;  %v1722_v3 = vld [vmem:[%s2086_s1 + $0x18] sm:$0xff]   ;;  %v1727_v4 = vld [vmem:[%s2087_s0] sm:$0xff]   ;;  %v1724_v6 = vld [vmem:[%s2086_s1 + $0x28] sm:$0xff]  }
   0x3   :  { %1624 = vmatpush3.bf16.msra.mxu0 %v1719_v0  ;;  %1711 = vmatpush3.bf16.msra.mxu1 %v1719_v0  ;;  %v1723_v5 = vld [vmem:[%s2086_s1 + $0x20] sm:$0xff]   ;;  %v1725_v7 = vld [vmem:[%s2086_s1 + $0x30] sm:$0xff]   ;;  %v1726_v8 = vld [vmem:[%s2086_s1 + $0x38] sm:$0xff]  }
   0x4   :  { %1625 = vmatprep.subr.bf16.mxu0 %v1720_v1  ;;  %1704 = vmatprep.subr.bf16.mxu1 %v1720_v1  ;;  %v1743_v9 = vld [vmem:[%s2087_s0 + $0x80] sm:$0xff]   ;;  %v1728_v10 = vld [vmem:[%s2087_s0 + $0x8] sm:$0xff]   ;;  %v1729_v11 = vld [vmem:[%s2087_s0 + $0x10] sm:$0xff]  }
   0x5   :  { %1639 = vmatprep.mubr.bf16.mxu0 %v1727_v4  ;;  %1671 = vmatprep.mubr.bf16.mxu1 %v1743_v9  ;;  %v1744_v12 = vld [vmem:[%s2087_s0 + $0x88] sm:$0xff]   ;;  %v1745_v13 = vld [vmem:[%s2087_s0 + $0x90] sm:$0xff]   ;;  %v1730_v14 = vld [vmem:[%s2087_s0 + $0x18] sm:$0xff]  }
   0x6   :  { %v1731_v15 = vld [vmem:[%s2087_s0 + $0x20] sm:$0xff]   ;;  %v1746_v16 = vld [vmem:[%s2087_s0 + $0x98] sm:$0xff]   ;;  %v1732_v18 = vld [vmem:[%s2087_s0 + $0x28] sm:$0xff]  }
   0x7   :  { %1626 = vmatpush3.bf16.msra.mxu0 %v1720_v1  ;;  %1712 = vmatpush3.bf16.msra.mxu1 %v1720_v1  ;;  %v1747_v17 = vld [vmem:[%s2087_s0 + $0xa0] sm:$0xff]   ;;  %v1748_v19 = vld [vmem:[%s2087_s0 + $0xa8] sm:$0xff]   ;;  %v1733_v20 = vld [vmem:[%s2087_s0 + $0x30] sm:$0xff]  }
   0x8   :  { %1627 = vmatprep.subr.bf16.mxu0 %v1721_v2  ;;  %1705 = vmatprep.subr.bf16.mxu1 %v1721_v2  ;;  %v1749_v21 = vld [vmem:[%s2087_s0 + $0xb0] sm:$0xff]   ;;  %v1734_v22 = vld [vmem:[%s2087_s0 + $0x38] sm:$0xff]   ;;  %v1735_v24 = vld [vmem:[%s2087_s0 + $0x40] sm:$0xff]  }
   0x9   :  { %v1750_v23 = vld [vmem:[%s2087_s0 + $0xb8] sm:$0xff]   ;;  %v1751_v25 = vld [vmem:[%s2087_s0 + $0xc0] sm:$0xff]   ;;  %v1736_v26 = vld [vmem:[%s2087_s0 + $0x48] sm:$0xff]  }
   0xa   :  { %v1752_v27 = vld [vmem:[%s2087_s0 + $0xc8] sm:$0xff]   ;;  %v1737_v28 = vld [vmem:[%s2087_s0 + $0x50] sm:$0xff]   ;;  %v1738_v30 = vld [vmem:[%s2087_s0 + $0x58] sm:$0xff]  }
   0xb   :  { %1628 = vmatpush3.bf16.msra.mxu0 %v1721_v2  ;;  %1713 = vmatpush3.bf16.msra.mxu1 %v1721_v2  ;;  %v1753_v29 = vld [vmem:[%s2087_s0 + $0xd0] sm:$0xff]   ;;  %v1754_v31 = vld [vmem:[%s2087_s0 + $0xd8] sm:$0xff]   ;;  %v1739_v32 = vld [vmem:[%s2087_s0 + $0x60] sm:$0xff]  }
   0xc   :  { %1629 = vmatprep.subr.bf16.mxu0 %v1722_v3  ;;  %1706 = vmatprep.subr.bf16.mxu1 %v1722_v3  ;;  %v1755_v33 = vld [vmem:[%s2087_s0 + $0xe0] sm:$0xff]   ;;  %v1740_v34 = vld [vmem:[%s2087_s0 + $0x68] sm:$0xff]   ;;  %v1741_v36 = vld [vmem:[%s2087_s0 + $0x70] sm:$0xff]  }
   0xd   :  { %v1756_v35 = vld [vmem:[%s2087_s0 + $0xe8] sm:$0xff]   ;;  %v1757_v37 = vld [vmem:[%s2087_s0 + $0xf0] sm:$0xff]   ;;  %v1742_v38 = vld [vmem:[%s2087_s0 + $0x78] sm:$0xff]  }
   0xe   :  { %v1758_v39 = vld [vmem:[%s2087_s0 + $0xf8] sm:$0xff]  }
   0xf   :  { %1630 = vmatpush3.bf16.msra.mxu0 %v1722_v3  ;;  %1714 = vmatpush3.bf16.msra.mxu1 %v1722_v3 }
  0x10   :  { %1631 = vmatprep.subr.bf16.mxu0 %v1723_v5  ;;  %1707 = vmatprep.subr.bf16.mxu1 %v1723_v5 }
  0x13   :  { %1632 = vmatpush3.bf16.msra.mxu0 %v1723_v5  ;;  %1715 = vmatpush3.bf16.msra.mxu1 %v1723_v5 }
  0x14   :  { %1633 = vmatprep.subr.bf16.mxu0 %v1724_v6  ;;  %1708 = vmatprep.subr.bf16.mxu1 %v1724_v6 }
  0x17   :  { %1634 = vmatpush3.bf16.msra.mxu0 %v1724_v6  ;;  %1716 = vmatpush3.bf16.msra.mxu1 %v1724_v6 }
  0x18   :  { %1635 = vmatprep.subr.bf16.mxu0 %v1725_v7  ;;  %1709 = vmatprep.subr.bf16.mxu1 %v1725_v7 }
  0x1b   :  { %1636 = vmatpush3.bf16.msra.mxu0 %v1725_v7  ;;  %1717 = vmatpush3.bf16.msra.mxu1 %v1725_v7 }
  0x1c   :  { %1637 = vmatprep.subr.bf16.mxu0 %v1726_v8  ;;  %1710 = vmatprep.subr.bf16.mxu1 %v1726_v8 }
  0x1f   :  { %1638 = vmatpush3.bf16.msra.mxu0 %v1726_v8  ;;  %1718 = vmatpush3.bf16.msra.mxu1 %v1726_v8 }
  0x22   :  { %1640 = vmatmul.mubr.bf16.vlgmr.msra.gmra.mrb[0].mxu0 %v1728_v10  ;;  %1672 = vmatmul.mubr.bf16.vlgmr.msra.gmra.mrb[0].mxu1 %v1744_v12 }
  0x23   :  { %1643 = vmatprep.mubr.bf16.mxu0 %v1729_v11  ;;  %1675 = vmatprep.mubr.bf16.mxu1 %v1745_v13 }
  0x2a   :  { %1644 = vmatmul.mubr.bf16.gmra.mrb[4].mxu0 %v1730_v14  ;;  %1676 = vmatmul.mubr.bf16.gmra.mrb[4].mxu1 %v1746_v16 }
  0x2b   :  { %1647 = vmatprep.mubr.bf16.mxu0 %v1731_v15  ;;  %1679 = vmatprep.mubr.bf16.mxu1 %v1747_v17 }
  0x32   :  { %1648 = vmatmul.mubr.bf16.gmra.mrb[8].mxu0 %v1732_v18  ;;  %1680 = vmatmul.mubr.bf16.gmra.mrb[8].mxu1 %v1748_v19 }
  0x33   :  { %1651 = vmatprep.mubr.bf16.mxu0 %v1733_v20  ;;  %1683 = vmatprep.mubr.bf16.mxu1 %v1749_v21 }
  0x3a   :  { %1652 = vmatmul.mubr.bf16.gmra.mrb[12].mxu0 %v1734_v22  ;;  %1684 = vmatmul.mubr.bf16.gmra.mrb[12].mxu1 %v1750_v23 }
  0x3b   :  { %1655 = vmatprep.mubr.bf16.mxu0 %v1735_v24  ;;  %1687 = vmatprep.mubr.bf16.mxu1 %v1751_v25 }
  0x42   :  { %1656 = vmatmul.mubr.bf16.gmra.mrb[16].mxu0 %v1736_v26  ;;  %1688 = vmatmul.mubr.bf16.gmra.mrb[16].mxu1 %v1752_v27 }
  0x43   :  { %1659 = vmatprep.mubr.bf16.mxu0 %v1737_v28  ;;  %1691 = vmatprep.mubr.bf16.mxu1 %v1753_v29 }
  0x4a   :  { %1660 = vmatmul.mubr.bf16.gmra.mrb[20].mxu0 %v1738_v30  ;;  %1692 = vmatmul.mubr.bf16.gmra.mrb[20].mxu1 %v1754_v31 }
  0x4b   :  { %1663 = vmatprep.mubr.bf16.mxu0 %v1739_v32  ;;  %1695 = vmatprep.mubr.bf16.mxu1 %v1755_v33 }
  0x52   :  { %1664 = vmatmul.mubr.bf16.gmra.mrb[24].mxu0 %v1740_v34  ;;  %1696 = vmatmul.mubr.bf16.gmra.mrb[24].mxu1 %v1756_v35 }
  0x53   :  { %1667 = vmatprep.mubr.bf16.mxu0 %v1741_v36  ;;  %1699 = vmatprep.mubr.bf16.mxu1 %v1757_v37 }
  0x5a   :  { %1668 = vmatmul.mubr.bf16.gmra.mrb[28].mxu0 %v1742_v38  ;;  %1700 = vmatmul.mubr.bf16.gmra.mrb[28].mxu1 %v1758_v39 }
  0xf5   :  { %v1641_v40 = vpop.f32.mrb[0].mxu0  ;;  %v1673_v41 = vpop.f32.mrb[0].mxu1 }
  0xf6   :  { %v369_v42 = vpop.f32.mrb[1].mxu0  ;;  %v497_v43 = vpop.f32.mrb[1].mxu1 }
  0xf7   :  { %v1642_v44 = vpop.f32.mrb[2].mxu0  ;;  %v1674_v45 = vpop.f32.mrb[2].mxu1 }
  0xf8   :  { %v625_v46 = vpack.c.bf16 %v1642_v44, %v1641_v40  ;;  %v372_v47 = vpop.f32.mrb[3].mxu0  ;;  %v1904_v48 = vpack.c.bf16 %v1674_v45, %v1673_v41  ;;  %v500_v49 = vpop.f32.mrb[3].mxu1 }
  0xf9   :  { %v624_v50 = vpack.c.bf16 %v372_v47, %v369_v42  ;;  %v1906_v51 = vpack.c.bf16 %v500_v49, %v497_v43 }
  0xfa   :  { %1552 = vst [vmem:[%s2088_s2 + $0x8] sm:$0xff] %v625_v46   ;;  %1568 = vst [vmem:[%s2088_s2 + $0x88] sm:$0xff] %v1904_v48   ;;  %v946_v52 = vunpack.c.l.bf16 %v625_v46  ;;  %v947_v55 = vunpack.c.h.bf16 %v625_v46 }
  0xfb   :  { %1396 = vst [vmem:[%s2088_s2] sm:$0xff] %v624_v50   ;;  %v944_v53 = vunpack.c.l.bf16 %v624_v50  ;;  %v945_v54 = vunpack.c.h.bf16 %v624_v50  ;;  %1567 = vst [vmem:[%s2088_s2 + $0x80] sm:$0xff] %v1906_v51  }
  0xfc   :  { %v1080_v63 = vmul.f32 %v946_v52, %v946_v52  ;;  %v1081_v4 = vmul.f32 %v947_v55, %v947_v55 }
  0xfd   :  { %v1008_v56 = vadd.f32 %v945_v54, %v944_v53  ;;  %v1078_v57 = vmul.f32 %v944_v53, %v944_v53  ;;  %v1079_v58 = vmul.f32 %v945_v54, %v945_v54  ;;  %v1645_v59 = vpop.f32.mrb[4].mxu0  ;;  %v1677_v60 = vpop.f32.mrb[4].mxu1 }
  0xfe   :  { %v385_v61 = vpop.f32.mrb[5].mxu0  ;;  %v513_v62 = vpop.f32.mrb[5].mxu1 }
  0xff   :  { %v1009_v0 = vadd.f32 %v1008_v56, %v946_v52  ;;  %v1142_v1 = vadd.f32 %v1079_v58, %v1078_v57  ;;  %v1646_v2 = vpop.f32.mrb[6].mxu0  ;;  %v1678_v3 = vpop.f32.mrb[6].mxu1 }
 0x100   :  { %v627_v5 = vpack.c.bf16 %v1646_v2, %v1645_v59  ;;  %v388_v6 = vpop.f32.mrb[7].mxu0  ;;  %v1922_v7 = vpack.c.bf16 %v1678_v3, %v1677_v60  ;;  %v516_v8 = vpop.f32.mrb[7].mxu1 }
 0x101   :  { %v1143_v9 = vadd.f32 %v1142_v1, %v1080_v63  ;;  %v626_v10 = vpack.c.bf16 %v388_v6, %v385_v61  ;;  %v1010_v11 = vadd.f32 %v1009_v0, %v947_v55  ;;  %v1924_v12 = vpack.c.bf16 %v516_v8, %v513_v62 }
 0x102   :  { %1554 = vst [vmem:[%s2088_s2 + $0x18] sm:$0xff] %v627_v5   ;;  %1570 = vst [vmem:[%s2088_s2 + $0x98] sm:$0xff] %v1922_v7   ;;  %v950_v16 = vunpack.c.l.bf16 %v627_v5  ;;  %v951_v21 = vunpack.c.h.bf16 %v627_v5 }
 0x103   :  { %1553 = vst [vmem:[%s2088_s2 + $0x10] sm:$0xff] %v626_v10   ;;  %v948_v13 = vunpack.c.l.bf16 %v626_v10  ;;  %v949_v14 = vunpack.c.h.bf16 %v626_v10  ;;  %v1144_v15 = vadd.f32 %v1143_v9, %v1081_v4  ;;  %1569 = vst [vmem:[%s2088_s2 + $0x90] sm:$0xff] %v1924_v12  }
 0x104   :  { %v1084_v29 = vmul.f32 %v950_v16, %v950_v16  ;;  %v1085_v38 = vmul.f32 %v951_v21, %v951_v21 }
 0x105   :  { %v1011_v17 = vadd.f32 %v1010_v11, %v948_v13  ;;  %v1082_v18 = vmul.f32 %v948_v13, %v948_v13  ;;  %v1649_v19 = vpop.f32.mrb[8].mxu0  ;;  %v1681_v20 = vpop.f32.mrb[8].mxu1  ;;  %v1083_v25 = vmul.f32 %v949_v14, %v949_v14 }
 0x106   :  { %v401_v22 = vpop.f32.mrb[9].mxu0  ;;  %v529_v23 = vpop.f32.mrb[9].mxu1 }
 0x107   :  { %v1012_v24 = vadd.f32 %v1011_v17, %v949_v14  ;;  %v1145_v26 = vadd.f32 %v1144_v15, %v1082_v18  ;;  %v1650_v27 = vpop.f32.mrb[10].mxu0  ;;  %v1682_v28 = vpop.f32.mrb[10].mxu1 }
 0x108   :  { %v629_v30 = vpack.c.bf16 %v1650_v27, %v1649_v19  ;;  %v404_v31 = vpop.f32.mrb[11].mxu0  ;;  %v1940_v32 = vpack.c.bf16 %v1682_v28, %v1681_v20  ;;  %v532_v33 = vpop.f32.mrb[11].mxu1 }
 0x109   :  { %v1013_v34 = vadd.f32 %v1012_v24, %v950_v16  ;;  %v1146_v35 = vadd.f32 %v1145_v26, %v1083_v25  ;;  %v628_v36 = vpack.c.bf16 %v404_v31, %v401_v22  ;;  %v1942_v37 = vpack.c.bf16 %v532_v33, %v529_v23 }
 0x10a   :  { %1556 = vst [vmem:[%s2088_s2 + $0x28] sm:$0xff] %v629_v30   ;;  %1572 = vst [vmem:[%s2088_s2 + $0xa8] sm:$0xff] %v1940_v32   ;;  %v954_v43 = vunpack.c.l.bf16 %v629_v30  ;;  %v955_v50 = vunpack.c.h.bf16 %v629_v30 }
 0x10b   :  { %v1147_v39 = vadd.f32 %v1146_v35, %v1084_v29  ;;  %1555 = vst [vmem:[%s2088_s2 + $0x20] sm:$0xff] %v628_v36   ;;  %v952_v40 = vunpack.c.l.bf16 %v628_v36  ;;  %v953_v41 = vunpack.c.h.bf16 %v628_v36  ;;  %v1014_v42 = vadd.f32 %v1013_v34, %v951_v21  ;;  %1571 = vst [vmem:[%s2088_s2 + $0xa0] sm:$0xff] %v1942_v37  }
 0x10c   :  { %v1088_v59 = vmul.f32 %v954_v43, %v954_v43  ;;  %v1089_v4 = vmul.f32 %v955_v50, %v955_v50 }
 0x10d   :  { %v1015_v44 = vadd.f32 %v1014_v42, %v952_v40  ;;  %v1086_v45 = vmul.f32 %v952_v40, %v952_v40  ;;  %v1148_v46 = vadd.f32 %v1147_v39, %v1085_v38  ;;  %v1653_v47 = vpop.f32.mrb[12].mxu0  ;;  %v1685_v49 = vpop.f32.mrb[12].mxu1  ;;  %v1087_v55 = vmul.f32 %v953_v41, %v953_v41 }
 0x10e   :  { %v417_v52 = vpop.f32.mrb[13].mxu0  ;;  %v545_v53 = vpop.f32.mrb[13].mxu1 }
 0x10f   :  { %v1016_v54 = vadd.f32 %v1015_v44, %v953_v41  ;;  %v1149_v56 = vadd.f32 %v1148_v46, %v1086_v45  ;;  %v1654_v57 = vpop.f32.mrb[14].mxu0  ;;  %v1686_v58 = vpop.f32.mrb[14].mxu1 }
 0x110   :  { %v631_v60 = vpack.c.bf16 %v1654_v57, %v1653_v47  ;;  %v420_v61 = vpop.f32.mrb[15].mxu0  ;;  %v1958_v62 = vpack.c.bf16 %v1686_v58, %v1685_v49  ;;  %v548_v63 = vpop.f32.mrb[15].mxu1 }
 0x111   :  { %v1017_v0 = vadd.f32 %v1016_v54, %v954_v43  ;;  %v1150_v1 = vadd.f32 %v1149_v56, %v1087_v55  ;;  %v630_v2 = vpack.c.bf16 %v420_v61, %v417_v52  ;;  %v1960_v3 = vpack.c.bf16 %v548_v63, %v545_v53 }
 0x112   :  { %1558 = vst [vmem:[%s2088_s2 + $0x38] sm:$0xff] %v631_v60   ;;  %1574 = vst [vmem:[%s2088_s2 + $0xb8] sm:$0xff] %v1958_v62   ;;  %v958_v10 = vunpack.c.l.bf16 %v631_v60  ;;  %v959_v17 = vunpack.c.h.bf16 %v631_v60 }
 0x113   :  { %v1151_v5 = vadd.f32 %v1150_v1, %v1088_v59  ;;  %1557 = vst [vmem:[%s2088_s2 + $0x30] sm:$0xff] %v630_v2   ;;  %v956_v6 = vunpack.c.l.bf16 %v630_v2  ;;  %v957_v8 = vunpack.c.h.bf16 %v630_v2  ;;  %v1018_v9 = vadd.f32 %v1017_v0, %v955_v50  ;;  %1573 = vst [vmem:[%s2088_s2 + $0xb0] sm:$0xff] %v1960_v3  }
 0x114   :  { %v1092_v25 = vmul.f32 %v958_v10, %v958_v10  ;;  %v1093_v35 = vmul.f32 %v959_v17, %v959_v17 }
 0x115   :  { %v1019_v11 = vadd.f32 %v1018_v9, %v956_v6  ;;  %v1090_v13 = vmul.f32 %v956_v6, %v956_v6  ;;  %v1152_v14 = vadd.f32 %v1151_v5, %v1089_v4  ;;  %v1657_v15 = vpop.f32.mrb[16].mxu0  ;;  %v1689_v16 = vpop.f32.mrb[16].mxu1  ;;  %v1091_v21 = vmul.f32 %v957_v8, %v957_v8 }
 0x116   :  { %v433_v18 = vpop.f32.mrb[17].mxu0  ;;  %v561_v19 = vpop.f32.mrb[17].mxu1 }
 0x117   :  { %v1020_v20 = vadd.f32 %v1019_v11, %v957_v8  ;;  %v1153_v22 = vadd.f32 %v1152_v14, %v1090_v13  ;;  %v1658_v23 = vpop.f32.mrb[18].mxu0  ;;  %v1690_v24 = vpop.f32.mrb[18].mxu1 }
 0x118   :  { %v633_v26 = vpack.c.bf16 %v1658_v23, %v1657_v15  ;;  %v436_v27 = vpop.f32.mrb[19].mxu0  ;;  %v1976_v28 = vpack.c.bf16 %v1690_v24, %v1689_v16  ;;  %v564_v29 = vpop.f32.mrb[19].mxu1 }
 0x119   :  { %v1021_v30 = vadd.f32 %v1020_v20, %v958_v10  ;;  %v1154_v31 = vadd.f32 %v1153_v22, %v1091_v21  ;;  %v632_v33 = vpack.c.bf16 %v436_v27, %v433_v18  ;;  %v1978_v34 = vpack.c.bf16 %v564_v29, %v561_v19 }
 0x11a   :  { %1560 = vst [vmem:[%s2088_s2 + $0x48] sm:$0xff] %v633_v26   ;;  %1576 = vst [vmem:[%s2088_s2 + $0xc8] sm:$0xff] %v1976_v28   ;;  %v962_v41 = vunpack.c.l.bf16 %v633_v26  ;;  %v963_v47 = vunpack.c.h.bf16 %v633_v26 }
 0x11b   :  { %v1155_v36 = vadd.f32 %v1154_v31, %v1092_v25  ;;  %1559 = vst [vmem:[%s2088_s2 + $0x40] sm:$0xff] %v632_v33   ;;  %v960_v38 = vunpack.c.l.bf16 %v632_v33  ;;  %v961_v39 = vunpack.c.h.bf16 %v632_v33  ;;  %v1022_v40 = vadd.f32 %v1021_v30, %v959_v17  ;;  %1575 = vst [vmem:[%s2088_s2 + $0xc0] sm:$0xff] %v1978_v34  }
 0x11c   :  { %v1096_v57 = vmul.f32 %v962_v41, %v962_v41  ;;  %v1097_v4 = vmul.f32 %v963_v47, %v963_v47 }
 0x11d   :  { %v1023_v42 = vadd.f32 %v1022_v40, %v960_v38  ;;  %v1094_v43 = vmul.f32 %v960_v38, %v960_v38  ;;  %v1156_v44 = vadd.f32 %v1155_v36, %v1093_v35  ;;  %v1661_v45 = vpop.f32.mrb[20].mxu0  ;;  %v1693_v46 = vpop.f32.mrb[20].mxu1  ;;  %v1095_v53 = vmul.f32 %v961_v39, %v961_v39 }
 0x11e   :  { %v449_v49 = vpop.f32.mrb[21].mxu0  ;;  %v577_v50 = vpop.f32.mrb[21].mxu1 }
 0x11f   :  { %v1024_v52 = vadd.f32 %v1023_v42, %v961_v39  ;;  %v1157_v54 = vadd.f32 %v1156_v44, %v1094_v43  ;;  %v1662_v55 = vpop.f32.mrb[22].mxu0  ;;  %v1694_v56 = vpop.f32.mrb[22].mxu1 }
 0x120   :  { %v635_v58 = vpack.c.bf16 %v1662_v55, %v1661_v45  ;;  %v452_v59 = vpop.f32.mrb[23].mxu0  ;;  %v1994_v60 = vpack.c.bf16 %v1694_v56, %v1693_v46  ;;  %v580_v61 = vpop.f32.mrb[23].mxu1 }
 0x121   :  { %v1025_v63 = vadd.f32 %v1024_v52, %v962_v41  ;;  %v1158_v0 = vadd.f32 %v1157_v54, %v1095_v53  ;;  %v634_v1 = vpack.c.bf16 %v452_v59, %v449_v49  ;;  %v1996_v2 = vpack.c.bf16 %v580_v61, %v577_v50 }
 0x122   :  { %1562 = vst [vmem:[%s2088_s2 + $0x58] sm:$0xff] %v635_v58   ;;  %1578 = vst [vmem:[%s2088_s2 + $0xd8] sm:$0xff] %v1994_v60   ;;  %v966_v10 = vunpack.c.l.bf16 %v635_v58  ;;  %v967_v17 = vunpack.c.h.bf16 %v635_v58 }
 0x123   :  { %v1159_v5 = vadd.f32 %v1158_v0, %v1096_v57  ;;  %1561 = vst [vmem:[%s2088_s2 + $0x50] sm:$0xff] %v634_v1   ;;  %v964_v6 = vunpack.c.l.bf16 %v634_v1  ;;  %v965_v8 = vunpack.c.h.bf16 %v634_v1  ;;  %v1026_v9 = vadd.f32 %v1025_v63, %v963_v47  ;;  %1577 = vst [vmem:[%s2088_s2 + $0xd0] sm:$0xff] %v1996_v2  }
 0x124   :  { %v1100_v25 = vmul.f32 %v966_v10, %v966_v10  ;;  %v1101_v38 = vmul.f32 %v967_v17, %v967_v17 }
 0x125   :  { %v1027_v11 = vadd.f32 %v1026_v9, %v964_v6  ;;  %v1098_v13 = vmul.f32 %v964_v6, %v964_v6  ;;  %v1160_v14 = vadd.f32 %v1159_v5, %v1097_v4  ;;  %v1665_v15 = vpop.f32.mrb[24].mxu0  ;;  %v1697_v16 = vpop.f32.mrb[24].mxu1  ;;  %v1099_v21 = vmul.f32 %v965_v8, %v965_v8 }
 0x126   :  { %v465_v18 = vpop.f32.mrb[25].mxu0  ;;  %v593_v19 = vpop.f32.mrb[25].mxu1 }
 0x127   :  { %v1028_v20 = vadd.f32 %v1027_v11, %v965_v8  ;;  %v1161_v22 = vadd.f32 %v1160_v14, %v1098_v13  ;;  %v1666_v23 = vpop.f32.mrb[26].mxu0  ;;  %v1698_v24 = vpop.f32.mrb[26].mxu1 }
 0x128   :  { %v637_v26 = vpack.c.bf16 %v1666_v23, %v1665_v15  ;;  %v468_v27 = vpop.f32.mrb[27].mxu0  ;;  %v2012_v29 = vpack.c.bf16 %v1698_v24, %v1697_v16  ;;  %v596_v30 = vpop.f32.mrb[27].mxu1 }
 0x129   :  { %v1029_v31 = vadd.f32 %v1028_v20, %v966_v10  ;;  %v1162_v33 = vadd.f32 %v1161_v22, %v1099_v21  ;;  %v636_v35 = vpack.c.bf16 %v468_v27, %v465_v18  ;;  %v2014_v36 = vpack.c.bf16 %v596_v30, %v593_v19 }
 0x12a   :  { %1564 = vst [vmem:[%s2088_s2 + $0x68] sm:$0xff] %v637_v26   ;;  %1580 = vst [vmem:[%s2088_s2 + $0xe8] sm:$0xff] %v2012_v29   ;;  %v970_v43 = vunpack.c.l.bf16 %v637_v26  ;;  %v971_v50 = vunpack.c.h.bf16 %v637_v26  ;;  %v976_v26 = vunpack.c.l.bf16 %v1906_v51 }
 0x12b   :  { %v1163_v39 = vadd.f32 %v1162_v33, %v1100_v25  ;;  %1563 = vst [vmem:[%s2088_s2 + $0x60] sm:$0xff] %v636_v35   ;;  %v968_v40 = vunpack.c.l.bf16 %v636_v35  ;;  %v969_v41 = vunpack.c.h.bf16 %v636_v35  ;;  %v1030_v42 = vadd.f32 %v1029_v31, %v967_v17  ;;  %1579 = vst [vmem:[%s2088_s2 + $0xe0] sm:$0xff] %v2014_v36  }
 0x12c   :  { %v1104_v59 = vmul.f32 %v970_v43, %v970_v43  ;;  %v1105_v9 = vmul.f32 %v971_v50, %v971_v50  ;;  %v977_v31 = vunpack.c.h.bf16 %v1906_v51  ;;  %v978_v35 = vunpack.c.l.bf16 %v1904_v48 }
 0x12d   :  { %v1031_v44 = vadd.f32 %v1030_v42, %v968_v40  ;;  %v1102_v45 = vmul.f32 %v968_v40, %v968_v40  ;;  %v1164_v46 = vadd.f32 %v1163_v39, %v1101_v38  ;;  %v1669_v47 = vpop.f32.mrb[28].mxu0  ;;  %v1701_v49 = vpop.f32.mrb[28].mxu1  ;;  %v1103_v55 = vmul.f32 %v969_v41, %v969_v41 }
 0x12e   :  { %v481_v52 = vpop.f32.mrb[29].mxu0  ;;  %v609_v53 = vpop.f32.mrb[29].mxu1  ;;  %v1110_v39 = vmul.f32 %v976_v26, %v976_v26  ;;  %v981_v51 = vunpack.c.h.bf16 %v1924_v12 }
 0x12f   :  { %v1032_v54 = vadd.f32 %v1031_v44, %v969_v41  ;;  %v1165_v56 = vadd.f32 %v1164_v46, %v1102_v45  ;;  %v1670_v57 = vpop.f32.mrb[30].mxu0  ;;  %v1702_v58 = vpop.f32.mrb[30].mxu1  ;;  %v979_v41 = vunpack.c.h.bf16 %v1904_v48  ;;  %v1112_v45 = vmul.f32 %v978_v35, %v978_v35 }
 0x130   :  { %v639_v61 = vpack.c.bf16 %v1670_v57, %v1669_v47  ;;  %v484_v63 = vpop.f32.mrb[31].mxu0  ;;  %v2030_v0 = vpack.c.bf16 %v1702_v58, %v1701_v49  ;;  %v612_v1 = vpop.f32.mrb[31].mxu1  ;;  %v980_v49 = vunpack.c.l.bf16 %v1924_v12  ;;  %v983_v48 = vunpack.c.h.bf16 %v1922_v7 }
 0x131   :  { %v1033_v4 = vadd.f32 %v1032_v54, %v970_v43  ;;  %v1166_v5 = vadd.f32 %v1165_v56, %v1103_v55  ;;  %v638_v6 = vpack.c.bf16 %v484_v63, %v481_v52  ;;  %v2032_v8 = vpack.c.bf16 %v612_v1, %v609_v53 }
 0x132   :  { %1566 = vst [vmem:[%s2088_s2 + $0x78] sm:$0xff] %v639_v61   ;;  %1582 = vst [vmem:[%s2088_s2 + $0xf8] sm:$0xff] %v2030_v0   ;;  %v974_v15 = vunpack.c.l.bf16 %v639_v61  ;;  %v975_v19 = vunpack.c.h.bf16 %v639_v61  ;;  %v1111_v43 = vmul.f32 %v977_v31, %v977_v31  ;;  %v982_v54 = vunpack.c.l.bf16 %v1922_v7 }
 0x133   :  { %v1167_v10 = vadd.f32 %v1166_v5, %v1104_v59  ;;  %1565 = vst [vmem:[%s2088_s2 + $0x70] sm:$0xff] %v638_v6   ;;  %v972_v11 = vunpack.c.l.bf16 %v638_v6  ;;  %v973_v13 = vunpack.c.h.bf16 %v638_v6  ;;  %v1034_v14 = vadd.f32 %v1033_v4, %v971_v50  ;;  %1581 = vst [vmem:[%s2088_s2 + $0xf0] sm:$0xff] %v2032_v8  }
 0x134   :  { %v1108_v23 = vmul.f32 %v974_v15, %v974_v15  ;;  %v1109_v27 = vmul.f32 %v975_v19, %v975_v19  ;;  %v1113_v50 = vmul.f32 %v979_v41, %v979_v41  ;;  %v1114_v56 = vmul.f32 %v980_v49, %v980_v49 }
 0x135   :  { %v1035_v16 = vadd.f32 %v1034_v14, %v972_v11  ;;  %v1106_v17 = vmul.f32 %v972_v11, %v972_v11  ;;  %v1168_v18 = vadd.f32 %v1167_v10, %v1105_v9  ;;  %v1107_v21 = vmul.f32 %v973_v13, %v973_v13 }
 0x136   :  { %v1115_v59 = vmul.f32 %v981_v51, %v981_v51  ;;  %v1116_v63 = vmul.f32 %v982_v54, %v982_v54  ;;  %v984_v5 = vunpack.c.l.bf16 %v1942_v37  ;;  %v1117_v6 = vmul.f32 %v983_v48, %v983_v48 }
 0x137   :  { %v1036_v20 = vadd.f32 %v1035_v16, %v973_v13  ;;  %v1169_v22 = vadd.f32 %v1168_v18, %v1106_v17  ;;  %v985_v12 = vunpack.c.h.bf16 %v1942_v37  ;;  %v986_v11 = vunpack.c.l.bf16 %v1940_v32 }
 0x138   :  { %v1118_v14 = vmul.f32 %v984_v5, %v984_v5  ;;  %v987_v7 = vunpack.c.h.bf16 %v1940_v32  ;;  %v989_v37 = vunpack.c.h.bf16 %v1960_v3  ;;  %v991_v32 = vunpack.c.h.bf16 %v1958_v62 }
 0x139   :  { %v1037_v24 = vadd.f32 %v1036_v20, %v974_v15  ;;  %v1170_v25 = vadd.f32 %v1169_v22, %v1107_v21  ;;  %v1119_v17 = vmul.f32 %v985_v12, %v985_v12  ;;  %v988_v22 = vunpack.c.l.bf16 %v1960_v3 }
 0x13a   :  { %v993_v3 = vunpack.c.h.bf16 %v1978_v34 }
 0x13b   :  { %v1171_v30 = vadd.f32 %v1170_v25, %v1108_v23  ;;  %v1038_v33 = vadd.f32 %v1037_v24, %v975_v19  ;;  %v1120_v19 = vmul.f32 %v986_v11, %v986_v11  ;;  %v1121_v23 = vmul.f32 %v987_v7, %v987_v7 }
 0x13d   :  { %v1039_v38 = vadd.f32 %v1038_v33, %v976_v26  ;;  %v1172_v40 = vadd.f32 %v1171_v30, %v1109_v27  ;;  %v990_v26 = vunpack.c.l.bf16 %v1958_v62  ;;  %v1122_v30 = vmul.f32 %v988_v22, %v988_v22 }
 0x13e   :  { %v995_v62 = vunpack.c.h.bf16 %v1976_v28 }
 0x13f   :  { %v1040_v42 = vadd.f32 %v1039_v38, %v977_v31  ;;  %v1173_v44 = vadd.f32 %v1172_v40, %v1110_v39  ;;  %v1124_v39 = vmul.f32 %v990_v26, %v990_v26 }
 0x141   :  { %v1041_v46 = vadd.f32 %v1040_v42, %v978_v35  ;;  %v1174_v47 = vadd.f32 %v1173_v44, %v1111_v43  ;;  %v1123_v35 = vmul.f32 %v989_v37, %v989_v37  ;;  %v992_v42 = vunpack.c.l.bf16 %v1978_v34 }
 0x142   :  { %v1125_v43 = vmul.f32 %v991_v32, %v991_v32  ;;  %v997_v34 = vunpack.c.h.bf16 %v1996_v2 }
 0x143   :  { %v1175_v52 = vadd.f32 %v1174_v47, %v1112_v45  ;;  %v1042_v53 = vadd.f32 %v1041_v46, %v979_v41  ;;  %v994_v46 = vunpack.c.l.bf16 %v1976_v28  ;;  %v999_v28 = vunpack.c.h.bf16 %v1994_v60 }
 0x145   :  { %v1043_v55 = vadd.f32 %v1042_v53, %v980_v49  ;;  %v1176_v57 = vadd.f32 %v1175_v52, %v1113_v50  ;;  %v1126_v49 = vmul.f32 %v992_v42, %v992_v42 }
 0x147   :  { %v1044_v58 = vadd.f32 %v1043_v55, %v981_v51  ;;  %v1177_v61 = vadd.f32 %v1176_v57, %v1114_v56  ;;  %v1127_v51 = vmul.f32 %v993_v3, %v993_v3  ;;  %v996_v57 = vunpack.c.l.bf16 %v1996_v2 }
 0x148   :  { %v1001_v2 = vunpack.c.h.bf16 %v2014_v36 }
 0x149   :  { %v1045_v1 = vadd.f32 %v1044_v58, %v982_v54  ;;  %v1178_v4 = vadd.f32 %v1177_v61, %v1115_v59  ;;  %v1128_v54 = vmul.f32 %v994_v46, %v994_v46  ;;  %v998_v61 = vunpack.c.l.bf16 %v1994_v60 }
 0x14a   :  { %v1003_v60 = vunpack.c.h.bf16 %v2012_v29 }
 0x14b   :  { %v1179_v9 = vadd.f32 %v1178_v4, %v1116_v63  ;;  %v1046_v10 = vadd.f32 %v1045_v1, %v983_v48  ;;  %v1129_v48 = vmul.f32 %v995_v62, %v995_v62  ;;  %v1130_v1 = vmul.f32 %v996_v57, %v996_v57 }
 0x14d   :  { %v1047_v13 = vadd.f32 %v1046_v10, %v984_v5  ;;  %v1180_v15 = vadd.f32 %v1179_v9, %v1117_v6  ;;  %v1131_v6 = vmul.f32 %v997_v34, %v997_v34 }
 0x14f   :  { %v1048_v16 = vadd.f32 %v1047_v13, %v985_v12  ;;  %v1181_v18 = vadd.f32 %v1180_v15, %v1118_v14  ;;  %v1132_v12 = vmul.f32 %v998_v61, %v998_v61  ;;  %v1000_v13 = vunpack.c.l.bf16 %v2014_v36 }
 0x150   :  { %v1133_v14 = vmul.f32 %v999_v28, %v999_v28  ;;  %v1005_v36 = vunpack.c.h.bf16 %v2032_v8 }
 0x151   :  { %v1049_v20 = vadd.f32 %v1048_v16, %v986_v11  ;;  %v1182_v21 = vadd.f32 %v1181_v18, %v1119_v17  ;;  %v1002_v16 = vunpack.c.l.bf16 %v2012_v29  ;;  %v1134_v18 = vmul.f32 %v1000_v13, %v1000_v13 }
 0x152   :  { %v1007_v29 = vunpack.c.h.bf16 %v2030_v0 }
 0x153   :  { %v1183_v24 = vadd.f32 %v1182_v21, %v1120_v19  ;;  %v1050_v25 = vadd.f32 %v1049_v20, %v987_v7  ;;  %v1135_v21 = vmul.f32 %v1001_v2, %v1001_v2 }
 0x155   :  { %v1051_v27 = vadd.f32 %v1050_v25, %v988_v22  ;;  %v1184_v31 = vadd.f32 %v1183_v24, %v1121_v23  ;;  %v1136_v23 = vmul.f32 %v1002_v16, %v1002_v16  ;;  %v1004_v25 = vunpack.c.l.bf16 %v2032_v8 }
 0x157   :  { %v1052_v33 = vadd.f32 %v1051_v27, %v989_v37  ;;  %v1185_v38 = vadd.f32 %v1184_v31, %v1122_v30  ;;  %v1006_v31 = vunpack.c.l.bf16 %v2030_v0 }
 0x159   :  { %v1053_v40 = vadd.f32 %v1052_v33, %v990_v26  ;;  %v1186_v41 = vadd.f32 %v1185_v38, %v1123_v35  ;;  %v1137_v26 = vmul.f32 %v1003_v60, %v1003_v60  ;;  %v1138_v33 = vmul.f32 %v1004_v25, %v1004_v25 }
 0x15b   :  { %v1187_v44 = vadd.f32 %v1186_v41, %v1124_v39  ;;  %v1054_v45 = vadd.f32 %v1053_v40, %v991_v32  ;;  %v1139_v39 = vmul.f32 %v1005_v36, %v1005_v36  ;;  %v1140_v41 = vmul.f32 %v1006_v31, %v1006_v31 }
 0x15d   :  { %v1055_v47 = vadd.f32 %v1054_v45, %v992_v42  ;;  %v1188_v50 = vadd.f32 %v1187_v44, %v1125_v43  ;;  %v1141_v44 = vmul.f32 %v1007_v29, %v1007_v29 }
 0x15f   :  { %v1056_v52 = vadd.f32 %v1055_v47, %v993_v3  ;;  %v1189_v53 = vadd.f32 %v1188_v50, %v1126_v49 }
 0x161   :  { %v1057_v55 = vadd.f32 %v1056_v52, %v994_v46  ;;  %v1190_v56 = vadd.f32 %v1189_v53, %v1127_v51 }
 0x163   :  { %v1191_v58 = vadd.f32 %v1190_v56, %v1128_v54  ;;  %v1058_v59 = vadd.f32 %v1057_v55, %v995_v62 }
 0x165   :  { %v1059_v63 = vadd.f32 %v1058_v59, %v996_v57  ;;  %v1192_v4 = vadd.f32 %v1191_v58, %v1129_v48 }
 0x167   :  { %v1060_v5 = vadd.f32 %v1059_v63, %v997_v34  ;;  %v1193_v9 = vadd.f32 %v1192_v4, %v1130_v1 }
 0x169   :  { %v1061_v10 = vadd.f32 %v1060_v5, %v998_v61  ;;  %v1194_v11 = vadd.f32 %v1193_v9, %v1131_v6 }
 0x16b   :  { %v1195_v15 = vadd.f32 %v1194_v11, %v1132_v12  ;;  %v1062_v7 = vadd.f32 %v1061_v10, %v999_v28 }
 0x16d   :  { %v1063_v17 = vadd.f32 %v1062_v7, %v1000_v13  ;;  %v1196_v19 = vadd.f32 %v1195_v15, %v1133_v14 }
 0x16f   :  { %v1064_v20 = vadd.f32 %v1063_v17, %v1001_v2  ;;  %v1197_v22 = vadd.f32 %v1196_v19, %v1134_v18 }
 0x171   :  { %v1065_v24 = vadd.f32 %v1064_v20, %v1002_v16  ;;  %v1198_v37 = vadd.f32 %v1197_v22, %v1135_v21 }
 0x173   :  { %v1199_v27 = vadd.f32 %v1198_v37, %v1136_v23  ;;  %v1066_v30 = vadd.f32 %v1065_v24, %v1003_v60 }
 0x175   :  { %v1067_v32 = vadd.f32 %v1066_v30, %v1004_v25  ;;  %v1200_v35 = vadd.f32 %v1199_v27, %v1137_v26 }
 0x177   :  { %v1068_v38 = vadd.f32 %v1067_v32, %v1005_v36  ;;  %v1201_v40 = vadd.f32 %v1200_v35, %v1138_v33 }
 0x179   :  { %v1069_v42 = vadd.f32 %v1068_v38, %v1006_v31  ;;  %v1202_v43 = vadd.f32 %v1201_v40, %v1139_v39 }
 0x17b   :  { %v1070_v3 = vadd.f32 %v1069_v42, %v1007_v29  ;;  %v1203_v45 = vadd.f32 %v1202_v43, %v1140_v41 }
 0x17d   :  { %v1071_v46 = vrot.slane %v1070_v3, 4  ;;  %v1204_v47 = vadd.f32 %v1203_v45, %v1141_v44 }
 0x17f   :  { %v1072_v8 = vadd.f32 %v1071_v46, %v1070_v3  ;;  %v1205_v49 = vrot.slane %v1204_v47, 4 }
 0x181   :  { %v1073_v50 = vrot.slane %v1072_v8, 2  ;;  %v1206_v62 = vadd.f32 %v1205_v49, %v1204_v47 }
 0x183   :  { %v1074_v52 = vadd.f32 %v1073_v50, %v1072_v8  ;;  %v1207_v51 = vrot.slane %v1206_v62, 2 }
 0x185   :  { %v1075_v53 = vrot.slane %v1074_v52, 1  ;;  %v1208_v54 = vadd.f32 %v1207_v51, %v1206_v62 }
 0x187   :  { %v1076_v0 = vadd.f32 %v1075_v53, %v1074_v52  ;;  %v1209_v55 = vrot.slane %v1208_v54, 1 }
 0x189   :  { %1077 = vst [vmem:[%s2089_s3] sm:$0x1] %v1076_v0  ;;  %v1210_v56 = vadd.f32 %v1209_v55, %v1208_v54 }
 0x18b   :  { %1211 = vst [vmem:[%s2090_s4] sm:$0x1] %v1210_v56 }

// kernel: bottleneck_pallas.5
= control target key start
LH: loop header
LB: loop body
LE: loop exit
PB: predicated region body
PF: predicated region fallthrough
CT: control target
= control target key end

     0   :  { %s2789_s15 = smov 0   ;;  %s2791_s16 = smov 0   ;;  %s3128_s0 = inlined_call_operand.vmem [shape: bf16[2,4,9,9,128], index: 0, kind: input, shape index: {}]   ;;  %s3129_s1 = inlined_call_operand.vmem [shape: bf16[3,384,128], index: 1, kind: input, shape index: {}]   ;;  %s3130_s2 = inlined_call_operand.vmem [shape: bf16[2,8,8,128], index: 2, kind: output, shape index: {0}]   ;;  %s3131_s3 = inlined_call_operand.vmem [shape: f32[2,1,128], index: 3, kind: output, shape index: {1}]   ;;  %s3132_s4 = inlined_call_operand.vmem [shape: f32[2,1,128], index: 4, kind: output, shape index: {2}]  }
   0x1   :  { %s2793_s17 = smov 0  }
   0x2 LB: > { %s27_s18 = sadd.s32 1, %s2758_s16  ;;  %p1997_p0 = scmp.ge.s32.totalorder %s2762_s17, 1  ;;  %s2762_s17 = sphi %s2793_s17, %s15_s17   ;;  %s2758_s16 = sphi %s2791_s16, %s3134_s16   ;;  %s2754_s15 = sphi %s2789_s15, %s3133_s15  }
   0x3   : > { %p29_p1 = scmp.ge.s32.totalorder %s27_s18, 2  ;;  %p185_p2 = scmp.lt.s32.totalorder %s2762_s17, 3 }
   0x5   : > { %s3136_s18 = smov (%p29_p1, %s27_s18), 0  ;;  %p186_p3 = pnand %p1997_p0, %p185_p2 }
   0x6   : > { %v2620_v0 = vld [vmem:[%s3129_s1 + $0x100] sm:$0xff] (!%p186_p3)   ;;  %v2623_v3 = vld [vmem:[%s3129_s1 + $0x108] sm:$0xff] (!%p186_p3)   ;;  %v2626_v6 = vld [vmem:[%s3129_s1 + $0x110] sm:$0xff] (!%p186_p3)   ;;  %p223_p4 = scmp.lt.s32.totalorder (!%p186_p3), %s2754_s15, 1 }
   0x7   : > { %189 = sbr.rel (%p186_p3) target bundleno = 372 (0x174), region = 28  ;;  %v2621_v1 = vld [vmem:[%s3129_s1 + $0x140] sm:$0xff] (!%p186_p3)   ;;  %2327 = vmatprep.subr.bf16.mxu0 (!%p186_p3), %v2620_v0  ;;  %v2624_v4 = vld [vmem:[%s3129_s1 + $0x148] sm:$0xff] (!%p186_p3)   ;;  %v2627_v7 = vld [vmem:[%s3129_s1 + $0x150] sm:$0xff] (!%p186_p3)  }
   0x8   : > { %v2622_v2 = vld [vmem:[%s3129_s1 + $0xc0] sm:$0xff] (!%p186_p3)   ;;  %2483 = vmatprep.subr.bf16.mxu1 (!%p186_p3), %v2621_v1  ;;  %v2625_v5 = vld [vmem:[%s3129_s1 + $0xc8] sm:$0xff] (!%p186_p3)   ;;  %v2628_v8 = vld [vmem:[%s3129_s1 + $0xd0] sm:$0xff] (!%p186_p3)  }
   0x9   : > { %2328 = vmatpush3.bf16.msra.mxu0 (!%p186_p3), %v2622_v2  ;;  %2484 = vmatpush3.bf16.msra.mxu1 (!%p186_p3), %v2621_v1  ;;  %v2629_v9 = vld [vmem:[%s3129_s1 + $0x118] sm:$0xff] (!%p186_p3)   ;;  %v2632_v12 = vld [vmem:[%s3129_s1 + $0x120] sm:$0xff] (!%p186_p3)   ;;  %v2635_v15 = vld [vmem:[%s3129_s1 + $0x128] sm:$0xff] (!%p186_p3)  }
   0xa   : > { %2329 = vmatprep.subr.bf16.mxu0 (!%p186_p3), %v2623_v3  ;;  %2485 = vmatprep.subr.bf16.mxu1 (!%p186_p3), %v2624_v4  ;;  %v2630_v10 = vld [vmem:[%s3129_s1 + $0x158] sm:$0xff] (!%p186_p3)   ;;  %v2633_v13 = vld [vmem:[%s3129_s1 + $0x160] sm:$0xff] (!%p186_p3)   ;;  %v2636_v16 = vld [vmem:[%s3129_s1 + $0x168] sm:$0xff] (!%p186_p3)  }
   0xb   : > { %v2631_v11 = vld [vmem:[%s3129_s1 + $0xd8] sm:$0xff] (!%p186_p3)   ;;  %v2634_v14 = vld [vmem:[%s3129_s1 + $0xe0] sm:$0xff] (!%p186_p3)   ;;  %v2637_v17 = vld [vmem:[%s3129_s1 + $0xe8] sm:$0xff] (!%p186_p3)  }
   0xc   : > { %v2638_v18 = vld [vmem:[%s3129_s1 + $0x130] sm:$0xff] (!%p186_p3)   ;;  %v2641_v21 = vld [vmem:[%s3129_s1 + $0x138] sm:$0xff] (!%p186_p3)   ;;  %v2648_v33 = vld [vmem:[%s3129_s1 + $0x40] sm:$0xff] (!%p186_p3)  }
   0xd   : > { %2330 = vmatpush3.bf16.msra.mxu0 (!%p186_p3), %v2625_v5  ;;  %2486 = vmatpush3.bf16.msra.mxu1 (!%p186_p3), %v2624_v4  ;;  %v2639_v19 = vld [vmem:[%s3129_s1 + $0x170] sm:$0xff] (!%p186_p3)   ;;  %v2642_v22 = vld [vmem:[%s3129_s1 + $0x178] sm:$0xff] (!%p186_p3)   ;;  %v2649_v34 = vld [vmem:[%s3129_s1 + $0x80] sm:$0xff] (!%p186_p3)  }
   0xe   : > { %2331 = vmatprep.subr.bf16.mxu0 %v2626_v6  ;;  %2487 = vmatprep.subr.bf16.mxu1 %v2627_v7  ;;  %s3138_s15 = smov (!%p223_p4, %s2754_s15), 1  ;;  %v2640_v20 = vld [vmem:[%s3129_s1 + $0xf0] sm:$0xff]   ;;  %v2643_v29 = vld [vmem:[%s3129_s1 + $0xf8] sm:$0xff]   ;;  %v2652_v43 = vld [vmem:[%s3129_s1] sm:$0xff]  }
   0xf   : > { %s2595_s5 = smul.u32 288, %s3138_s15  ;;  %v2653_v47 = vld [vmem:[%s3129_s1 + $0x48] sm:$0xff]   ;;  %v2658_v61 = vld [vmem:[%s3129_s1 + $0x50] sm:$0xff]   ;;  %v2661_v3 = vld [vmem:[%s3129_s1 + $0x58] sm:$0xff]   ;;  %s241_s23 = scalar_lea.vmem %s3131_s3, %s3138_s15 }
  0x10   : > { %v2655_v57 = vld [vmem:[%s3129_s1 + $0x8] sm:$0xff]   ;;  %v2660_v1 = vld [vmem:[%s3129_s1 + $0x10] sm:$0xff]   ;;  %s246_s26 = scalar_lea.vmem %s3132_s4, %s3138_s15 }
  0x11   : > { %2332 = vmatpush3.bf16.msra.mxu0 %v2628_v8  ;;  %2488 = vmatpush3.bf16.msra.mxu1 %v2627_v7  ;;  %s2880_s20 = scalar_lea.vmem %s3128_s0, %s2595_s5  ;;  %v2654_v63 = vld [vmem:[%s3129_s1 + $0x88] sm:$0xff]   ;;  %v2659_v2 = vld [vmem:[%s3129_s1 + $0x90] sm:$0xff]  }
  0x12   : > { %2333 = vmatprep.subr.bf16.mxu0 %v2629_v9  ;;  %2489 = vmatprep.subr.bf16.mxu1 %v2630_v10  ;;  %v2644_v23 = vld [vmem:[%s2880_s20 + $0xd8] ss:$8 sps:$4 sm:$0xff]   ;;  %v2017_v24 = vld [vmem:[%s2880_s20 + $0x90] sm:$0xf]  ;;  %v2033_v26 = vld [vmem:[%s2880_s20 + $0x94] sm:$0x1] }
  0x13   : > { %v2018_v25 = vld [vmem:[%s2880_s20 + $0x98] sm:$0xf]  ;;  %847 = vmatprep.mubr.bf16.mxu0 %v2644_v23  ;;  %v2034_v27 = vld [vmem:[%s2880_s20 + $0x9c] sm:$0x1]  ;;  %v2041_v28 = vcombine.low %v2017_v24, %v2033_v26  ;;  %v2019_v35 = vld [vmem:[%s2880_s20 + $0xa0] sm:$0xf] }
  0x14   : > { %v2042_v30 = vcombine.low %v2018_v25, %v2034_v27  ;;  %v2020_v38 = vld [vmem:[%s2880_s20 + $0xa8] sm:$0xf]  ;;  %v2035_v39 = vld [vmem:[%s2880_s20 + $0xa4] sm:$0x1]  ;;  %v2036_v41 = vld [vmem:[%s2880_s20 + $0xac] sm:$0x1]  ;;  %v2097_v44 = vcombine.low %v2017_v24, %v2018_v25 }
  0x15   : > { %2334 = vmatpush3.bf16.msra.mxu0 %v2631_v11  ;;  %2490 = vmatpush3.bf16.msra.mxu1 %v2630_v10  ;;  %v519_v31 = vshrl.u32 %v2041_v28, 16  ;;  %v521_v32 = vshll.u32 %v2041_v28, 16  ;;  %v2043_v42 = vcombine.low %v2019_v35, %v2035_v39  ;;  %v2044_v46 = vcombine.low %v2020_v38, %v2036_v41  ;;  %v2656_v58 = vld [vmem:[%s2880_s20 + $0xe8] ss:$8 sps:$4 sm:$0xff]   ;;  %v2664_v4 = vld [vmem:[%s2880_s20 + $0xf8] ss:$8 sps:$4 sm:$0xff]  }
  0x16   : > { %2335 = vmatprep.subr.bf16.mxu0 %v2632_v12  ;;  %2491 = vmatprep.subr.bf16.mxu1 %v2633_v13  ;;  %v526_v36 = vshrl.u32 %v2042_v30, 16  ;;  %v528_v37 = vshll.u32 %v2042_v30, 16  ;;  %v2100_v0 = vcombine.low %v2019_v35, %v2020_v38  ;;  %v2021_v5 = vld [vmem:[%s2880_s20 + $0xb0] sm:$0xf]  ;;  %v2022_v6 = vld [vmem:[%s2880_s20 + $0xb8] sm:$0xf] }
  0x17   : > { %v523_v40 = vrot.slane %v521_v32, 1  ;;  %v533_v49 = vshrl.u32 %v2043_v42, 16  ;;  %v535_v50 = vshll.u32 %v2043_v42, 16  ;;  %v540_v52 = vshrl.u32 %v2044_v46, 16  ;;  %v2037_v7 = vld [vmem:[%s2880_s20 + $0xb4] sm:$0x1] }
  0x18   : > { %v530_v45 = vrot.slane %v528_v37, 1  ;;  %v542_v53 = vshll.u32 %v2044_v46, 16  ;;  %v2038_v8 = vld [vmem:[%s2880_s20 + $0xbc] sm:$0x1]  ;;  %v2045_v10 = vcombine.low %v2021_v5, %v2037_v7  ;;  %v2668_v12 = vld [vmem:[%s3129_s1 + $0x60] sm:$0xff]   ;;  %v2673_v23 = vld [vmem:[%s3129_s1 + $0x28] sm:$0xff]  }
  0x19   : > { %2336 = vmatpush3.bf16.msra.mxu0 %v2634_v14  ;;  %2492 = vmatpush3.bf16.msra.mxu1 %v2633_v13  ;;  %v524_v48 = vor.u32 %v523_v40, %v519_v31  ;;  %v537_v54 = vrot.slane %v535_v50, 1  ;;  %v2663_v9 = vld [vmem:[%s3129_s1 + $0x18] sm:$0xff]   ;;  %v2046_v11 = vcombine.low %v2022_v6, %v2038_v8  ;;  %v2674_v26 = vld [vmem:[%s2880_s20 + $0x108] ss:$8 sps:$4 sm:$0xff]   ;;  %v2023_v27 = vld [vmem:[%s2880_s20 + $0xc0] sm:$0xf] }
  0x1a   : > { %2337 = vmatprep.subr.bf16.mxu0 %v2635_v15  ;;  %2493 = vmatprep.subr.bf16.mxu1 %v2636_v16  ;;  %v531_v51 = vor.u32 %v530_v45, %v526_v36  ;;  %v544_v56 = vrot.slane %v542_v53, 1  ;;  %v549_v13 = vshll.u32 %v2045_v10, 16  ;;  %v2662_v15 = vld [vmem:[%s3129_s1 + $0x98] sm:$0xff]   ;;  %v2024_v28 = vld [vmem:[%s2880_s20 + $0xc8] sm:$0xf]  ;;  %v2680_v42 = vld [vmem:[%s3129_s1 + $0x30] sm:$0xff]  }
  0x1b   : > { %v538_v59 = vor.u32 %v537_v54, %v533_v49  ;;  %v556_v14 = vshll.u32 %v2046_v11, 16  ;;  %v2040_v30 = vld [vmem:[%s2880_s20 + $0xcc] sm:$0x1]  ;;  %v2106_v36 = vcombine.low %v2023_v27, %v2024_v28  ;;  %v2681_v46 = vld [vmem:[%s3129_s1 + $0x78] sm:$0xff]   ;;  %v2684_v50 = vld [vmem:[%s2880_s20 + $0x48] ss:$8 sps:$4 sm:$0xff]  }
  0x1c   : > { %v2099_v55 = vcombine.low %v524_v48, %v531_v51  ;;  %v545_v60 = vor.u32 %v544_v56, %v540_v52  ;;  %v2672_v35 = vld [vmem:[%s3129_s1 + $0xa8] sm:$0xff]   ;;  %v2683_v49 = vld [vmem:[%s3129_s1 + $0x38] sm:$0xff]   ;;  %v253_v51 = vld [vmem:[%s2880_s20] sm:$0xf] }
  0x1d   : > { %2338 = vmatpush3.bf16.msra.mxu0 %v2637_v17  ;;  %2494 = vmatpush3.bf16.msra.mxu1 %v2636_v16  ;;  %v2103_v16 = vcombine.low %v2021_v5, %v2022_v6  ;;  %v547_v17 = vshrl.u32 %v2045_v10, 16  ;;  %v558_v25 = vrot.slane %v556_v14, 1  ;;  %v254_v52 = vld [vmem:[%s2880_s20 + $0x8] sm:$0xf]  ;;  %v272_v54 = vld [vmem:[%s2880_s20 + $0x4] sm:$0x1] }
  0x1e   : > { %2339 = vmatprep.subr.bf16.mxu0 %v2638_v18  ;;  %2495 = vmatprep.subr.bf16.mxu1 %v2639_v19  ;;  %v2102_v62 = vcombine.low %v538_v59, %v545_v60  ;;  %v2670_v18 = vld [vmem:[%s3129_s1 + $0x20] sm:$0xff]   ;;  %v2009_v56 = vcombine.low %v253_v51, %v272_v54  ;;  %v2682_v59 = vld [vmem:[%s3129_s1 + $0xb8] sm:$0xff]   ;;  %v2133_v60 = vcombine.low %v253_v51, %v254_v52 }
  0x1f   : > { %2499 = vmatprep.mubr.bf16.mxu1 %v2099_v55  ;;  %v273_v55 = vld [vmem:[%s2880_s20 + $0xc] sm:$0x1]  ;;  %v275_v5 = vld [vmem:[%s2880_s20 + $0x1c] sm:$0x1]  ;;  %v2692_v10 = vld [vmem:[%s3129_s1 + $0x180] sm:$0xff]  }
  0x21   : > { %2340 = vmatpush3.bf16.msra.mxu0 %v2640_v20  ;;  %2496 = vmatpush3.bf16.msra.mxu1 %v2639_v19  ;;  %v551_v19 = vrot.slane %v549_v13, 1  ;;  %v2669_v20 = vld [vmem:[%s3129_s1 + $0xa0] sm:$0xff]  }
  0x22   : > { %2341 = vmatprep.subr.bf16.mxu0 %v2641_v21  ;;  %2497 = vmatprep.subr.bf16.mxu1 %v2642_v22  ;;  %v2671_v21 = vld [vmem:[%s3129_s1 + $0x68] sm:$0xff]  }
  0x23   : > { %v552_v24 = vor.u32 %v551_v19, %v547_v17 }
  0x25   : > { %2342 = vmatpush3.bf16.msra.mxu0 %v2643_v29  ;;  %2498 = vmatpush3.bf16.msra.mxu1 %v2642_v22  ;;  %v554_v22 = vshrl.u32 %v2046_v11, 16  ;;  %v2039_v29 = vld [vmem:[%s2880_s20 + $0xc4] sm:$0x1]  ;;  %v2693_v11 = vld [vmem:[%s3129_s1 + $0x1c8] sm:$0xff]  }
  0x26   : > { %2379 = vmatprep.subr.bf16.mxu0 %v2648_v33  ;;  %2507 = vmatprep.subr.bf16.mxu1 %v2649_v34  ;;  %v2047_v32 = vcombine.low %v2023_v27, %v2039_v29  ;;  %v2048_v33 = vcombine.low %v2024_v28, %v2040_v30  ;;  %v2700_v27 = vld [vmem:[%s3129_s1 + $0x190] sm:$0xff]   ;;  %v2701_v28 = vld [vmem:[%s3129_s1 + $0x1d8] sm:$0xff]   ;;  %v2694_v30 = vld [vmem:[%s3129_s1 + $0x208] sm:$0xff]  }
  0x27   : > { %v559_v31 = vor.u32 %v558_v25, %v554_v22 }
  0x28   : > { %848 = vmatmul.mubr.bf16.vlgmr.msra.gmra.mrb[0].mxu0 %v2097_v44  ;;  %2500 = vmatmul.mubr.bf16.vlgmr.msra.gmra.mrb[0].mxu1 %v2102_v62  ;;  %v563_v38 = vshll.u32 %v2047_v32, 16  ;;  %v570_v39 = vshll.u32 %v2048_v33, 16  ;;  %v561_v40 = vshrl.u32 %v2047_v32, 16  ;;  %v568_v41 = vshrl.u32 %v2048_v33, 16  ;;  %v2699_v32 = vld [vmem:[%s3129_s1 + $0x210] sm:$0xff]  }
  0x29   : > { %2380 = vmatpush3.bf16.msra.mxu0 %v2652_v43  ;;  %855 = vmatprep.mubr.bf16.mxu0 %v2656_v58  ;;  %v2105_v37 = vcombine.low %v552_v24, %v559_v31  ;;  %v2679_v43 = vld [vmem:[%s3129_s1 + $0xb0] sm:$0xff]   ;;  %v2688_v58 = vld [vmem:[%s3129_s1 + $0x1c0] sm:$0xff]   ;;  %v321_v62 = vshrl.u32 %v2009_v56, 16  ;;  %v2703_v31 = vld [vmem:[%s3129_s1 + $0x198] sm:$0xff]  }
  0x2a   : > { %2381 = vmatprep.subr.bf16.mxu0 %v2653_v47  ;;  %2508 = vmatpush3.bf16.msra.mxu1 %v2649_v34  ;;  %v2678_v34 = vld [vmem:[%s3129_s1 + $0x70] sm:$0xff]   ;;  %v565_v44 = vrot.slane %v563_v38, 1  ;;  %v572_v45 = vrot.slane %v570_v39, 1 }
  0x2b   : > { %2509 = vmatprep.subr.bf16.mxu1 %v2654_v63  ;;  %2503 = vmatprep.mubr.bf16.mxu1 %v2105_v37  ;;  %v2704_v33 = vld [vmem:[%s2880_s20 + $0x68] ss:$8 sps:$4 sm:$0xff]   ;;  %v277_v37 = vld [vmem:[%s2880_s20 + $0x2c] sm:$0x1] }
  0x2c   : > { %v566_v47 = vor.u32 %v565_v44, %v561_v40  ;;  %v573_v48 = vor.u32 %v572_v45, %v568_v41  ;;  %v2708_v41 = vld [vmem:[%s3129_s1 + $0x1e0] sm:$0xff]  }
  0x2d   : > { %2382 = vmatpush3.bf16.msra.mxu0 %v2655_v57  ;;  %v2010_v57 = vcombine.low %v254_v52, %v273_v55  ;;  %v2710_v45 = vld [vmem:[%s3129_s1 + $0x1a0] sm:$0xff]   ;;  %v259_v55 = vld [vmem:[%s2880_s20 + $0x30] sm:$0xf] }
  0x2e   : > { %2383 = vmatprep.subr.bf16.mxu0 %v2658_v61  ;;  %2510 = vmatpush3.bf16.msra.mxu1 %v2654_v63  ;;  %v2108_v53 = vcombine.low %v566_v47, %v573_v48  ;;  %v255_v61 = vld [vmem:[%s2880_s20 + $0x10] sm:$0xf]  ;;  %v323_v63 = vshll.u32 %v2009_v56, 16  ;;  %v2714_v52 = vld [vmem:[%s2880_s20 + $0x78] ss:$8 sps:$4 sm:$0xff]  }
  0x2f   : > { %2511 = vmatprep.subr.bf16.mxu1 %v2659_v2  ;;  %v2718_v56 = vld [vmem:[%s3129_s1 + $0x1f0] sm:$0xff]  }
  0x30   : > { %856 = vmatmul.mubr.bf16.gmra.mrb[4].mxu0 %v2100_v0  ;;  %2504 = vmatmul.mubr.bf16.gmra.mrb[4].mxu1 %v2108_v53  ;;  %v328_v0 = vshrl.u32 %v2010_v57, 16  ;;  %v325_v6 = vrot.slane %v323_v63, 1  ;;  %v2712_v63 = vld [vmem:[%s3129_s1 + $0x228] sm:$0xff]  }
  0x31   : > { %2384 = vmatpush3.bf16.msra.mxu0 %v2660_v1  ;;  %863 = vmatprep.mubr.bf16.mxu0 %v2664_v4  ;;  %v330_v1 = vshll.u32 %v2010_v57, 16  ;;  %v274_v4 = vld [vmem:[%s2880_s20 + $0x14] sm:$0x1]  ;;  %v260_v57 = vld [vmem:[%s2880_s20 + $0x38] sm:$0xf] }
  0x32   : > { %2385 = vmatprep.subr.bf16.mxu0 %v2661_v3  ;;  %2512 = vmatpush3.bf16.msra.mxu1 %v2659_v2  ;;  %v256_v2 = vld [vmem:[%s2880_s20 + $0x18] sm:$0xf]  ;;  %v2689_v3 = vld [vmem:[%s3129_s1 + $0x200] sm:$0xff]   ;;  %v2011_v8 = vcombine.low %v255_v61, %v274_v4 }
  0x33   : > { %2513 = vmatprep.subr.bf16.mxu1 %v2662_v15  ;;  %v332_v7 = vrot.slane %v330_v1, 1  ;;  %v2136_v24 = vcombine.low %v255_v61, %v256_v2 }
  0x34   : > { %v335_v14 = vshrl.u32 %v2011_v8, 16 }
  0x35   : > { %2386 = vmatpush3.bf16.msra.mxu0 %v2663_v9  ;;  %v2012_v9 = vcombine.low %v256_v2, %v275_v5  ;;  %v333_v13 = vor.u32 %v332_v7, %v328_v0  ;;  %v2142_v0 = vcombine.low %v259_v55, %v260_v57  ;;  %v2720_v5 = vld [vmem:[%s3129_s1 + $0x1b0] sm:$0xff]   ;;  %v2721_v7 = vld [vmem:[%s3129_s1 + $0x1f8] sm:$0xff]  }
  0x36   : > { %2387 = vmatprep.subr.bf16.mxu0 %v2668_v12  ;;  %2514 = vmatpush3.bf16.msra.mxu1 %v2662_v15  ;;  %v326_v12 = vor.u32 %v325_v6, %v321_v62  ;;  %v337_v15 = vshll.u32 %v2011_v8, 16 }
  0x37   : > { %2515 = vmatprep.subr.bf16.mxu1 %v2669_v20  ;;  %v342_v17 = vshrl.u32 %v2012_v9, 16 }
  0x38   : > { %864 = vmatmul.mubr.bf16.gmra.mrb[8].mxu0 %v2103_v16  ;;  %v2695_v16 = vld [vmem:[%s3129_s1 + $0x188] sm:$0xff]   ;;  %v2135_v19 = vcombine.low %v326_v12, %v333_v13  ;;  %v2723_v13 = vld [vmem:[%s3129_s1 + $0x1b8] sm:$0xff]  }
  0x39   : > { %2388 = vmatpush3.bf16.msra.mxu0 %v2670_v18  ;;  %871 = vmatprep.mubr.bf16.mxu0 %v2674_v26  ;;  %v344_v18 = vshll.u32 %v2012_v9, 16 }
  0x3a   : > { %2389 = vmatprep.subr.bf16.mxu0 %v2671_v21  ;;  %2516 = vmatpush3.bf16.msra.mxu1 %v2669_v20  ;;  %v339_v20 = vrot.slane %v337_v15, 1  ;;  %v2698_v21 = vld [vmem:[%s3129_s1 + $0x1d0] sm:$0xff]   ;;  %v2169_v15 = vld [vmem:[%s2880_s20 + $0x8] sm:$0xf] }
  0x3b   : > { %2517 = vmatprep.subr.bf16.mxu1 %v2672_v35  ;;  %v346_v22 = vrot.slane %v344_v18, 1  ;;  %2523 = vmatprep.mubr.bf16.mxu1 %v2135_v19  ;;  %v2185_v18 = vld [vmem:[%s2880_s20 + $0xc] sm:$0x1]  ;;  %v2186_v19 = vld [vmem:[%s2880_s20 + $0x14] sm:$0x1] }
  0x3c   : > { %v340_v25 = vor.u32 %v339_v20, %v335_v14  ;;  %v2724_v14 = vld [vmem:[%s2880_s20 + $0x50] ss:$8 sps:$4 sm:$0xff]  }
  0x3d   : > { %2390 = vmatpush3.bf16.msra.mxu0 %v2673_v23  ;;  %v2696_v23 = vld [vmem:[%s2880_s20 + $0x58] ss:$8 sps:$4 sm:$0xff]   ;;  %v347_v26 = vor.u32 %v346_v22, %v342_v17 }
  0x3e   : > { %2391 = vmatprep.subr.bf16.mxu0 %v2678_v34  ;;  %2518 = vmatpush3.bf16.msra.mxu1 %v2672_v35  ;;  %v257_v34 = vld [vmem:[%s2880_s20 + $0x20] sm:$0xf]  ;;  %v258_v35 = vld [vmem:[%s2880_s20 + $0x28] sm:$0xf]  ;;  %v2722_v22 = vld [vmem:[%s3129_s1 + $0x238] sm:$0xff]  }
  0x3f   : > { %2519 = vmatprep.subr.bf16.mxu1 %v2679_v43  ;;  %v2138_v29 = vcombine.low %v340_v25, %v347_v26  ;;  %v2139_v39 = vcombine.low %v257_v34, %v258_v35  ;;  %v2014_v40 = vcombine.low %v258_v35, %v277_v37  ;;  %v2172_v25 = vld [vmem:[%s2880_s20 + $0x20] sm:$0xf]  ;;  %v2187_v26 = vld [vmem:[%s2880_s20 + $0x1c] sm:$0x1]  ;;  %v2173_v35 = vld [vmem:[%s2880_s20 + $0x28] sm:$0xf] }
  0x40   : > { %872 = vmatmul.mubr.bf16.gmra.mrb[12].mxu0 %v2106_v36  ;;  %v276_v36 = vld [vmem:[%s2880_s20 + $0x24] sm:$0x1] }
  0x41   : > { %2392 = vmatpush3.bf16.msra.mxu0 %v2680_v42  ;;  %1145 = vmatprep.mubr.bf16.mxu0 %v2684_v50  ;;  %v2013_v38 = vcombine.low %v257_v34, %v276_v36  ;;  %v2702_v42 = vld [vmem:[%s3129_s1 + $0x218] sm:$0xff]   ;;  %v358_v44 = vshll.u32 %v2014_v40, 16  ;;  %v2713_v50 = vld [vmem:[%s3129_s1 + $0x1a8] sm:$0xff]   ;;  %v356_v51 = vshrl.u32 %v2014_v40, 16  ;;  %v2174_v40 = vld [vmem:[%s2880_s20 + $0x30] sm:$0xf] }
  0x42   : > { %2393 = vmatprep.subr.bf16.mxu0 %v2681_v46  ;;  %2520 = vmatpush3.bf16.msra.mxu1 %v2679_v43  ;;  %v2711_v46 = vld [vmem:[%s3129_s1 + $0x1e8] sm:$0xff]  }
  0x43   : > { %2521 = vmatprep.subr.bf16.mxu1 %v2682_v59  ;;  %v351_v43 = vshll.u32 %v2013_v38, 16  ;;  %v349_v47 = vshrl.u32 %v2013_v38, 16  ;;  %v360_v54 = vrot.slane %v358_v44, 1  ;;  %v2190_v44 = vld [vmem:[%s2880_s20 + $0x34] sm:$0x1] }
  0x45   : > { %2394 = vmatpush3.bf16.msra.mxu0 %v2683_v49  ;;  %v353_v48 = vrot.slane %v351_v43, 1  ;;  %v2709_v49 = vld [vmem:[%s3129_s1 + $0x220] sm:$0xff]   ;;  %v2189_v43 = vld [vmem:[%s2880_s20 + $0x2c] sm:$0x1] }
  0x46   : > { %2431 = vmatprep.subr.bf16.mxu0 %v2688_v58  ;;  %2522 = vmatpush3.bf16.msra.mxu1 %v2682_v59  ;;  %v278_v58 = vld [vmem:[%s2880_s20 + $0x34] sm:$0x1]  ;;  %v279_v59 = vld [vmem:[%s2880_s20 + $0x3c] sm:$0x1] }
  0x47   : > { %2531 = vmatprep.subr.bf16.mxu1 %v2689_v3  ;;  %v354_v53 = vor.u32 %v353_v48, %v349_v47  ;;  %v2015_v61 = vcombine.low %v259_v55, %v278_v58  ;;  %v2016_v62 = vcombine.low %v260_v57, %v279_v59  ;;  %v2197_v47 = vcombine.low %v2173_v35, %v2189_v43  ;;  %v2192_v55 = vld [vmem:[%s2880_s20 + $0x44] sm:$0x1] }
  0x48   : > { %1146 = vmatmul.mubr.bf16.vlgmr.msra.gmra.mrb[16].mxu0 %v2133_v60  ;;  %v361_v60 = vor.u32 %v360_v54, %v356_v51  ;;  %v2198_v48 = vcombine.low %v2174_v40, %v2190_v44  ;;  %v2191_v54 = vld [vmem:[%s2880_s20 + $0x3c] sm:$0x1] }
  0x49   : > { %2432 = vmatpush3.bf16.msra.mxu0 %v2692_v10  ;;  %1153 = vmatprep.mubr.bf16.mxu0 %v2696_v23  ;;  %v365_v2 = vshll.u32 %v2015_v61, 16  ;;  %v363_v4 = vshrl.u32 %v2015_v61, 16  ;;  %v370_v6 = vshrl.u32 %v2016_v62, 16  ;;  %v2719_v10 = vld [vmem:[%s3129_s1 + $0x230] sm:$0xff]   ;;  %v2193_v23 = vcombine.low %v2169_v15, %v2185_v18 }
  0x4a   : > { %2433 = vmatprep.subr.bf16.mxu0 %v2693_v11  ;;  %2524 = vmatmul.mubr.bf16.vlgmr.msra.gmra.mrb[0].mxu1 %v2138_v29  ;;  %v2141_v1 = vcombine.low %v354_v53, %v361_v60  ;;  %v1343_v58 = vshrl.u32 %v2197_v47, 16  ;;  %v1345_v59 = vshll.u32 %v2197_v47, 16  ;;  %v2736_v60 = vld [vmem:[%s2880_s20 + $0x70] ss:$8 sps:$4 sm:$0xff]  }
  0x4b   : > { %2532 = vmatpush3.bf16.msra.mxu1 %v2689_v3  ;;  %v372_v3 = vshll.u32 %v2016_v62, 16  ;;  %v367_v8 = vrot.slane %v365_v2, 1  ;;  %v1350_v62 = vshrl.u32 %v2198_v48, 16 }
  0x4c   : > { %2533 = vmatprep.subr.bf16.mxu1 %v2694_v30  ;;  %2527 = vmatprep.mubr.bf16.mxu1 %v2141_v1  ;;  %v1347_v2 = vrot.slane %v1345_v59, 1 }
  0x4d   : > { %2434 = vmatpush3.bf16.msra.mxu0 %v2695_v16  ;;  %v374_v9 = vrot.slane %v372_v3, 1  ;;  %v368_v11 = vor.u32 %v367_v8, %v363_v4  ;;  %v2170_v16 = vld [vmem:[%s2880_s20 + $0x10] sm:$0xf] }
  0x4e   : > { %2435 = vmatprep.subr.bf16.mxu0 %v2698_v21  ;;  %v2249_v20 = vcombine.low %v2169_v15, %v2170_v16  ;;  %v2171_v21 = vld [vmem:[%s2880_s20 + $0x18] sm:$0xf] }
  0x4f   : > { %2534 = vmatpush3.bf16.msra.mxu1 %v2694_v30  ;;  %v375_v12 = vor.u32 %v374_v9, %v370_v6  ;;  %v2730_v30 = vld [vmem:[%s2880_s20 + $0x60] ss:$8 sps:$4 sm:$0xff]   ;;  %v2252_v53 = vcombine.low %v2171_v21, %v2172_v25 }
  0x50   : > { %1154 = vmatmul.mubr.bf16.gmra.mrb[20].mxu0 %v2136_v24  ;;  %2535 = vmatprep.subr.bf16.mxu1 %v2699_v32  ;;  %v2194_v24 = vcombine.low %v2170_v16, %v2186_v19  ;;  %v2255_v16 = vcombine.low %v2173_v35, %v2174_v40 }
  0x51   : > { %2436 = vmatpush3.bf16.msra.mxu0 %v2700_v27  ;;  %1161 = vmatprep.mubr.bf16.mxu0 %v2704_v33  ;;  %v2144_v17 = vcombine.low %v368_v11, %v375_v12  ;;  %v2188_v27 = vld [vmem:[%s2880_s20 + $0x24] sm:$0x1] }
  0x52   : > { %2437 = vmatprep.subr.bf16.mxu0 %v2701_v28  ;;  %v2195_v28 = vcombine.low %v2171_v21, %v2187_v26  ;;  %v2196_v29 = vcombine.low %v2172_v25, %v2188_v27  ;;  %v1322_v33 = vshrl.u32 %v2194_v24, 16  ;;  %v1324_v34 = vshll.u32 %v2194_v24, 16 }
  0x53   : > { %2536 = vmatpush3.bf16.msra.mxu1 %v2699_v32  ;;  %v1317_v32 = vshll.u32 %v2193_v23, 16 }
  0x54   : > { %2537 = vmatprep.subr.bf16.mxu1 %v2702_v42  ;;  %2528 = vmatmul.mubr.bf16.gmra.mrb[4].mxu1 %v2144_v17  ;;  %v1329_v36 = vshrl.u32 %v2195_v28, 16  ;;  %v1331_v37 = vshll.u32 %v2195_v28, 16  ;;  %v1336_v38 = vshrl.u32 %v2196_v29, 16  ;;  %v2738_v17 = vld [vmem:[%s2880_s20 + $0x80] ss:$8 sps:$4 sm:$0xff]  }
  0x55   : > { %2438 = vmatpush3.bf16.msra.mxu0 %v2703_v31  ;;  %v1315_v31 = vshrl.u32 %v2193_v23, 16 }
  0x56   : > { %2439 = vmatprep.subr.bf16.mxu0 %v2708_v41  ;;  %v1319_v41 = vrot.slane %v1317_v32, 1 }
  0x57   : > { %2538 = vmatpush3.bf16.msra.mxu1 %v2702_v42  ;;  %v1326_v42 = vrot.slane %v1324_v34, 1 }
  0x58   : > { %1162 = vmatmul.mubr.bf16.gmra.mrb[24].mxu0 %v2139_v39  ;;  %2539 = vmatprep.subr.bf16.mxu1 %v2709_v49  ;;  %v1338_v39 = vshll.u32 %v2196_v29, 16  ;;  %v1320_v51 = vor.u32 %v1319_v41, %v1315_v31 }
  0x59   : > { %2440 = vmatpush3.bf16.msra.mxu0 %v2710_v45  ;;  %1169 = vmatprep.mubr.bf16.mxu0 %v2714_v52  ;;  %v1333_v45 = vrot.slane %v1331_v37, 1  ;;  %v1327_v52 = vor.u32 %v1326_v42, %v1322_v33 }
  0x5a   : > { %2441 = vmatprep.subr.bf16.mxu0 %v2711_v46  ;;  %v1340_v46 = vrot.slane %v1338_v39, 1 }
  0x5b   : > { %2540 = vmatpush3.bf16.msra.mxu1 %v2709_v49  ;;  %v2175_v49 = vld [vmem:[%s2880_s20 + $0x38] sm:$0xf]  ;;  %v2251_v61 = vcombine.low %v1320_v51, %v1327_v52 }
  0x5c   : > { %2541 = vmatprep.subr.bf16.mxu1 %v2712_v63  ;;  %v1341_v57 = vor.u32 %v1340_v46, %v1336_v38 }
  0x5d   : > { %2442 = vmatpush3.bf16.msra.mxu0 %v2713_v50  ;;  %v2176_v50 = vld [vmem:[%s2880_s20 + $0x40] sm:$0xf]  ;;  %2547 = vmatprep.mubr.bf16.mxu1 %v2251_v61  ;;  %s2295_s20 = sshll.u32 %s3138_s15, 5 }
  0x5e   : > { %2443 = vmatprep.subr.bf16.mxu0 %v2718_v56  ;;  %v1334_v56 = vor.u32 %v1333_v45, %v1329_v36  ;;  %v2200_v3 = vcombine.low %v2176_v50, %v2192_v55  ;;  %v2258_v19 = vcombine.low %v2175_v49, %v2176_v50  ;;  %s3103_s19 = scalar_lea.vmem %s3130_s2, %s2295_s20 }
  0x5f   : > { %2542 = vmatpush3.bf16.msra.mxu1 %v2712_v63  ;;  %v1352_v63 = vshll.u32 %v2198_v48, 16 }
  0x60   : > { %1170 = vmatmul.mubr.bf16.gmra.mrb[28].mxu0 %v2142_v0  ;;  %2543 = vmatprep.subr.bf16.mxu1 %v2719_v10  ;;  %v2199_v0 = vcombine.low %v2175_v49, %v2191_v54  ;;  %v2254_v1 = vcombine.low %v1334_v56, %v1341_v57  ;;  %v1364_v8 = vshrl.u32 %v2200_v3, 16  ;;  %v1366_v9 = vshll.u32 %v2200_v3, 16 }
  0x61   : > { %2444 = vmatpush3.bf16.msra.mxu0 %v2720_v5  ;;  %1643 = vmatprep.mubr.bf16.mxu0 %v2724_v14  ;;  %v1354_v4 = vrot.slane %v1352_v63, 1 }
  0x62   : > { %2445 = vmatprep.subr.bf16.mxu0 %v2721_v7  ;;  %v1357_v5 = vshrl.u32 %v2199_v0, 16  ;;  %v1359_v6 = vshll.u32 %v2199_v0, 16  ;;  %v1348_v7 = vor.u32 %v1347_v2, %v1343_v58  ;;  %v1368_v12 = vrot.slane %v1366_v9, 1 }
  0x63   : > { %2544 = vmatpush3.bf16.msra.mxu1 %v2719_v10  ;;  %v1355_v10 = vor.u32 %v1354_v4, %v1350_v62 }
  0x64   : > { %2545 = vmatprep.subr.bf16.mxu1 %v2722_v22  ;;  %v1361_v11 = vrot.slane %v1359_v6, 1  ;;  %v1369_v15 = vor.u32 %v1368_v12, %v1364_v8 }
  0x65   : > { %2446 = vmatpush3.bf16.msra.mxu0 %v2723_v13  ;;  %v2257_v13 = vcombine.low %v1348_v7, %v1355_v10 }
  0x66   : > { %v1362_v14 = vor.u32 %v1361_v11, %v1357_v5 }
  0x67   : > { %2546 = vmatpush3.bf16.msra.mxu1 %v2722_v22 }
  0x68   : > { %1644 = vmatmul.mubr.bf16.vlgmr.msra.gmra.mrb[32].mxu0 %v2249_v20  ;;  %v2260_v18 = vcombine.low %v1362_v14, %v1369_v15 }
  0x69   : > { %1651 = vmatprep.mubr.bf16.mxu0 %v2730_v30 }
  0x6a   : > { %2548 = vmatmul.mubr.bf16.vlgmr.msra.gmra.mrb[0].mxu1 %v2254_v1 }
  0x6b   : > { %2551 = vmatprep.mubr.bf16.mxu1 %v2257_v13 }
  0x70   : > { %1652 = vmatmul.mubr.bf16.gmra.mrb[36].mxu0 %v2252_v53 }
  0x71   : > { %1659 = vmatprep.mubr.bf16.mxu0 %v2736_v60 }
  0x72   : > { %2552 = vmatmul.mubr.bf16.gmra.mrb[4].mxu1 %v2260_v18 }
  0x78   : > { %1660 = vmatmul.mubr.bf16.gmra.mrb[40].mxu0 %v2255_v16 }
  0x79   : > { %1667 = vmatprep.mubr.bf16.mxu0 %v2738_v17 }
  0x80   : > { %1668 = vmatmul.mubr.bf16.gmra.mrb[44].mxu0 %v2258_v19 }
  0xfb   : > { %v2343_v20 = vpop.f32.mrb[0].mxu0 }
  0xfc   : > { %v2344_v21 = vpop.f32.mrb[1].mxu0 }
  0xfd   : > { %v2345_v22 = vadd.f32 %v2344_v21, %v2343_v20  ;;  %v2346_v23 = vpop.f32.mrb[2].mxu0 }
  0xfe   : > { %v2347_v24 = vpop.f32.mrb[3].mxu0 }
  0xff   : > { %v2348_v25 = vadd.f32 %v2347_v24, %v2346_v23 }
 0x103   : > { %v2349_v26 = vpop.f32.mrb[4].mxu0 }
 0x104   : > { %v2350_v27 = vpop.f32.mrb[5].mxu0 }
 0x105   : > { %v2351_v28 = vadd.f32 %v2350_v27, %v2349_v26  ;;  %v2352_v29 = vpop.f32.mrb[6].mxu0 }
 0x106   : > { %v2353_v30 = vpop.f32.mrb[7].mxu0 }
 0x107   : > { %v2354_v31 = vadd.f32 %v2353_v30, %v2352_v29 }
 0x10b   : > { %v2355_v32 = vpop.f32.mrb[8].mxu0 }
 0x10c   : > { %v2356_v33 = vpop.f32.mrb[9].mxu0 }
 0x10d   : > { %v2357_v34 = vadd.f32 %v2356_v33, %v2355_v32  ;;  %v2358_v35 = vpop.f32.mrb[10].mxu0 }
 0x10e   : > { %v2359_v36 = vpop.f32.mrb[11].mxu0 }
 0x10f   : > { %v2360_v37 = vadd.f32 %v2359_v36, %v2358_v35 }
 0x113   : > { %v2361_v38 = vpop.f32.mrb[12].mxu0 }
 0x114   : > { %v2362_v39 = vpop.f32.mrb[13].mxu0 }
 0x115   : > { %v2363_v40 = vadd.f32 %v2362_v39, %v2361_v38  ;;  %v2364_v41 = vpop.f32.mrb[14].mxu0 }
 0x116   : > { %v2365_v42 = vpop.f32.mrb[15].mxu0 }
 0x117   : > { %v2366_v43 = vadd.f32 %v2365_v42, %v2364_v41 }
 0x11b   : > { %v2395_v44 = vpop.f32.mrb[16].mxu0 }
 0x11c   : > { %v2396_v45 = vpop.f32.mrb[17].mxu0 }
 0x11d   : > { %v2397_v46 = vadd.f32 %v2396_v45, %v2395_v44  ;;  %v2398_v47 = vpop.f32.mrb[18].mxu0 }
 0x11e   : > { %v2399_v48 = vpop.f32.mrb[19].mxu0 }
 0x11f   : > { %v2558_v49 = vadd.f32 %v2397_v46, %v2345_v22  ;;  %v2400_v50 = vadd.f32 %v2399_v48, %v2398_v47 }
 0x121   : > { %v2564_v51 = vadd.f32 %v2400_v50, %v2348_v25 }
 0x123   : > { %v2401_v52 = vpop.f32.mrb[20].mxu0 }
 0x124   : > { %v2402_v53 = vpop.f32.mrb[21].mxu0 }
 0x125   : > { %v2403_v54 = vadd.f32 %v2402_v53, %v2401_v52  ;;  %v2404_v55 = vpop.f32.mrb[22].mxu0 }
 0x126   : > { %v2405_v56 = vpop.f32.mrb[23].mxu0 }
 0x127   : > { %v2555_v57 = vadd.f32 %v2403_v54, %v2351_v28  ;;  %v2406_v58 = vadd.f32 %v2405_v56, %v2404_v55 }
 0x129   : > { %v2561_v59 = vadd.f32 %v2406_v58, %v2354_v31 }
 0x12b   : > { %v2407_v60 = vpop.f32.mrb[24].mxu0 }
 0x12c   : > { %v2408_v61 = vpop.f32.mrb[25].mxu0 }
 0x12d   : > { %v2409_v62 = vadd.f32 %v2408_v61, %v2407_v60  ;;  %v2410_v63 = vpop.f32.mrb[26].mxu0 }
 0x12e   : > { %v2411_v0 = vpop.f32.mrb[27].mxu0 }
 0x12f   : > { %v2570_v1 = vadd.f32 %v2409_v62, %v2357_v34  ;;  %v2412_v2 = vadd.f32 %v2411_v0, %v2410_v63 }
 0x131   : > { %v2576_v3 = vadd.f32 %v2412_v2, %v2360_v37 }
 0x133   : > { %v2413_v4 = vpop.f32.mrb[28].mxu0 }
 0x134   : > { %v2414_v5 = vpop.f32.mrb[29].mxu0 }
 0x135   : > { %v2415_v6 = vadd.f32 %v2414_v5, %v2413_v4  ;;  %v2416_v7 = vpop.f32.mrb[30].mxu0 }
 0x136   : > { %v2417_v8 = vpop.f32.mrb[31].mxu0 }
 0x137   : > { %v3095_v9 = vadd.f32 %v2415_v6, %v2363_v40  ;;  %v2418_v10 = vadd.f32 %v2417_v8, %v2416_v7 }
 0x139   : > { %v3097_v11 = vadd.f32 %v2418_v10, %v2366_v43 }
 0x13b   : > { %v2447_v12 = vpop.f32.mrb[32].mxu0 }
 0x13c   : > { %v2448_v13 = vpop.f32.mrb[33].mxu0 }
 0x13d   : > { %v2449_v14 = vadd.f32 %v2448_v13, %v2447_v12  ;;  %v2450_v15 = vpop.f32.mrb[34].mxu0  ;;  %v2549_v21 = vpop.f32.mrb[0].mxu1 }
 0x13e   : > { %v2451_v16 = vpop.f32.mrb[35].mxu0  ;;  %v1710_v23 = vpop.f32.mrb[1].mxu1 }
 0x13f   : > { %v2559_v17 = vadd.f32 %v2558_v49, %v2449_v14  ;;  %v2452_v18 = vadd.f32 %v2451_v16, %v2450_v15  ;;  %v2550_v27 = vpop.f32.mrb[2].mxu1 }
 0x140   : > { %v1713_v29 = vpop.f32.mrb[3].mxu1 }
 0x141   : > { %v2565_v19 = vadd.f32 %v2564_v51, %v2452_v18  ;;  %v2560_v26 = vadd.f32 %v2559_v17, %v1710_v23 }
 0x143   : > { %v2453_v20 = vpop.f32.mrb[36].mxu0  ;;  %v2566_v32 = vadd.f32 %v2565_v19, %v1713_v29 }
 0x144   : > { %v2454_v22 = vpop.f32.mrb[37].mxu0 }
 0x145   : > { %v2455_v24 = vadd.f32 %v2454_v22, %v2453_v20  ;;  %v2456_v25 = vpop.f32.mrb[38].mxu0  ;;  %v1749_v35 = vpack.c.bf16 %v2566_v32, %v2560_v26  ;;  %v2553_v40 = vpop.f32.mrb[4].mxu1 }
 0x146   : > { %v2457_v28 = vpop.f32.mrb[39].mxu0  ;;  %v1726_v42 = vpop.f32.mrb[5].mxu1 }
 0x147   : > { %v2556_v30 = vadd.f32 %v2555_v57, %v2455_v24  ;;  %v2458_v31 = vadd.f32 %v2457_v28, %v2456_v25  ;;  %2308 = vst [vmem:[%s3103_s19] sm:$0xff] %v1749_v35   ;;  %v1789_v38 = vunpack.c.l.bf16 %v1749_v35  ;;  %v1790_v39 = vunpack.c.h.bf16 %v1749_v35  ;;  %v2554_v49 = vpop.f32.mrb[6].mxu1 }
 0x148   : > { %v1729_v53 = vpop.f32.mrb[7].mxu1 }
 0x149   : > { %v2557_v33 = vadd.f32 %v2556_v30, %v2549_v21  ;;  %v2562_v34 = vadd.f32 %v2561_v59, %v2458_v31  ;;  %v1797_v46 = vadd.f32 %v1790_v39, %v1789_v38  ;;  %v1811_v47 = vmul.f32 %v1789_v38, %v1789_v38 }
 0x14a   : > { %v1812_v48 = vmul.f32 %v1790_v39, %v1790_v39 }
 0x14b   : > { %v2563_v36 = vadd.f32 %v2562_v34, %v2550_v27  ;;  %v2459_v37 = vpop.f32.mrb[40].mxu0 }
 0x14c   : > { %v2460_v41 = vpop.f32.mrb[41].mxu0  ;;  %v1819_v56 = vadd.f32 %v1812_v48, %v1811_v47 }
 0x14d   : > { %v1750_v43 = vpack.c.bf16 %v2563_v36, %v2557_v33  ;;  %v2461_v44 = vadd.f32 %v2460_v41, %v2459_v37  ;;  %v2462_v45 = vpop.f32.mrb[42].mxu0 }
 0x14e   : > { %v2463_v50 = vpop.f32.mrb[43].mxu0 }
 0x14f   : > { %2324 = vst [vmem:[%s3103_s19 + $0x8] sm:$0xff] %v1750_v43   ;;  %v1791_v51 = vunpack.c.l.bf16 %v1750_v43  ;;  %v1792_v52 = vunpack.c.h.bf16 %v1750_v43  ;;  %v2571_v54 = vadd.f32 %v2570_v1, %v2461_v44  ;;  %v2464_v55 = vadd.f32 %v2463_v50, %v2462_v45 }
 0x151   : > { %v1798_v57 = vadd.f32 %v1797_v46, %v1791_v51  ;;  %v1813_v58 = vmul.f32 %v1791_v51, %v1791_v51  ;;  %v2572_v59 = vadd.f32 %v2571_v54, %v1726_v42  ;;  %v2577_v60 = vadd.f32 %v2576_v3, %v2464_v55 }
 0x152   : > { %v1814_v62 = vmul.f32 %v1792_v52, %v1792_v52 }
 0x153   : > { %v1799_v61 = vadd.f32 %v1798_v57, %v1792_v52  ;;  %v1820_v63 = vadd.f32 %v1819_v56, %v1813_v58  ;;  %v2465_v0 = vpop.f32.mrb[44].mxu0  ;;  %v2578_v2 = vadd.f32 %v2577_v60, %v1729_v53 }
 0x154   : > { %v2466_v4 = vpop.f32.mrb[45].mxu0 }
 0x155   : > { %v1821_v5 = vadd.f32 %v1820_v63, %v1814_v62  ;;  %v2467_v6 = vadd.f32 %v2466_v4, %v2465_v0  ;;  %v2468_v7 = vpop.f32.mrb[46].mxu0  ;;  %v1751_v8 = vpack.c.bf16 %v2578_v2, %v2572_v59 }
 0x156   : > { %v2469_v10 = vpop.f32.mrb[47].mxu0 }
 0x157   : > { %v2568_v1 = vadd.f32 %v3095_v9, %v2467_v6  ;;  %v2470_v12 = vadd.f32 %v2469_v10, %v2468_v7  ;;  %2325 = vst [vmem:[%s3103_s19 + $0x10] sm:$0xff] %v1751_v8   ;;  %v1793_v13 = vunpack.c.l.bf16 %v1751_v8  ;;  %v1794_v14 = vunpack.c.h.bf16 %v1751_v8 }
 0x159   : > { %v2569_v15 = vadd.f32 %v2568_v1, %v2553_v40  ;;  %v2574_v3 = vadd.f32 %v3097_v11, %v2470_v12  ;;  %v1800_v16 = vadd.f32 %v1799_v61, %v1793_v13  ;;  %v1815_v17 = vmul.f32 %v1793_v13, %v1793_v13 }
 0x15a   : > { %v1816_v20 = vmul.f32 %v1794_v14, %v1794_v14 }
 0x15b   : > { %v2575_v18 = vadd.f32 %v2574_v3, %v2554_v49  ;;  %v1801_v19 = vadd.f32 %v1800_v16, %v1794_v14  ;;  %v1822_v21 = vadd.f32 %v1821_v5, %v1815_v17 }
 0x15d   : > { %v1752_v22 = vpack.c.bf16 %v2575_v18, %v2569_v15  ;;  %v1823_v23 = vadd.f32 %v1822_v21, %v1816_v20 }
 0x15f   : > { %2326 = vst [vmem:[%s3103_s19 + $0x18] sm:$0xff] %v1752_v22   ;;  %v1795_v24 = vunpack.c.l.bf16 %v1752_v22  ;;  %v1796_v25 = vunpack.c.h.bf16 %v1752_v22 }
 0x161   : > { %v1802_v9 = vadd.f32 %v1801_v19, %v1795_v24  ;;  %v1817_v26 = vmul.f32 %v1795_v24, %v1795_v24  ;;  %v1818_v28 = vmul.f32 %v1796_v25, %v1796_v25 }
 0x163   : > { %v1803_v27 = vadd.f32 %v1802_v9, %v1796_v25  ;;  %v1824_v29 = vadd.f32 %v1823_v23, %v1817_v26 }
 0x165   : > { %v1804_v30 = vrot.slane %v1803_v27, 4  ;;  %v1825_v11 = vadd.f32 %v1824_v29, %v1818_v28 }
 0x167   : > { %v1805_v31 = vadd.f32 %v1804_v30, %v1803_v27  ;;  %v1826_v32 = vrot.slane %v1825_v11, 4 }
 0x169   : > { %v1806_v33 = vrot.slane %v1805_v31, 2  ;;  %v1827_v34 = vadd.f32 %v1826_v32, %v1825_v11 }
 0x16b   : > { %v1807_v35 = vadd.f32 %v1806_v33, %v1805_v31  ;;  %v1828_v36 = vrot.slane %v1827_v34, 2 }
 0x16d   : > { %v1808_v37 = vrot.slane %v1807_v35, 1  ;;  %v1829_v38 = vadd.f32 %v1828_v36, %v1827_v34 }
 0x16f   : > { %v1809_v39 = vadd.f32 %v1808_v37, %v1807_v35  ;;  %v1830_v40 = vrot.slane %v1829_v38, 1 }
 0x171   : > { %1810 = vst [vmem:[%s241_s23] sm:$0x1] %v1809_v39  ;;  %v1831_v41 = vadd.f32 %v1830_v40, %v1829_v38 }
 0x173   : > { %1832 = vst [vmem:[%s246_s26] sm:$0x1] %v1831_v41 }
 0x174 PF: > { %s15_s17 = sadd.s32 1, %s2762_s17   ;;  %s3133_s15 = smov %s2758_s16 }
 0x175   : > { %p12_p5 = scmp.ge.s32.totalorder %s15_s17, 4   ;;  %s3134_s16 = smov %s3136_s18 }
 0x177   :  { %14 = sbr.rel (!%p12_p5) target bundleno = 2 (0x2), region = 90 }

// kernel: bottleneck_pallas.6
= control target key start
LH: loop header
LB: loop body
LE: loop exit
PB: predicated region body
PF: predicated region fallthrough
CT: control target
= control target key end

     0   :  { %s1455_s3 = inlined_call_operand.vmem [shape: bf16[128,128], index: 3, kind: input, shape index: {}]   ;;  %s1456_s5 = inlined_call_operand.vmem [shape: bf16[128,128], index: 5, kind: input, shape index: {}]   ;;  %s1457_s0 = inlined_call_operand.vmem [shape: bf16[128,128], index: 0, kind: input, shape index: {}]   ;;  %s1458_s1 = inlined_call_operand.vmem [shape: f32[1,128], index: 1, kind: input, shape index: {}]   ;;  %s1459_s2 = inlined_call_operand.vmem [shape: f32[1,128], index: 2, kind: input, shape index: {}]   ;;  %s1460_s4 = inlined_call_operand.vmem [shape: bf16[128,128], index: 4, kind: input, shape index: {}]   ;;  %s1461_s6 = inlined_call_operand.vmem [shape: bf16[128,128], index: 6, kind: output, shape index: {0}]   ;;  %s1462_s7 = inlined_call_operand.vmem [shape: bf16[128,128], index: 7, kind: output, shape index: {1}]   ;;  %s1463_s8 = inlined_call_operand.vmem [shape: f32[1,1,128], index: 8, kind: output, shape index: {2}]   ;;  %s1464_s9 = inlined_call_operand.vmem [shape: f32[1,1,128], index: 9, kind: output, shape index: {3}]   ;;  %s1465_s10 = inlined_call_operand.vmem [shape: f32[1,1,128], index: 10, kind: output, shape index: {4}]   ;;  %s1466_s11 = inlined_call_operand.vmem [shape: f32[1,1,128], index: 11, kind: output, shape index: {5}]  }
   0x1   :  { %v1173_v0 = vld [vmem:[%s1455_s3] sm:$0xff]   ;;  %v1175_v2 = vld [vmem:[%s1455_s3 + $0x8] sm:$0xff]   ;;  %v1177_v4 = vld [vmem:[%s1455_s3 + $0x10] sm:$0xff]  }
   0x2   :  { %v1174_v1 = vld [vmem:[%s1456_s5] sm:$0xff]   ;;  %1109 = vmatprep.subr.bf16.mxu0 %v1173_v0  ;;  %v1176_v3 = vld [vmem:[%s1456_s5 + $0x8] sm:$0xff]   ;;  %v1178_v5 = vld [vmem:[%s1456_s5 + $0x10] sm:$0xff]  }
   0x3   :  { %1141 = vmatprep.subr.bf16.mxu1 %v1174_v1  ;;  %1110 = vmatpush3.bf16.msra.mxu0 %v1173_v0  ;;  %v1179_v6 = vld [vmem:[%s1455_s3 + $0x18] sm:$0xff]   ;;  %v1181_v8 = vld [vmem:[%s1455_s3 + $0x20] sm:$0xff]   ;;  %v1183_v10 = vld [vmem:[%s1455_s3 + $0x28] sm:$0xff]  }
   0x4   :  { %1142 = vmatpush3.bf16.msra.mxu1 %v1174_v1  ;;  %1111 = vmatprep.subr.bf16.mxu0 %v1175_v2  ;;  %v1180_v7 = vld [vmem:[%s1456_s5 + $0x18] sm:$0xff]   ;;  %v1182_v9 = vld [vmem:[%s1456_s5 + $0x20] sm:$0xff]   ;;  %v1184_v11 = vld [vmem:[%s1456_s5 + $0x28] sm:$0xff]  }
   0x5   :  { %1143 = vmatprep.subr.bf16.mxu1 %v1176_v3  ;;  %v945_v12 = vld [vmem:[%s1457_s0] sm:$0xff]   ;;  %v1056_v18 = vld [vmem:[%s1457_s0 + $0x8] sm:$0xff]   ;;  %v1057_v23 = vld [vmem:[%s1457_s0 + $0x10] sm:$0xff]  }
   0x6   :  { %v1299_v13 = vld [vmem:[%s1458_s1] ss:$0 sm:$0xff]  ;;  %v946_v15 = vunpack.c.l.bf16 %v945_v12  ;;  %v947_v16 = vunpack.c.h.bf16 %v945_v12  ;;  %v950_v21 = vunpack.c.l.bf16 %v1056_v18  ;;  %v951_v22 = vunpack.c.h.bf16 %v1056_v18  ;;  %v1185_v24 = vld [vmem:[%s1455_s3 + $0x30] sm:$0xff]   ;;  %v1058_v27 = vld [vmem:[%s1457_s0 + $0x18] sm:$0xff]  }
   0x7   :  { %1112 = vmatpush3.bf16.msra.mxu0 %v1175_v2  ;;  %v1304_v14 = vld [vmem:[%s1459_s2] ss:$0 sm:$0xff]  ;;  %v954_v25 = vunpack.c.l.bf16 %v1057_v23  ;;  %v955_v26 = vunpack.c.h.bf16 %v1057_v23  ;;  %v1186_v28 = vld [vmem:[%s1456_s5 + $0x30] sm:$0xff]   ;;  %v958_v35 = vunpack.c.l.bf16 %v1058_v27  ;;  %v959_v36 = vunpack.c.h.bf16 %v1058_v27  ;;  %v1187_v42 = vld [vmem:[%s1455_s3 + $0x38] sm:$0xff]  }
   0x8   :  { %1144 = vmatpush3.bf16.msra.mxu1 %v1176_v3  ;;  %1113 = vmatprep.subr.bf16.mxu0 %v1177_v4  ;;  %v1189_v17 = vld [vmem:[%s1460_s4] sm:$0xff]   ;;  %v69_v19 = vmul.f32 %v946_v15, %v1299_v13  ;;  %v70_v20 = vmul.f32 %v947_v16, %v1299_v13  ;;  %v71_v31 = vmul.f32 %v950_v21, %v1299_v13  ;;  %v1188_v43 = vld [vmem:[%s1456_s5 + $0x38] sm:$0xff]   ;;  %v1060_v56 = vld [vmem:[%s1457_s0 + $0x28] sm:$0xff]  }
   0x9   :  { %1145 = vmatprep.subr.bf16.mxu1 %v1178_v5  ;;  %1157 = vmatprep.mubr.bf16.mxu1 %v1189_v17  ;;  %v72_v32 = vmul.f32 %v951_v22, %v1299_v13  ;;  %v73_v33 = vmul.f32 %v954_v25, %v1299_v13  ;;  %v74_v34 = vmul.f32 %v955_v26, %v1299_v13  ;;  %v1059_v37 = vld [vmem:[%s1457_s0 + $0x20] sm:$0xff]   ;;  %v1061_v58 = vld [vmem:[%s1457_s0 + $0x30] sm:$0xff]   ;;  %v966_v63 = vunpack.c.l.bf16 %v1060_v56  ;;  %v1190_v1 = vld [vmem:[%s1460_s4 + $0x8] sm:$0xff]  }
   0xa   :  { %v92_v29 = vadd.f32 %v1304_v14, %v69_v19  ;;  %v93_v30 = vadd.f32 %v1304_v14, %v70_v20  ;;  %v94_v40 = vadd.f32 %v1304_v14, %v71_v31  ;;  %v962_v46 = vunpack.c.l.bf16 %v1059_v37  ;;  %v1192_v23 = vld [vmem:[%s1460_s4 + $0x18] sm:$0xff]   ;;  %v1193_v27 = vld [vmem:[%s1460_s4 + $0x20] sm:$0xff]  }
   0xb   :  { %1114 = vmatpush3.bf16.msra.mxu0 %v1177_v4  ;;  %v95_v41 = vadd.f32 %v1304_v14, %v72_v32  ;;  %v96_v44 = vadd.f32 %v1304_v14, %v73_v33  ;;  %v97_v45 = vadd.f32 %v1304_v14, %v74_v34  ;;  %v75_v50 = vmul.f32 %v958_v35, %v1299_v13 }
   0xc   :  { %1146 = vmatpush3.bf16.msra.mxu1 %v1178_v5  ;;  %1115 = vmatprep.subr.bf16.mxu0 %v1179_v6  ;;  %v108_v38 = vmax.f32 %v92_v29, 0.0  ;;  %v109_v39 = vmax.f32 %v93_v30, 0.0  ;;  %v110_v48 = vmax.f32 %v94_v40, 0.0  ;;  %v76_v53 = vmul.f32 %v959_v36, %v1299_v13 }
   0xd   :  { %1147 = vmatprep.subr.bf16.mxu1 %v1180_v7  ;;  %v111_v49 = vmax.f32 %v95_v41, 0.0  ;;  %v112_v51 = vmax.f32 %v96_v44, 0.0  ;;  %v113_v52 = vmax.f32 %v97_v45, 0.0  ;;  %v963_v54 = vunpack.c.h.bf16 %v1059_v37  ;;  %v1194_v37 = vld [vmem:[%s1460_s4 + $0x28] sm:$0xff]  }
   0xe   :  { %v124_v47 = vpack.c.bf16 %v109_v39, %v108_v38  ;;  %v77_v55 = vmul.f32 %v962_v46, %v1299_v13  ;;  %v98_v60 = vadd.f32 %v1304_v14, %v75_v50  ;;  %v99_v62 = vadd.f32 %v1304_v14, %v76_v53  ;;  %v1195_v39 = vld [vmem:[%s1460_s4 + $0x30] sm:$0xff]  }
   0xf   :  { %1116 = vmatpush3.bf16.msra.mxu0 %v1179_v6  ;;  %v78_v57 = vmul.f32 %v963_v54, %v1299_v13  ;;  %v125_v59 = vpack.c.bf16 %v111_v49, %v110_v48  ;;  %v126_v61 = vpack.c.bf16 %v113_v52, %v112_v51  ;;  %v967_v0 = vunpack.c.h.bf16 %v1060_v56  ;;  %v1191_v6 = vld [vmem:[%s1460_s4 + $0x10] sm:$0xff]  }
  0x10   :  { %1148 = vmatpush3.bf16.msra.mxu1 %v1180_v7  ;;  %1117 = vmatprep.subr.bf16.mxu0 %v1181_v8  ;;  %v100_v2 = vadd.f32 %v1304_v14, %v77_v55  ;;  %v970_v4 = vunpack.c.l.bf16 %v1061_v58  ;;  %v971_v5 = vunpack.c.h.bf16 %v1061_v58  ;;  %v114_v7 = vmax.f32 %v98_v60, 0.0 }
  0x11   :  { %1149 = vmatprep.subr.bf16.mxu1 %v1182_v9  ;;  %1125 = vmatprep.mubr.bf16.mxu0 %v124_v47  ;;  %v101_v3 = vadd.f32 %v1304_v14, %v78_v57 }
  0x12   :  { %v116_v12 = vmax.f32 %v100_v2, 0.0  ;;  %v81_v16 = vmul.f32 %v970_v4, %v1299_v13  ;;  %v82_v17 = vmul.f32 %v971_v5, %v1299_v13 }
  0x13   :  { %1118 = vmatpush3.bf16.msra.mxu0 %v1181_v8  ;;  %v115_v8 = vmax.f32 %v99_v62, 0.0  ;;  %v117_v15 = vmax.f32 %v101_v3, 0.0 }
  0x14   :  { %1150 = vmatpush3.bf16.msra.mxu1 %v1182_v9  ;;  %1119 = vmatprep.subr.bf16.mxu0 %v1183_v10  ;;  %v79_v9 = vmul.f32 %v966_v63, %v1299_v13  ;;  %v104_v25 = vadd.f32 %v1304_v14, %v81_v16  ;;  %v105_v26 = vadd.f32 %v1304_v14, %v82_v17 }
  0x15   :  { %1151 = vmatprep.subr.bf16.mxu1 %v1184_v11  ;;  %v127_v19 = vpack.c.bf16 %v115_v8, %v114_v7 }
  0x16   :  { %v102_v20 = vadd.f32 %v1304_v14, %v79_v9  ;;  %v120_v32 = vmax.f32 %v104_v25, 0.0  ;;  %v121_v33 = vmax.f32 %v105_v26, 0.0 }
  0x17   :  { %1120 = vmatpush3.bf16.msra.mxu0 %v1183_v10  ;;  %v80_v10 = vmul.f32 %v967_v0, %v1299_v13 }
  0x18   :  { %1152 = vmatpush3.bf16.msra.mxu1 %v1184_v11  ;;  %1121 = vmatprep.subr.bf16.mxu0 %v1185_v24  ;;  %v1062_v11 = vld [vmem:[%s1457_s0 + $0x38] sm:$0xff]   ;;  %v130_v38 = vpack.c.bf16 %v121_v33, %v120_v32 }
  0x19   :  { %1153 = vmatprep.subr.bf16.mxu1 %v1186_v28  ;;  %v974_v18 = vunpack.c.l.bf16 %v1062_v11  ;;  %v103_v21 = vadd.f32 %v1304_v14, %v80_v10  ;;  %v975_v22 = vunpack.c.h.bf16 %v1062_v11 }
  0x1b   :  { %1122 = vmatpush3.bf16.msra.mxu0 %v1185_v24  ;;  %v128_v24 = vpack.c.bf16 %v117_v15, %v116_v12  ;;  %v119_v29 = vmax.f32 %v103_v21, 0.0  ;;  %v83_v30 = vmul.f32 %v974_v18, %v1299_v13  ;;  %v84_v31 = vmul.f32 %v975_v22, %v1299_v13 }
  0x1c   :  { %1154 = vmatpush3.bf16.msra.mxu1 %v1186_v28  ;;  %1123 = vmatprep.subr.bf16.mxu0 %v1187_v42  ;;  %v118_v28 = vmax.f32 %v102_v20, 0.0 }
  0x1d   :  { %1155 = vmatprep.subr.bf16.mxu1 %v1188_v43  ;;  %v106_v35 = vadd.f32 %v1304_v14, %v83_v30  ;;  %v107_v36 = vadd.f32 %v1304_v14, %v84_v31  ;;  %v1196_v14 = vld [vmem:[%s1460_s4 + $0x38] sm:$0xff]  }
  0x1e   :  { %v129_v34 = vpack.c.bf16 %v119_v29, %v118_v28 }
  0x1f   :  { %1124 = vmatpush3.bf16.msra.mxu0 %v1187_v42  ;;  %v122_v13 = vmax.f32 %v106_v35, 0.0  ;;  %v123_v40 = vmax.f32 %v107_v36, 0.0 }
  0x20   :  { %1156 = vmatpush3.bf16.msra.mxu1 %v1188_v43 }
  0x21   :  { %v131_v41 = vpack.c.bf16 %v123_v40, %v122_v13 }
  0x22   :  { %1126 = vmatmul.mubr.bf16.vlgmr.msra.gmra.mrb[0].mxu0 %v125_v59 }
  0x23   :  { %1158 = vmatmul.mubr.bf16.vlgmr.msra.gmra.mrb[0].mxu1 %v1190_v1  ;;  %1129 = vmatprep.mubr.bf16.mxu0 %v126_v61 }
  0x24   :  { %1161 = vmatprep.mubr.bf16.mxu1 %v1191_v6 }
  0x2a   :  { %1130 = vmatmul.mubr.bf16.gmra.mrb[4].mxu0 %v127_v19 }
  0x2b   :  { %1162 = vmatmul.mubr.bf16.gmra.mrb[4].mxu1 %v1192_v23  ;;  %1133 = vmatprep.mubr.bf16.mxu0 %v128_v24 }
  0x2c   :  { %1165 = vmatprep.mubr.bf16.mxu1 %v1193_v27 }
  0x32   :  { %1134 = vmatmul.mubr.bf16.gmra.mrb[8].mxu0 %v129_v34 }
  0x33   :  { %1166 = vmatmul.mubr.bf16.gmra.mrb[8].mxu1 %v1194_v37  ;;  %1137 = vmatprep.mubr.bf16.mxu0 %v130_v38 }
  0x34   :  { %1169 = vmatprep.mubr.bf16.mxu1 %v1195_v39 }
  0x3a   :  { %1138 = vmatmul.mubr.bf16.gmra.mrb[12].mxu0 %v131_v41 }
  0x3b   :  { %1170 = vmatmul.mubr.bf16.gmra.mrb[12].mxu1 %v1196_v14 }
  0xf5   :  { %v1127_v42 = vpop.f32.mrb[0].mxu0 }
  0xf6   :  { %v1159_v43 = vpop.f32.mrb[0].mxu1  ;;  %v230_v44 = vpop.f32.mrb[1].mxu0 }
  0xf7   :  { %v611_v45 = vpop.f32.mrb[1].mxu1  ;;  %v1128_v46 = vpop.f32.mrb[2].mxu0 }
  0xf8   :  { %v294_v47 = vpack.c.bf16 %v1128_v46, %v1127_v42  ;;  %v1160_v48 = vpop.f32.mrb[2].mxu1  ;;  %v233_v49 = vpop.f32.mrb[3].mxu0 }
  0xf9   :  { %v675_v50 = vpack.c.bf16 %v1160_v48, %v1159_v43  ;;  %v293_v51 = vpack.c.bf16 %v233_v49, %v230_v44  ;;  %v614_v52 = vpop.f32.mrb[3].mxu1 }
  0xfa   :  { %1063 = vst [vmem:[%s1461_s6 + $0x8] sm:$0xff] %v294_v47   ;;  %v674_v53 = vpack.c.bf16 %v614_v52, %v611_v45  ;;  %v375_v54 = vunpack.c.l.bf16 %v294_v47  ;;  %v376_v60 = vunpack.c.h.bf16 %v294_v47 }
  0xfb   :  { %1070 = vst [vmem:[%s1462_s7 + $0x8] sm:$0xff] %v675_v50   ;;  %v756_v55 = vunpack.c.l.bf16 %v675_v50  ;;  %980 = vst [vmem:[%s1461_s6] sm:$0xff] %v293_v51   ;;  %v373_v56 = vunpack.c.l.bf16 %v293_v51  ;;  %v374_v57 = vunpack.c.h.bf16 %v293_v51  ;;  %v757_v7 = vunpack.c.h.bf16 %v675_v50 }
  0xfc   :  { %1020 = vst [vmem:[%s1462_s7] sm:$0xff] %v674_v53   ;;  %v754_v58 = vunpack.c.l.bf16 %v674_v53  ;;  %v755_v59 = vunpack.c.h.bf16 %v674_v53  ;;  %v413_v6 = vmul.f32 %v375_v54, %v375_v54  ;;  %v414_v24 = vmul.f32 %v376_v60, %v376_v60 }
  0xfd   :  { %v389_v61 = vadd.f32 %v374_v57, %v373_v56  ;;  %v411_v62 = vmul.f32 %v373_v56, %v373_v56  ;;  %v1131_v63 = vpop.f32.mrb[4].mxu0  ;;  %v412_v0 = vmul.f32 %v374_v57, %v374_v57  ;;  %v794_v8 = vmul.f32 %v756_v55, %v756_v55 }
  0xfe   :  { %v770_v1 = vadd.f32 %v755_v59, %v754_v58  ;;  %v792_v2 = vmul.f32 %v754_v58, %v754_v58  ;;  %v793_v3 = vmul.f32 %v755_v59, %v755_v59  ;;  %v1163_v4 = vpop.f32.mrb[4].mxu1  ;;  %v246_v5 = vpop.f32.mrb[5].mxu0  ;;  %v795_v29 = vmul.f32 %v757_v7, %v757_v7 }
  0xff   :  { %v390_v9 = vadd.f32 %v389_v61, %v375_v54  ;;  %v627_v10 = vpop.f32.mrb[5].mxu1  ;;  %v1132_v11 = vpop.f32.mrb[6].mxu0  ;;  %v427_v12 = vadd.f32 %v412_v0, %v411_v62 }
 0x100   :  { %v771_v15 = vadd.f32 %v770_v1, %v756_v55  ;;  %v808_v16 = vadd.f32 %v793_v3, %v792_v2  ;;  %v296_v17 = vpack.c.bf16 %v1132_v11, %v1131_v63  ;;  %v1164_v18 = vpop.f32.mrb[6].mxu1  ;;  %v249_v19 = vpop.f32.mrb[7].mxu0 }
 0x101   :  { %v677_v20 = vpack.c.bf16 %v1164_v18, %v1163_v4  ;;  %v295_v21 = vpack.c.bf16 %v249_v19, %v246_v5  ;;  %v391_v22 = vadd.f32 %v390_v9, %v376_v60  ;;  %v630_v23 = vpop.f32.mrb[7].mxu1  ;;  %v428_v25 = vadd.f32 %v427_v12, %v413_v6 }
 0x102   :  { %v809_v26 = vadd.f32 %v808_v16, %v794_v8  ;;  %1065 = vst [vmem:[%s1461_s6 + $0x18] sm:$0xff] %v296_v17   ;;  %v379_v30 = vunpack.c.l.bf16 %v296_v17  ;;  %v676_v32 = vpack.c.bf16 %v630_v23, %v627_v10  ;;  %v380_v33 = vunpack.c.h.bf16 %v296_v17 }
 0x103   :  { %1072 = vst [vmem:[%s1462_s7 + $0x18] sm:$0xff] %v677_v20   ;;  %1064 = vst [vmem:[%s1461_s6 + $0x10] sm:$0xff] %v295_v21   ;;  %v377_v27 = vunpack.c.l.bf16 %v295_v21  ;;  %v378_v28 = vunpack.c.h.bf16 %v295_v21  ;;  %v429_v31 = vadd.f32 %v428_v25, %v414_v24  ;;  %v760_v34 = vunpack.c.l.bf16 %v677_v20 }
 0x104   :  { %v761_v38 = vunpack.c.h.bf16 %v677_v20  ;;  %1071 = vst [vmem:[%s1462_s7 + $0x10] sm:$0xff] %v676_v32   ;;  %v758_v39 = vunpack.c.l.bf16 %v676_v32  ;;  %v759_v13 = vunpack.c.h.bf16 %v676_v32  ;;  %v772_v40 = vadd.f32 %v771_v15, %v757_v7 }
 0x105   :  { %v392_v35 = vadd.f32 %v391_v22, %v377_v27  ;;  %v415_v36 = vmul.f32 %v377_v27, %v377_v27  ;;  %v1135_v37 = vpop.f32.mrb[8].mxu0  ;;  %v416_v43 = vmul.f32 %v378_v28, %v378_v28  ;;  %v810_v45 = vadd.f32 %v809_v26, %v795_v29 }
 0x106   :  { %v1167_v41 = vpop.f32.mrb[8].mxu1  ;;  %v262_v14 = vpop.f32.mrb[9].mxu0  ;;  %v417_v48 = vmul.f32 %v379_v30, %v379_v30  ;;  %v773_v49 = vadd.f32 %v772_v40, %v758_v39  ;;  %v796_v50 = vmul.f32 %v758_v39, %v758_v39  ;;  %v797_v60 = vmul.f32 %v759_v13, %v759_v13 }
 0x107   :  { %v393_v42 = vadd.f32 %v392_v35, %v378_v28  ;;  %v430_v44 = vadd.f32 %v429_v31, %v415_v36  ;;  %v643_v46 = vpop.f32.mrb[9].mxu1  ;;  %v1136_v47 = vpop.f32.mrb[10].mxu0  ;;  %v418_v62 = vmul.f32 %v380_v33, %v380_v33  ;;  %v798_v63 = vmul.f32 %v760_v34, %v760_v34 }
 0x108   :  { %v298_v51 = vpack.c.bf16 %v1136_v47, %v1135_v37  ;;  %v1168_v52 = vpop.f32.mrb[10].mxu1  ;;  %v265_v53 = vpop.f32.mrb[11].mxu0  ;;  %v774_v59 = vadd.f32 %v773_v49, %v759_v13  ;;  %v811_v61 = vadd.f32 %v810_v45, %v796_v50  ;;  %v799_v2 = vmul.f32 %v761_v38, %v761_v38 }
 0x109   :  { %v394_v54 = vadd.f32 %v393_v42, %v379_v30  ;;  %v431_v55 = vadd.f32 %v430_v44, %v416_v43  ;;  %v679_v56 = vpack.c.bf16 %v1168_v52, %v1167_v41  ;;  %v297_v57 = vpack.c.bf16 %v265_v53, %v262_v14  ;;  %v646_v58 = vpop.f32.mrb[11].mxu1 }
 0x10a   :  { %1067 = vst [vmem:[%s1461_s6 + $0x28] sm:$0xff] %v298_v51   ;;  %v775_v3 = vadd.f32 %v774_v59, %v760_v34  ;;  %v812_v4 = vadd.f32 %v811_v61, %v797_v60  ;;  %v383_v5 = vunpack.c.l.bf16 %v298_v51  ;;  %v384_v6 = vunpack.c.h.bf16 %v298_v51 }
 0x10b   :  { %v432_v0 = vadd.f32 %v431_v55, %v417_v48  ;;  %1074 = vst [vmem:[%s1462_s7 + $0x28] sm:$0xff] %v679_v56   ;;  %1066 = vst [vmem:[%s1461_s6 + $0x20] sm:$0xff] %v297_v57   ;;  %v381_v1 = vunpack.c.l.bf16 %v297_v57  ;;  %v764_v7 = vunpack.c.l.bf16 %v679_v56  ;;  %v382_v8 = vunpack.c.h.bf16 %v297_v57 }
 0x10c   :  { %v395_v9 = vadd.f32 %v394_v54, %v380_v33  ;;  %v813_v11 = vadd.f32 %v812_v4, %v798_v63  ;;  %v678_v16 = vpack.c.bf16 %v646_v58, %v643_v46  ;;  %v765_v19 = vunpack.c.h.bf16 %v679_v56 }
 0x10d   :  { %v1139_v10 = vpop.f32.mrb[12].mxu0  ;;  %v419_v12 = vmul.f32 %v381_v1, %v381_v1  ;;  %v433_v15 = vadd.f32 %v432_v0, %v418_v62  ;;  %v420_v21 = vmul.f32 %v382_v8, %v382_v8  ;;  %v776_v22 = vadd.f32 %v775_v3, %v761_v38 }
 0x10e   :  { %v1171_v17 = vpop.f32.mrb[12].mxu1  ;;  %v278_v18 = vpop.f32.mrb[13].mxu0  ;;  %v396_v20 = vadd.f32 %v395_v9, %v381_v1  ;;  %1073 = vst [vmem:[%s1462_s7 + $0x20] sm:$0xff] %v678_v16   ;;  %v762_v26 = vunpack.c.l.bf16 %v678_v16  ;;  %v763_v27 = vunpack.c.h.bf16 %v678_v16  ;;  %v814_v28 = vadd.f32 %v813_v11, %v799_v2 }
 0x10f   :  { %v659_v23 = vpop.f32.mrb[13].mxu1  ;;  %v1140_v24 = vpop.f32.mrb[14].mxu0  ;;  %v434_v25 = vadd.f32 %v433_v15, %v419_v12  ;;  %v421_v36 = vmul.f32 %v383_v5, %v383_v5  ;;  %v422_v43 = vmul.f32 %v384_v6, %v384_v6  ;;  %v802_v44 = vmul.f32 %v764_v7, %v764_v7 }
 0x110   :  { %v1172_v29 = vpop.f32.mrb[14].mxu1  ;;  %v281_v30 = vpop.f32.mrb[15].mxu0  ;;  %v397_v31 = vadd.f32 %v396_v20, %v382_v8  ;;  %v300_v32 = vpack.c.bf16 %v1140_v24, %v1139_v10  ;;  %v777_v38 = vadd.f32 %v776_v22, %v762_v26  ;;  %v800_v39 = vmul.f32 %v762_v26, %v762_v26 }
 0x111   :  { %v681_v33 = vpack.c.bf16 %v1172_v29, %v1171_v17  ;;  %v299_v34 = vpack.c.bf16 %v281_v30, %v278_v18  ;;  %v662_v35 = vpop.f32.mrb[15].mxu1  ;;  %v435_v37 = vadd.f32 %v434_v25, %v420_v21  ;;  %v801_v14 = vmul.f32 %v763_v27, %v763_v27 }
 0x112   :  { %v398_v13 = vadd.f32 %v397_v31, %v383_v5  ;;  %1069 = vst [vmem:[%s1461_s6 + $0x38] sm:$0xff] %v300_v32   ;;  %v778_v41 = vadd.f32 %v777_v38, %v763_v27  ;;  %v815_v42 = vadd.f32 %v814_v28, %v800_v39  ;;  %v803_v45 = vmul.f32 %v765_v19, %v765_v19 }
 0x113   :  { %1076 = vst [vmem:[%s1462_s7 + $0x38] sm:$0xff] %v681_v33   ;;  %1068 = vst [vmem:[%s1461_s6 + $0x30] sm:$0xff] %v299_v34   ;;  %v436_v40 = vadd.f32 %v435_v37, %v421_v36  ;;  %v385_v46 = vunpack.c.l.bf16 %v299_v34  ;;  %v387_v49 = vunpack.c.l.bf16 %v300_v32  ;;  %v386_v50 = vunpack.c.h.bf16 %v299_v34 }
 0x114   :  { %v779_v47 = vadd.f32 %v778_v41, %v764_v7  ;;  %v816_v48 = vadd.f32 %v815_v42, %v801_v14  ;;  %v399_v51 = vadd.f32 %v398_v13, %v384_v6  ;;  %v680_v54 = vpack.c.bf16 %v662_v35, %v659_v23 }
 0x115   :  { %v423_v52 = vmul.f32 %v385_v46, %v385_v46  ;;  %v437_v53 = vadd.f32 %v436_v40, %v422_v43  ;;  %v388_v56 = vunpack.c.h.bf16 %v300_v32  ;;  %v424_v57 = vmul.f32 %v386_v50, %v386_v50 }
 0x116   :  { %v817_v55 = vadd.f32 %v816_v48, %v802_v44  ;;  %v780_v58 = vadd.f32 %v779_v47, %v765_v19  ;;  %v400_v59 = vadd.f32 %v399_v51, %v385_v46  ;;  %1075 = vst [vmem:[%s1462_s7 + $0x30] sm:$0xff] %v680_v54   ;;  %v766_v61 = vunpack.c.l.bf16 %v680_v54 }
 0x117   :  { %v438_v60 = vadd.f32 %v437_v53, %v423_v52  ;;  %v767_v62 = vunpack.c.h.bf16 %v680_v54  ;;  %v425_v63 = vmul.f32 %v387_v49, %v387_v49  ;;  %v768_v0 = vunpack.c.l.bf16 %v681_v33 }
 0x118   :  { %v818_v1 = vadd.f32 %v817_v55, %v803_v45  ;;  %v401_v2 = vadd.f32 %v400_v59, %v386_v50  ;;  %v781_v4 = vadd.f32 %v780_v58, %v766_v61  ;;  %v804_v5 = vmul.f32 %v766_v61, %v766_v61 }
 0x119   :  { %v439_v3 = vadd.f32 %v438_v60, %v424_v57  ;;  %v426_v6 = vmul.f32 %v388_v56, %v388_v56  ;;  %v769_v7 = vunpack.c.h.bf16 %v681_v33  ;;  %v805_v8 = vmul.f32 %v767_v62, %v767_v62 }
 0x11a   :  { %v402_v9 = vadd.f32 %v401_v2, %v387_v49  ;;  %v782_v11 = vadd.f32 %v781_v4, %v767_v62  ;;  %v819_v12 = vadd.f32 %v818_v1, %v804_v5  ;;  %v806_v15 = vmul.f32 %v768_v0, %v768_v0 }
 0x11b   :  { %v440_v10 = vadd.f32 %v439_v3, %v425_v63  ;;  %v807_v20 = vmul.f32 %v769_v7, %v769_v7 }
 0x11c   :  { %v403_v16 = vadd.f32 %v402_v9, %v388_v56  ;;  %v783_v18 = vadd.f32 %v782_v11, %v768_v0  ;;  %v820_v19 = vadd.f32 %v819_v12, %v805_v8 }
 0x11d   :  { %v441_v17 = vadd.f32 %v440_v10, %v426_v6 }
 0x11e   :  { %v404_v21 = vrot.slane %v403_v16, 4  ;;  %v784_v23 = vadd.f32 %v783_v18, %v769_v7  ;;  %v821_v24 = vadd.f32 %v820_v19, %v806_v15 }
 0x11f   :  { %v442_v22 = vrot.slane %v441_v17, 4 }
 0x120   :  { %v405_v25 = vadd.f32 %v404_v21, %v403_v16  ;;  %v785_v27 = vrot.slane %v784_v23, 4  ;;  %v822_v28 = vadd.f32 %v821_v24, %v807_v20 }
 0x121   :  { %v443_v26 = vadd.f32 %v442_v22, %v441_v17 }
 0x122   :  { %v406_v29 = vrot.slane %v405_v25, 2  ;;  %v786_v31 = vadd.f32 %v785_v27, %v784_v23  ;;  %v823_v32 = vrot.slane %v822_v28, 4 }
 0x123   :  { %v444_v30 = vrot.slane %v443_v26, 2 }
 0x124   :  { %v407_v33 = vadd.f32 %v406_v29, %v405_v25  ;;  %v787_v35 = vrot.slane %v786_v31, 2  ;;  %v824_v36 = vadd.f32 %v823_v32, %v822_v28 }
 0x125   :  { %v445_v34 = vadd.f32 %v444_v30, %v443_v26 }
 0x126   :  { %v408_v37 = vrot.slane %v407_v33, 1  ;;  %v788_v39 = vadd.f32 %v787_v35, %v786_v31  ;;  %v825_v13 = vrot.slane %v824_v36, 2 }
 0x127   :  { %v446_v38 = vrot.slane %v445_v34, 1 }
 0x128   :  { %v409_v40 = vadd.f32 %v408_v37, %v407_v33  ;;  %v789_v14 = vrot.slane %v788_v39, 1  ;;  %v826_v42 = vadd.f32 %v825_v13, %v824_v36 }
 0x129   :  { %v447_v41 = vadd.f32 %v446_v38, %v445_v34 }
 0x12a   :  { %410 = vst [vmem:[%s1463_s8] sm:$0x1] %v409_v40  ;;  %v790_v43 = vadd.f32 %v789_v14, %v788_v39  ;;  %v827_v44 = vrot.slane %v826_v42, 1 }
 0x12b   :  { %448 = vst [vmem:[%s1464_s9] sm:$0x1] %v447_v41 }
 0x12c   :  { %791 = vst [vmem:[%s1465_s10] sm:$0x1] %v790_v43  ;;  %v828_v45 = vadd.f32 %v827_v44, %v826_v42 }
 0x12e   :  { %829 = vst [vmem:[%s1466_s11] sm:$0x1] %v828_v45 }

// kernel: bottleneck_pallas.7
= control target key start
LH: loop header
LB: loop body
LE: loop exit
PB: predicated region body
PF: predicated region fallthrough
CT: control target
= control target key end

     0   :  { %s678_s0 = inlined_call_operand.vmem [shape: bf16[128,128], index: 0, kind: input, shape index: {}]   ;;  %s679_s1 = inlined_call_operand.vmem [shape: f32[1,128], index: 1, kind: input, shape index: {}]   ;;  %s680_s2 = inlined_call_operand.vmem [shape: f32[1,128], index: 2, kind: input, shape index: {}]   ;;  %s681_s3 = inlined_call_operand.vmem [shape: bf16[128,128], index: 3, kind: input, shape index: {}]   ;;  %s682_s4 = inlined_call_operand.vmem [shape: f32[1,128], index: 4, kind: input, shape index: {}]   ;;  %s683_s5 = inlined_call_operand.vmem [shape: f32[1,128], index: 5, kind: input, shape index: {}]   ;;  %s684_s6 = inlined_call_operand.hbm [shape: bf16[128,128], index: 6, kind: output, shape index: {}]  }
   0x1   :  { %v345_v0 = vld [vmem:[%s678_s0] sm:$0xff]   ;;  %v448_v9 = vld [vmem:[%s678_s0 + $0x8] sm:$0xff]   ;;  %v449_v20 = vld [vmem:[%s678_s0 + $0x10] sm:$0xff]  }
   0x2   :  { %v540_v1 = vld [vmem:[%s679_s1] ss:$0 sm:$0xff]  ;;  %v346_v2 = vunpack.c.l.bf16 %v345_v0  ;;  %v347_v3 = vunpack.c.h.bf16 %v345_v0  ;;  %v455_v10 = vld [vmem:[%s681_s3 + $0x8] sm:$0xff]   ;;  %v350_v14 = vunpack.c.l.bf16 %v448_v9  ;;  %v351_v15 = vunpack.c.h.bf16 %v448_v9  ;;  %v456_v29 = vld [vmem:[%s681_s3 + $0x10] sm:$0xff]  }
   0x3   :  { %v377_v4 = vld [vmem:[%s681_s3] sm:$0xff]   ;;  %v382_v18 = vunpack.c.l.bf16 %v455_v10  ;;  %v383_v19 = vunpack.c.h.bf16 %v455_v10 }
   0x4   :  { %v548_v5 = vld [vmem:[%s682_s4] ss:$0 sm:$0xff]  ;;  %v378_v7 = vunpack.c.l.bf16 %v377_v4  ;;  %v379_v8 = vunpack.c.h.bf16 %v377_v4  ;;  %v63_v11 = vmul.f32 %v346_v2, %v540_v1  ;;  %v64_v12 = vmul.f32 %v347_v3, %v540_v1 }
   0x5   :  { %v553_v6 = vld [vmem:[%s680_s2] ss:$0 sm:$0xff]  ;;  %v65_v23 = vmul.f32 %v350_v14, %v540_v1  ;;  %v66_v24 = vmul.f32 %v351_v15, %v540_v1  ;;  %v143_v27 = vmul.f32 %v382_v18, %v548_v5  ;;  %v144_v28 = vmul.f32 %v383_v19, %v548_v5 }
   0x6   :  { %v566_v13 = vld [vmem:[%s683_s5] ss:$0 sm:$0xff]  ;;  %v141_v16 = vmul.f32 %v378_v7, %v548_v5  ;;  %v142_v17 = vmul.f32 %v379_v8, %v548_v5  ;;  %v86_v21 = vadd.f32 %v553_v6, %v63_v11  ;;  %v87_v22 = vadd.f32 %v553_v6, %v64_v12 }
   0x8   :  { %v164_v25 = vadd.f32 %v566_v13, %v141_v16  ;;  %v165_v26 = vadd.f32 %v566_v13, %v142_v17 }
   0x9   :  { %11 = vsyncpa [#allocation3], 0  ;;  %v88_v30 = vadd.f32 %v553_v6, %v65_v23  ;;  %v89_v31 = vadd.f32 %v553_v6, %v66_v24  ;;  %v354_v32 = vunpack.c.l.bf16 %v449_v20  ;;  %v355_v33 = vunpack.c.h.bf16 %v449_v20  ;;  %v450_v42 = vld [vmem:[%s678_s0 + $0x18] sm:$0xff]   ;;  %v451_v52 = vld [vmem:[%s678_s0 + $0x20] sm:$0xff]  }
   0xa   :  { %v180_v34 = vadd.f32 %v164_v25, %v86_v21  ;;  %v181_v35 = vadd.f32 %v165_v26, %v87_v22  ;;  %v166_v36 = vadd.f32 %v566_v13, %v143_v27  ;;  %v167_v37 = vadd.f32 %v566_v13, %v144_v28  ;;  %v457_v47 = vld [vmem:[%s681_s3 + $0x18] sm:$0xff]   ;;  %v458_v8 = vld [vmem:[%s681_s3 + $0x20] sm:$0xff]   ;;  %v452_v14 = vld [vmem:[%s678_s0 + $0x28] sm:$0xff]  }
   0xb   :  { %v67_v38 = vmul.f32 %v354_v32, %v540_v1  ;;  %v68_v39 = vmul.f32 %v355_v33, %v540_v1  ;;  %v386_v40 = vunpack.c.l.bf16 %v456_v29  ;;  %v387_v41 = vunpack.c.h.bf16 %v456_v29  ;;  %v459_v23 = vld [vmem:[%s681_s3 + $0x28] sm:$0xff]   ;;  %v453_v32 = vld [vmem:[%s678_s0 + $0x30] sm:$0xff]  }
   0xc   :  { %v196_v43 = vmax.f32 %v180_v34, 0.0  ;;  %v197_v44 = vmax.f32 %v181_v35, 0.0  ;;  %v182_v45 = vadd.f32 %v166_v36, %v88_v30  ;;  %v183_v46 = vadd.f32 %v167_v37, %v89_v31 }
   0xd   :  { %v90_v48 = vadd.f32 %v553_v6, %v67_v38  ;;  %v91_v49 = vadd.f32 %v553_v6, %v68_v39  ;;  %v145_v50 = vmul.f32 %v386_v40, %v548_v5  ;;  %v146_v51 = vmul.f32 %v387_v41, %v548_v5 }
   0xe   :  { %v411_v53 = vpack.c.bf16 %v197_v44, %v196_v43  ;;  %v198_v54 = vmax.f32 %v182_v45, 0.0  ;;  %v199_v55 = vmax.f32 %v183_v46, 0.0  ;;  %v358_v56 = vunpack.c.l.bf16 %v450_v42  ;;  %v460_v45 = vld [vmem:[%s681_s3 + $0x30] sm:$0xff]  }
   0xf   :  { %v168_v57 = vadd.f32 %v566_v13, %v145_v50  ;;  %v169_v58 = vadd.f32 %v566_v13, %v146_v51  ;;  %v359_v59 = vunpack.c.h.bf16 %v450_v42  ;;  %v390_v60 = vunpack.c.l.bf16 %v457_v47 }
  0x10   :  { %412 = vst [vmem:[#allocation2] sm:$0xff] %v411_v53   ;;  %v416_v61 = vpack.c.bf16 %v199_v55, %v198_v54  ;;  %v69_v62 = vmul.f32 %v358_v56, %v540_v1  ;;  %v391_v63 = vunpack.c.h.bf16 %v457_v47  ;;  %v362_v0 = vunpack.c.l.bf16 %v451_v52  ;;  %v454_v54 = vld [vmem:[%s678_s0 + $0x38] sm:$0xff]  }
  0x11   :  { %v184_v2 = vadd.f32 %v168_v57, %v90_v48  ;;  %v185_v3 = vadd.f32 %v169_v58, %v91_v49  ;;  %v70_v4 = vmul.f32 %v359_v59, %v540_v1  ;;  %v147_v7 = vmul.f32 %v390_v60, %v548_v5 }
  0x12   :  { %462 = vst [vmem:[#allocation2 + $0x8] sm:$0xff] %v416_v61   ;;  %v92_v9 = vadd.f32 %v553_v6, %v69_v62  ;;  %v148_v10 = vmul.f32 %v391_v63, %v548_v5  ;;  %v363_v11 = vunpack.c.h.bf16 %v451_v52  ;;  %v71_v12 = vmul.f32 %v362_v0, %v540_v1 }
  0x13   :  { %v200_v15 = vmax.f32 %v184_v2, 0.0  ;;  %v201_v16 = vmax.f32 %v185_v3, 0.0  ;;  %v93_v17 = vadd.f32 %v553_v6, %v70_v4  ;;  %v170_v18 = vadd.f32 %v566_v13, %v147_v7  ;;  %v461_v4 = vld [vmem:[%s681_s3 + $0x38] sm:$0xff]   ;;  %s496_s3 = smov [#allocation2]  }
  0x14   :  { %v171_v19 = vadd.f32 %v566_v13, %v148_v10  ;;  %v72_v20 = vmul.f32 %v363_v11, %v540_v1  ;;  %v94_v21 = vadd.f32 %v553_v6, %v71_v12  ;;  %v394_v22 = vunpack.c.l.bf16 %v458_v8  ;;  %s297_s7 = sshll.u32 %s496_s3, 4  ;;  %s298_s7 = int_to_ptr.vmem [resolvable:$true] %s297_s7 }
  0x15   :  { %v421_v24 = vpack.c.bf16 %v201_v16, %v200_v15  ;;  %v186_v25 = vadd.f32 %v170_v18, %v92_v9  ;;  %v395_v26 = vunpack.c.h.bf16 %v458_v8  ;;  %v366_v27 = vunpack.c.l.bf16 %v452_v14  ;;  %s472_s8 = scalar_lea.vmem %s298_s7, 1024  ;;  %p477_p1 = scmp.lt.s32.totalorder %s298_s7, %s298_s7 }
  0x16   :  { %v187_v28 = vadd.f32 %v171_v19, %v93_v17  ;;  %v95_v29 = vadd.f32 %v553_v6, %v72_v20  ;;  %v149_v30 = vmul.f32 %v394_v22, %v548_v5  ;;  %v367_v31 = vunpack.c.h.bf16 %v452_v14  ;;  %p473_p0 = scmp.ne.s32.totalorder %s298_s7, %s472_s8  ;;  %p478_p2 = scmp.lt.s32.totalorder %s472_s8, %s472_s8 }
  0x17   :  { %463 = vst [vmem:[#allocation2 + $0x10] sm:$0xff] %v421_v24   ;;  %v202_v33 = vmax.f32 %v186_v25, 0.0  ;;  %v150_v34 = vmul.f32 %v395_v26, %v548_v5  ;;  %v73_v35 = vmul.f32 %v366_v27, %v540_v1  ;;  %v398_v36 = vunpack.c.l.bf16 %v459_v23 }
  0x18   :  { %v203_v37 = vmax.f32 %v187_v28, 0.0  ;;  %v172_v38 = vadd.f32 %v566_v13, %v149_v30  ;;  %v74_v39 = vmul.f32 %v367_v31, %v540_v1  ;;  %v399_v40 = vunpack.c.h.bf16 %v459_v23  ;;  %p479_p3 = por %p478_p2, %p477_p1 }
  0x19   :  { %v173_v41 = vadd.f32 %v566_v13, %v150_v34  ;;  %v96_v42 = vadd.f32 %v553_v6, %v73_v35  ;;  %v151_v43 = vmul.f32 %v398_v36, %v548_v5  ;;  %v370_v44 = vunpack.c.l.bf16 %v453_v32 }
  0x1a   :  { %v426_v46 = vpack.c.bf16 %v203_v37, %v202_v33  ;;  %v188_v47 = vadd.f32 %v172_v38, %v94_v21  ;;  %v97_v48 = vadd.f32 %v553_v6, %v74_v39  ;;  %v152_v49 = vmul.f32 %v399_v40, %v548_v5  ;;  %p480_p4 = pnand %p479_p3, %p473_p0 }
  0x1b   :  { %v189_v50 = vadd.f32 %v173_v41, %v95_v29  ;;  %v174_v51 = vadd.f32 %v566_v13, %v151_v43  ;;  %v371_v52 = vunpack.c.h.bf16 %v453_v32  ;;  %v75_v53 = vmul.f32 %v370_v44, %v540_v1 }
  0x1c   :  { %464 = vst [vmem:[#allocation2 + $0x18] sm:$0xff] %v426_v46   ;;  %v204_v55 = vmax.f32 %v188_v47, 0.0  ;;  %v175_v56 = vadd.f32 %v566_v13, %v152_v49  ;;  %v402_v57 = vunpack.c.l.bf16 %v460_v45  ;;  %v403_v58 = vunpack.c.h.bf16 %v460_v45 }
  0x1d   :  { %v205_v59 = vmax.f32 %v189_v50, 0.0  ;;  %v190_v60 = vadd.f32 %v174_v51, %v96_v42  ;;  %v76_v61 = vmul.f32 %v371_v52, %v540_v1  ;;  %v98_v62 = vadd.f32 %v553_v6, %v75_v53 }
  0x1e   :  { %v191_v63 = vadd.f32 %v175_v56, %v97_v48  ;;  %v153_v0 = vmul.f32 %v402_v57, %v548_v5  ;;  %v154_v2 = vmul.f32 %v403_v58, %v548_v5  ;;  %v374_v3 = vunpack.c.l.bf16 %v454_v54 }
  0x1f   :  { %v431_v7 = vpack.c.bf16 %v205_v59, %v204_v55  ;;  %v206_v8 = vmax.f32 %v190_v60, 0.0  ;;  %v99_v9 = vadd.f32 %v553_v6, %v76_v61  ;;  %v375_v10 = vunpack.c.h.bf16 %v454_v54 }
  0x20   :  { %v207_v11 = vmax.f32 %v191_v63, 0.0  ;;  %v176_v12 = vadd.f32 %v566_v13, %v153_v0  ;;  %v177_v14 = vadd.f32 %v566_v13, %v154_v2  ;;  %v77_v15 = vmul.f32 %v374_v3, %v540_v1 }
  0x21   :  { %465 = vst [vmem:[#allocation2 + $0x20] sm:$0xff] %v431_v7   ;;  %v78_v16 = vmul.f32 %v375_v10, %v540_v1  ;;  %v406_v17 = vunpack.c.l.bf16 %v461_v4  ;;  %v407_v18 = vunpack.c.h.bf16 %v461_v4 }
  0x22   :  { %v436_v19 = vpack.c.bf16 %v207_v11, %v206_v8  ;;  %v192_v20 = vadd.f32 %v176_v12, %v98_v62  ;;  %v193_v21 = vadd.f32 %v177_v14, %v99_v9  ;;  %v100_v22 = vadd.f32 %v553_v6, %v77_v15 }
  0x23   :  { %v101_v23 = vadd.f32 %v553_v6, %v78_v16  ;;  %v155_v24 = vmul.f32 %v406_v17, %v548_v5  ;;  %v156_v25 = vmul.f32 %v407_v18, %v548_v5 }
  0x24   :  { %466 = vst [vmem:[#allocation2 + $0x28] sm:$0xff] %v436_v19   ;;  %v208_v26 = vmax.f32 %v192_v20, 0.0  ;;  %v209_v27 = vmax.f32 %v193_v21, 0.0 }
  0x25   :  { %v178_v28 = vadd.f32 %v566_v13, %v155_v24  ;;  %v179_v1 = vadd.f32 %v566_v13, %v156_v25 }
  0x26   :  { %v441_v29 = vpack.c.bf16 %v209_v27, %v208_v26 }
  0x27   :  { %v194_v30 = vadd.f32 %v178_v28, %v100_v22  ;;  %v195_v31 = vadd.f32 %v179_v1, %v101_v23 }
  0x28   :  { %467 = vst [vmem:[#allocation2 + $0x30] sm:$0xff] %v441_v29  }
  0x29   :  { %v210_v32 = vmax.f32 %v194_v30, 0.0  ;;  %v211_v33 = vmax.f32 %v195_v31, 0.0 }
  0x2b   :  { %v446_v6 = vpack.c.bf16 %v211_v33, %v210_v32 }
  0x2d   :  { %468 = vst [vmem:[#allocation2 + $0x38] sm:$0xff] %v446_v6  }
  0x2e   :  { %483 = shalt.err (!%p480_p4)
}
  0x2f   :  { %s484_s10 = scalar_lea.hbm %s684_s6, 1024 }
  0x30   :  { %p485_p5 = scmp.ne.s32.totalorder %s684_s6, %s484_s10  ;;  %p488_p6 = scmp.lt.u32.totalorder %s484_s10, %s684_s6 }
  0x32   :  { %p490_p7 = pnand %p488_p6, %p485_p5 }
  0x34   :  { %493 = shalt.err (!%p490_p7)
}
  0x35   :  { %s497_s13 = smov 64   ;;  %s498_s14 = smov 4  }
  0x36   :  { %303 = dma.vmem_to_hbm [thread:$0]  %s298_s7, 1024, %s684_s6, [#allocation3], %s497_s13, %s497_s13, %s498_s14  }
  0x37   :  { %494 = dma.done.wait [#allocation3], 1024  }
  0x38   :  { %495 = vsyncadd [#allocation3], 4294966272 }
  0x39   :  { %307 = vsyncpa [#allocation3], 1 }

</bundles_post_ra>
